<compile_context>
chip_gen: v7x
topology: tpu7x:2x2x1
jax: 0.10.0
libtpu: 0.0.40
codegen_flags: <defaults>
</compile_context>

<pallas_src>
import functools

import jax
import jax.numpy as jnp
from jax.experimental import pallas as pl
from jax.experimental.pallas import tpu as pltpu


# ------------------------------------------------------------------------
# Single fused kernel.  One grid step per batch element.
# ------------------------------------------------------------------------
def _fused_kernel(up_ref, dn_ref,
                  wu_ref, bu_ref, cu1_ref, cu2_ref, su_ref,
                  wd_ref, bd_ref, cd1_ref, cd2_ref, sd_ref,
                  f1w_ref, f1b_ref, f2w_ref, f2b_ref, f3w_ref, f3b_ref,
                  w3_ref, b3_ref, w1_ref, b1_ref,
                  o_ref,
                  sa_pad_ref, x_pad_ref, col_ref,
                  *, H, W):
    f32 = jnp.float32
    HW = H * W
    PAD = W + 1                         # halo width; covers |dy*W + dx| <= W+1
    C2 = x_pad_ref.shape[0]             # 2*U

    # Column-validity masks for the horizontal taps (dx = -1 / +1).  Row wrap
    # is handled by the zero halo of the padded scratches; only the column
    # wrap (j+dx outside [0, W)) needs masking.
    col_idx = jax.lax.broadcasted_iota(jnp.int32, (1, HW), 1) % W
    mask_m = (col_idx >= 1).astype(f32)          # dx = -1
    mask_p = (col_idx <= W - 2).astype(f32)      # dx = +1

    def col_mask(dx):
        return None if dx == 0 else (mask_m if dx < 0 else mask_p)

    # Zero only the (constant) halos; interiors are fully rewritten each step.
    for ref in (sa_pad_ref, x_pad_ref):
        rows = ref.shape[0]
        ref[:, 0:PAD] = jnp.zeros((rows, PAD), f32)
        ref[:, PAD + HW:] = jnp.zeros((rows, PAD), f32)

    def branch(x, w_ref, b_ref, ca1_ref, ca2_ref, sa_ref):
        # 1x1 conv (BN folded) + ReLU: (C, Cin) @ (Cin, HW) -> (C, HW)
        h = jnp.maximum(
            jnp.dot(w_ref[...], x, preferred_element_type=f32) + b_ref[...],
            0.0)
        # ---- Channel attention: shared MLP on spatial avg / max columns ----
        avg = jnp.mean(h, axis=1, keepdims=True)                  # (C, 1)
        mx = jnp.max(h, axis=1, keepdims=True)                    # (C, 1)
        hid_a = jnp.maximum(
            jnp.dot(ca1_ref[...], avg, preferred_element_type=f32), 0.0)
        hid_m = jnp.maximum(
            jnp.dot(ca1_ref[...], mx, preferred_element_type=f32), 0.0)
        att = jax.nn.sigmoid(
            jnp.dot(ca2_ref[...], hid_a, preferred_element_type=f32)
            + jnp.dot(ca2_ref[...], hid_m, preferred_element_type=f32))
        y = h * att                                               # (C, HW)
        # ---- Spatial attention: 3x3 conv (2->1, pad 1, no bias) ----
        sa_pad_ref[0:1, PAD:PAD + HW] = jnp.mean(y, axis=0, keepdims=True)
        sa_pad_ref[1:2, PAD:PAD + HW] = jnp.max(y, axis=0, keepdims=True)
        logits = jnp.zeros((1, HW), f32)
        k = 0
        for dy in (-1, 0, 1):
            for dx in (-1, 0, 1):
                off = PAD + dy * W + dx
                win0 = sa_pad_ref[0:1, off:off + HW]
                win1 = sa_pad_ref[1:2, off:off + HW]
                contrib = sa_ref[2 * k] * win0 + sa_ref[2 * k + 1] * win1
                m = col_mask(dx)
                if m is not None:
                    contrib = contrib * m
                logits = logits + contrib
                k += 1
        out = y * jax.nn.sigmoid(logits)
        gap = jnp.mean(out, axis=1, keepdims=True)                # (C, 1)
        return out, gap

    up_y, up_gap = branch(up_ref[0], wu_ref, bu_ref, cu1_ref, cu2_ref, su_ref)
    dn_y, dn_gap = branch(dn_ref[0], wd_ref, bd_ref, cd1_ref, cd2_ref, sd_ref)

    # ---- fc branch:  fc_3(fc_1(up_gap) + fc_2(down_gap))  (column vectors) ----
    fa = jnp.dot(f1w_ref[...], up_gap, preferred_element_type=f32) + f1b_ref[...]
    fb = jnp.dot(f2w_ref[...], dn_gap, preferred_element_type=f32) + f2b_ref[...]
    wgt = jnp.dot(f3w_ref[...], fa + fb,
                  preferred_element_type=f32) + f3b_ref[...]      # (U, 1)
    scale = wgt + 1.0                                             # x*w + x

    # ---- residual re-weighting + channel concat into the padded scratch ----
    U = up_y.shape[0]
    x_pad_ref[0:U, PAD:PAD + HW] = up_y * scale
    x_pad_ref[U:C2, PAD:PAD + HW] = dn_y * scale

    # ---- 3x3 conv (+BN folded, channel shuffle folded into weights) as one
    #      im2col matmul:  (Co, 9*2U) @ (9*2U, HW) ----
    k = 0
    for dy in (-1, 0, 1):
        for dx in (-1, 0, 1):
            off = PAD + dy * W + dx
            win = x_pad_ref[:, off:off + HW]
            m = col_mask(dx)
            if m is not None:
                win = win * m
            col_ref[k * C2:(k + 1) * C2, :] = win
            k += 1
    h3 = jnp.maximum(
        jnp.dot(w3_ref[...], col_ref[...], preferred_element_type=f32)
        + b3_ref[...], 0.0)                                       # (Co, HW)
    # ---- final 1x1 conv (+BN folded) + ReLU ----
    y = jnp.maximum(
        jnp.dot(w1_ref[...], h3, preferred_element_type=f32) + b1_ref[...], 0.0)
    o_ref[...] = y[None].astype(o_ref.dtype)


# ------------------------------------------------------------------------
# Parameters (deterministic synthetic init; BN folded, eval mode, eps=1e-5).
# Weights are stored in the (out, in) / (Co, 9*2U) layouts the kernel consumes.
# ------------------------------------------------------------------------
def init_params(key, U, D):
    keys = iter(jax.random.split(key, 40))
    nrm = lambda shape, s=0.1: s * jax.random.normal(next(keys), shape, jnp.float32)

    def bn(C):
        g = 0.5 + jax.random.uniform(next(keys), (C,), jnp.float32)
        beta = nrm((C,))
        mean = nrm((C,))
        var = 0.5 + jax.random.uniform(next(keys), (C,), jnp.float32)
        return g, beta, mean, var

    def fold(w, bias, bn_params, eps=1e-5):
        # w carries output channels on axis 0
        g, beta, mean, var = bn_params
        s = g / jnp.sqrt(var + eps)
        return w * s.reshape((-1,) + (1,) * (w.ndim - 1)), (bias - mean) * s + beta

    Co = U // 2
    r = max(U // 16, 1)
    p = {}
    w, b = fold(nrm((U, U)), nrm((U,)), bn(U))
    p["w_s1_up"], p["b_s1_up"] = w, b.reshape(U, 1)
    w, b = fold(nrm((U, D)), nrm((U,)), bn(U))
    p["w_s1_dn"], p["b_s1_dn"] = w, b.reshape(U, 1)
    p["ca_up_w1"], p["ca_up_w2"] = nrm((r, U)), nrm((U, r))
    p["sa_up_w"] = nrm((3, 3, 2)).reshape(-1)
    p["ca_dn_w1"], p["ca_dn_w2"] = nrm((r, U)), nrm((U, r))
    p["sa_dn_w"] = nrm((3, 3, 2)).reshape(-1)
    for name in ("fc1", "fc2", "fc3"):
        p[name + "_w"] = nrm((U, U))
        p[name + "_b"] = nrm((U,)).reshape(U, 1)
    # 3x3 conv (2U -> Co) + BN, with channel_shuffle(groups=4) folded into the
    # input-channel axis: shuffled[k] = concat[perm(k)], perm(k) = (k%4)*cpg + k//4,
    # so w_folded[:, m] = w[:, perm^{-1}(m)], perm^{-1}(m) = (m%cpg)*4 + m//cpg.
    w3, b3 = fold(nrm((Co, 2 * U, 3, 3)), nrm((Co,)), bn(Co))
    groups, cpg = 4, (2 * U) // 4
    m = jnp.arange(2 * U)
    inv_perm = (m % cpg) * groups + m // cpg
    w3 = w3[:, inv_perm, :, :]
    # -> (Co, 9*2U), laid out [(ky,kx) major, ci minor] matching the kernel im2col.
    p["conv3_w"] = jnp.transpose(w3, (0, 2, 3, 1)).reshape(Co, 9 * 2 * U)
    p["conv3_b"] = b3.reshape(Co, 1)
    w, b = fold(nrm((Co, Co)), nrm((Co,)), bn(Co))
    p["conv1_w"], p["conv1_b"] = w, b.reshape(Co, 1)
    return p


# ------------------------------------------------------------------------
# Full forward (wrapper takes NCHW like the PyTorch module).
# ------------------------------------------------------------------------
def module_1_start_forward(up_nchw, down_nchw, p):
    B, U, H, W = up_nchw.shape
    D = down_nchw.shape[1]
    Co = U // 2
    HW = H * W
    r = p["ca_up_w1"].shape[0]

    # bilinear, align_corners=False == half-pixel centers
    down = jax.image.resize(down_nchw, (B, D, H, W), method="bilinear",
                            antialias=False)
    up2 = up_nchw.reshape(B, U, HW)        # channels-on-sublanes, spatial-on-lanes
    dn2 = down.reshape(B, D, HW)

    def rep(shape):
        n = len(shape)
        return pl.BlockSpec(shape, lambda b, n=n: (0,) * n)

    smem = pl.BlockSpec(memory_space=pltpu.MemorySpace.SMEM)
    padw = HW + 2 * (W + 1)

    out = pl.pallas_call(
        functools.partial(_fused_kernel, H=H, W=W),
        out_shape=jax.ShapeDtypeStruct((B, Co, HW), jnp.float32),
        grid=(B,),
        in_specs=[
            pl.BlockSpec((1, U, HW), lambda b: (b, 0, 0)),
            pl.BlockSpec((1, D, HW), lambda b: (b, 0, 0)),
            rep((U, U)), rep((U, 1)), rep((r, U)), rep((U, r)), smem,
            rep((U, D)), rep((U, 1)), rep((r, U)), rep((U, r)), smem,
            rep((U, U)), rep((U, 1)), rep((U, U)), rep((U, 1)),
            rep((U, U)), rep((U, 1)),
            rep((Co, 9 * 2 * U)), rep((Co, 1)), rep((Co, Co)), rep((Co, 1)),
        ],
        out_specs=pl.BlockSpec((1, Co, HW), lambda b: (b, 0, 0)),
        scratch_shapes=[
            pltpu.VMEM((2, padw), jnp.float32),          # SA padded [mean;max]
            pltpu.VMEM((2 * U, padw), jnp.float32),      # padded concat for tail conv
            pltpu.VMEM((9 * 2 * U, HW), jnp.float32),    # im2col
        ],
        compiler_params=pltpu.CompilerParams(
            dimension_semantics=("parallel",)),
    )(up2, dn2,
      p["w_s1_up"], p["b_s1_up"], p["ca_up_w1"], p["ca_up_w2"], p["sa_up_w"],
      p["w_s1_dn"], p["b_s1_dn"], p["ca_dn_w1"], p["ca_dn_w2"], p["sa_dn_w"],
      p["fc1_w"], p["fc1_b"], p["fc2_w"], p["fc2_b"], p["fc3_w"], p["fc3_b"],
      p["conv3_w"], p["conv3_b"], p["conv1_w"], p["conv1_b"])
    return out.reshape(B, Co, H, W)                      # already NCHW


if __name__ == "__main__":
    key = jax.random.PRNGKey(0)
    U, D = 32, 16            # upchannel, downchannel
    B, H, W = 2, 16, 16
    kp, ku, kd = jax.random.split(key, 3)

    params = init_params(kp, U, D)
    up = jax.random.normal(ku, (B, U, H, W), jnp.float32)          # NCHW
    down = jax.random.normal(kd, (B, D, H // 2, W // 2), jnp.float32)

    fwd = jax.jit(module_1_start_forward)
    out = jax.block_until_ready(fwd(up, down, params))
    assert out.shape == (B, U // 2, H, W), out.shape
    assert bool(jnp.all(jnp.isfinite(out)))
    print("KERNEL_OK")
</pallas_src>

<mosaic_0001>
module attributes {stable_mosaic.version = 11 : i64} {
  func.func @_fused_kernel(%arg0: i32, %arg1: memref<1x32x256xf32, #tpu.memory_space<vmem>>, %arg2: memref<1x16x256xf32, #tpu.memory_space<vmem>>, %arg3: memref<32x32xf32, #tpu.memory_space<vmem>>, %arg4: memref<32x1xf32, #tpu.memory_space<vmem>>, %arg5: memref<2x32xf32, #tpu.memory_space<vmem>>, %arg6: memref<32x2xf32, #tpu.memory_space<vmem>>, %arg7: memref<18xf32, #tpu.memory_space<smem>>, %arg8: memref<32x16xf32, #tpu.memory_space<vmem>>, %arg9: memref<32x1xf32, #tpu.memory_space<vmem>>, %arg10: memref<2x32xf32, #tpu.memory_space<vmem>>, %arg11: memref<32x2xf32, #tpu.memory_space<vmem>>, %arg12: memref<18xf32, #tpu.memory_space<smem>>, %arg13: memref<32x32xf32, #tpu.memory_space<vmem>>, %arg14: memref<32x1xf32, #tpu.memory_space<vmem>>, %arg15: memref<32x32xf32, #tpu.memory_space<vmem>>, %arg16: memref<32x1xf32, #tpu.memory_space<vmem>>, %arg17: memref<32x32xf32, #tpu.memory_space<vmem>>, %arg18: memref<32x1xf32, #tpu.memory_space<vmem>>, %arg19: memref<16x576xf32, #tpu.memory_space<vmem>>, %arg20: memref<16x1xf32, #tpu.memory_space<vmem>>, %arg21: memref<16x16xf32, #tpu.memory_space<vmem>>, %arg22: memref<16x1xf32, #tpu.memory_space<vmem>>, %arg23: memref<1x16x256xf32, #tpu.memory_space<vmem>>, %arg24: memref<2x290xf32, #tpu.memory_space<vmem>>, %arg25: memref<64x290xf32, #tpu.memory_space<vmem>>, %arg26: memref<576x256xf32, #tpu.memory_space<vmem>>) attributes {dimension_semantics = [#tpu.dimension_semantics<parallel>], iteration_bounds = array<i64: 2>, scalar_prefetch = 0 : i64, scratch_operands = 3 : i64, tpu.core_type = #tpu.core_type<tc>, window_params = [{transform_indices = @transform_0, window_bounds = array<i64: 1, 32, 256>}, {transform_indices = @transform_1, window_bounds = array<i64: 1, 16, 256>}, {pipeline_mode = #tpu.pipeline_mode<synchronous>, transform_indices = @transform_2, window_bounds = array<i64: 32, 32>}, {pipeline_mode = #tpu.pipeline_mode<synchronous>, transform_indices = @transform_3, window_bounds = array<i64: 32, 1>}, {pipeline_mode = #tpu.pipeline_mode<synchronous>, transform_indices = @transform_4, window_bounds = array<i64: 2, 32>}, {pipeline_mode = #tpu.pipeline_mode<synchronous>, transform_indices = @transform_5, window_bounds = array<i64: 32, 2>}, {transform_indices = @transform_6, window_bounds = array<i64: 18>}, {pipeline_mode = #tpu.pipeline_mode<synchronous>, transform_indices = @transform_7, window_bounds = array<i64: 32, 16>}, {pipeline_mode = #tpu.pipeline_mode<synchronous>, transform_indices = @transform_8, window_bounds = array<i64: 32, 1>}, {pipeline_mode = #tpu.pipeline_mode<synchronous>, transform_indices = @transform_9, window_bounds = array<i64: 2, 32>}, {pipeline_mode = #tpu.pipeline_mode<synchronous>, transform_indices = @transform_10, window_bounds = array<i64: 32, 2>}, {transform_indices = @transform_11, window_bounds = array<i64: 18>}, {pipeline_mode = #tpu.pipeline_mode<synchronous>, transform_indices = @transform_12, window_bounds = array<i64: 32, 32>}, {pipeline_mode = #tpu.pipeline_mode<synchronous>, transform_indices = @transform_13, window_bounds = array<i64: 32, 1>}, {pipeline_mode = #tpu.pipeline_mode<synchronous>, transform_indices = @transform_14, window_bounds = array<i64: 32, 32>}, {pipeline_mode = #tpu.pipeline_mode<synchronous>, transform_indices = @transform_15, window_bounds = array<i64: 32, 1>}, {pipeline_mode = #tpu.pipeline_mode<synchronous>, transform_indices = @transform_16, window_bounds = array<i64: 32, 32>}, {pipeline_mode = #tpu.pipeline_mode<synchronous>, transform_indices = @transform_17, window_bounds = array<i64: 32, 1>}, {pipeline_mode = #tpu.pipeline_mode<synchronous>, transform_indices = @transform_18, window_bounds = array<i64: 16, 576>}, {pipeline_mode = #tpu.pipeline_mode<synchronous>, transform_indices = @transform_19, window_bounds = array<i64: 16, 1>}, {pipeline_mode = #tpu.pipeline_mode<synchronous>, transform_indices = @transform_20, window_bounds = array<i64: 16, 16>}, {pipeline_mode = #tpu.pipeline_mode<synchronous>, transform_indices = @transform_21, window_bounds = array<i64: 16, 1>}, {transform_indices = @transform_22, window_bounds = array<i64: 1, 16, 256>}]} {
    %0 = tpu.iota {dimensions = array<i32: 1>} : vector<1x256xi32>
    %c16_i32 = arith.constant 16 : i32
    %c0_i32 = arith.constant 0 : i32
    %1 = arith.cmpi eq, %c16_i32, %c0_i32 : i32
    %c1_i32 = arith.constant 1 : i32
    %2 = arith.select %1, %c1_i32, %c16_i32 : i32
    %3 = vector.broadcast %2 : i32 to vector<1x256xi32>
    %4 = arith.remsi %0, %3 : vector<1x256xi32>
    %c0_i32_0 = arith.constant 0 : i32
    %5 = vector.broadcast %c0_i32_0 : i32 to vector<1x256xi32>
    %6 = arith.cmpi ne, %4, %5 : vector<1x256xi32>
    %c0_i32_1 = arith.constant 0 : i32
    %7 = vector.broadcast %c0_i32_1 : i32 to vector<1x256xi32>
    %8 = arith.cmpi slt, %4, %7 : vector<1x256xi32>
    %c0_i32_2 = arith.constant 0 : i32
    %9 = arith.cmpi slt, %2, %c0_i32_2 : i32
    %10 = vector.broadcast %9 : i1 to vector<1x256xi1>
    %11 = vector.broadcast %10 : vector<1x256xi1> to vector<1x256xi1>
    %12 = arith.xori %8, %11 : vector<1x256xi1>
    %13 = arith.andi %12, %6 : vector<1x256xi1>
    %14 = vector.broadcast %2 : i32 to vector<1x256xi32>
    %15 = arith.addi %4, %14 : vector<1x256xi32>
    %16 = arith.select %13, %15, %4 : vector<1x256xi1>, vector<1x256xi32>
    %c1_i32_3 = arith.constant 1 : i32
    %17 = vector.broadcast %c1_i32_3 : i32 to vector<1x256xi32>
    %18 = arith.cmpi sge, %16, %17 : vector<1x256xi32>
    %19 = arith.extui %18 : vector<1x256xi1> to vector<1x256xi32>
    %20 = arith.sitofp %19 : vector<1x256xi32> to vector<1x256xf32>
    %c14_i32 = arith.constant 14 : i32
    %21 = vector.broadcast %c14_i32 : i32 to vector<1x256xi32>
    %22 = arith.cmpi sle, %16, %21 : vector<1x256xi32>
    %23 = arith.extui %22 : vector<1x256xi1> to vector<1x256xi32>
    %24 = arith.sitofp %23 : vector<1x256xi32> to vector<1x256xf32>
    %cst = arith.constant 0.000000e+00 : f32
    %25 = vector.broadcast %cst : f32 to vector<2x17xf32>
    %c0 = arith.constant 0 : index
    %c0_4 = arith.constant 0 : index
    %26 = vector.load %arg24[%c0, %c0_4] : memref<2x290xf32, #tpu.memory_space<vmem>>, vector<2x17xf32>
    tpu.vector_store %arg24[%c0, %c0_4], %25 {strides = array<i32>} : memref<2x290xf32, #tpu.memory_space<vmem>>, vector<2x17xf32>,
    %cst_5 = arith.constant 0.000000e+00 : f32
    %27 = vector.broadcast %cst_5 : f32 to vector<2x17xf32>
    %c0_6 = arith.constant 0 : index
    %c273 = arith.constant 273 : index
    %28 = vector.load %arg24[%c0_6, %c273] : memref<2x290xf32, #tpu.memory_space<vmem>>, vector<2x17xf32>
    tpu.vector_store %arg24[%c0_6, %c273], %27 {strides = array<i32>} : memref<2x290xf32, #tpu.memory_space<vmem>>, vector<2x17xf32>,
    %cst_7 = arith.constant 0.000000e+00 : f32
    %29 = vector.broadcast %cst_7 : f32 to vector<64x17xf32>
    %c0_8 = arith.constant 0 : index
    %c0_9 = arith.constant 0 : index
    %30 = vector.load %arg25[%c0_8, %c0_9] : memref<64x290xf32, #tpu.memory_space<vmem>>, vector<64x17xf32>
    tpu.vector_store %arg25[%c0_8, %c0_9], %29 {strides = array<i32>} : memref<64x290xf32, #tpu.memory_space<vmem>>, vector<64x17xf32>,
    %cst_10 = arith.constant 0.000000e+00 : f32
    %31 = vector.broadcast %cst_10 : f32 to vector<64x17xf32>
    %c0_11 = arith.constant 0 : index
    %c273_12 = arith.constant 273 : index
    %32 = vector.load %arg25[%c0_11, %c273_12] : memref<64x290xf32, #tpu.memory_space<vmem>>, vector<64x17xf32>
    tpu.vector_store %arg25[%c0_11, %c273_12], %31 {strides = array<i32>} : memref<64x290xf32, #tpu.memory_space<vmem>>, vector<64x17xf32>,
    %c0_13 = arith.constant 0 : index
    %c0_14 = arith.constant 0 : index
    %c0_15 = arith.constant 0 : index
    %33 = vector.load %arg1[%c0_13, %c0_14, %c0_15] : memref<1x32x256xf32, #tpu.memory_space<vmem>>, vector<1x32x256xf32>
    %34 = vector.shape_cast %33 : vector<1x32x256xf32> to vector<32x256xf32>
    %c0_16 = arith.constant 0 : index
    %c0_17 = arith.constant 0 : index
    %35 = vector.load %arg3[%c0_16, %c0_17] : memref<32x32xf32, #tpu.memory_space<vmem>>, vector<32x32xf32>
    %cst_18 = arith.constant dense<0.000000e+00> : vector<32x256xf32>
    %36 = tpu.matmul %35, %34, %cst_18 {dimension_numbers = #tpu.dot_dimension_numbers<[1], [0], [0], [1], [0, 0, 1, 1], [], []>} : vector<32x32xf32>, vector<32x256xf32>, vector<32x256xf32> -> vector<32x256xf32>
    %c0_19 = arith.constant 0 : index
    %c0_20 = arith.constant 0 : index
    %37 = vector.load %arg4[%c0_19, %c0_20] : memref<32x1xf32, #tpu.memory_space<vmem>>, vector<32x1xf32>
    %38 = vector.broadcast %37 : vector<32x1xf32> to vector<32x256xf32>
    %39 = arith.addf %36, %38 : vector<32x256xf32>
    %cst_21 = arith.constant 0.000000e+00 : f32
    %40 = vector.broadcast %cst_21 : f32 to vector<32x256xf32>
    %41 = arith.maximumf %39, %40 : vector<32x256xf32>
    %cst_22 = arith.constant dense<0.000000e+00> : vector<32xf32>
    %42 = vector.multi_reduction <add>, %41, %cst_22 [1] : vector<32x256xf32> to vector<32xf32>
    %43 = vector.shape_cast %42 : vector<32xf32> to vector<32x1xf32>
    %cst_23 = arith.constant 2.560000e+02 : f32
    %44 = vector.broadcast %cst_23 : f32 to vector<32x1xf32>
    %45 = arith.divf %43, %44 : vector<32x1xf32>
    %cst_24 = arith.constant dense<0xFF800000> : vector<32xf32>
    %46 = vector.multi_reduction <maximumf>, %41, %cst_24 [1] : vector<32x256xf32> to vector<32xf32>
    %47 = vector.shape_cast %46 : vector<32xf32> to vector<32x1xf32>
    %c0_25 = arith.constant 0 : index
    %c0_26 = arith.constant 0 : index
    %48 = vector.load %arg5[%c0_25, %c0_26] : memref<2x32xf32, #tpu.memory_space<vmem>>, vector<2x32xf32>
    %cst_27 = arith.constant dense<0.000000e+00> : vector<2x1xf32>
    %49 = tpu.matmul %48, %45, %cst_27 {dimension_numbers = #tpu.dot_dimension_numbers<[1], [0], [0], [1], [0, 0, 1, 1], [], []>} : vector<2x32xf32>, vector<32x1xf32>, vector<2x1xf32> -> vector<2x1xf32>
    %cst_28 = arith.constant 0.000000e+00 : f32
    %50 = vector.broadcast %cst_28 : f32 to vector<2x1xf32>
    %51 = arith.maximumf %49, %50 : vector<2x1xf32>
    %c0_29 = arith.constant 0 : index
    %c0_30 = arith.constant 0 : index
    %52 = vector.load %arg5[%c0_29, %c0_30] : memref<2x32xf32, #tpu.memory_space<vmem>>, vector<2x32xf32>
    %cst_31 = arith.constant dense<0.000000e+00> : vector<2x1xf32>
    %53 = tpu.matmul %52, %47, %cst_31 {dimension_numbers = #tpu.dot_dimension_numbers<[1], [0], [0], [1], [0, 0, 1, 1], [], []>} : vector<2x32xf32>, vector<32x1xf32>, vector<2x1xf32> -> vector<2x1xf32>
    %cst_32 = arith.constant 0.000000e+00 : f32
    %54 = vector.broadcast %cst_32 : f32 to vector<2x1xf32>
    %55 = arith.maximumf %53, %54 : vector<2x1xf32>
    %c0_33 = arith.constant 0 : index
    %c0_34 = arith.constant 0 : index
    %56 = vector.load %arg6[%c0_33, %c0_34] : memref<32x2xf32, #tpu.memory_space<vmem>>, vector<32x2xf32>
    %cst_35 = arith.constant dense<0.000000e+00> : vector<32x1xf32>
    %57 = tpu.matmul %56, %51, %cst_35 {dimension_numbers = #tpu.dot_dimension_numbers<[1], [0], [0], [1], [0, 0, 1, 1], [], []>} : vector<32x2xf32>, vector<2x1xf32>, vector<32x1xf32> -> vector<32x1xf32>
    %c0_36 = arith.constant 0 : index
    %c0_37 = arith.constant 0 : index
    %58 = vector.load %arg6[%c0_36, %c0_37] : memref<32x2xf32, #tpu.memory_space<vmem>>, vector<32x2xf32>
    %cst_38 = arith.constant dense<0.000000e+00> : vector<32x1xf32>
    %59 = tpu.matmul %58, %55, %cst_38 {dimension_numbers = #tpu.dot_dimension_numbers<[1], [0], [0], [1], [0, 0, 1, 1], [], []>} : vector<32x2xf32>, vector<2x1xf32>, vector<32x1xf32> -> vector<32x1xf32>
    %60 = arith.addf %57, %59 : vector<32x1xf32>
    %61 = arith.negf %60 : vector<32x1xf32>
    %62 = math.exp %61 : vector<32x1xf32>
    %cst_39 = arith.constant 1.000000e+00 : f32
    %63 = vector.broadcast %cst_39 : f32 to vector<32x1xf32>
    %64 = arith.addf %63, %62 : vector<32x1xf32>
    %65 = arith.divf %63, %64 : vector<32x1xf32>
    %66 = vector.broadcast %65 : vector<32x1xf32> to vector<32x256xf32>
    %67 = arith.mulf %41, %66 : vector<32x256xf32>
    %cst_40 = arith.constant dense<0.000000e+00> : vector<256xf32>
    %68 = vector.multi_reduction <add>, %67, %cst_40 [0] : vector<32x256xf32> to vector<256xf32>
    %69 = vector.shape_cast %68 : vector<256xf32> to vector<1x256xf32>
    %cst_41 = arith.constant 3.200000e+01 : f32
    %70 = vector.broadcast %cst_41 : f32 to vector<1x256xf32>
    %71 = arith.divf %69, %70 : vector<1x256xf32>
    %c0_42 = arith.constant 0 : index
    %c17 = arith.constant 17 : index
    %72 = vector.load %arg24[%c0_42, %c17] : memref<2x290xf32, #tpu.memory_space<vmem>>, vector<1x256xf32>
    tpu.vector_store %arg24[%c0_42, %c17], %71 {strides = array<i32>} : memref<2x290xf32, #tpu.memory_space<vmem>>, vector<1x256xf32>,
    %cst_43 = arith.constant dense<0xFF800000> : vector<256xf32>
    %73 = vector.multi_reduction <maximumf>, %67, %cst_43 [0] : vector<32x256xf32> to vector<256xf32>
    %74 = vector.shape_cast %73 : vector<256xf32> to vector<1x256xf32>
    %c1 = arith.constant 1 : index
    %c17_44 = arith.constant 17 : index
    %75 = vector.load %arg24[%c1, %c17_44] : memref<2x290xf32, #tpu.memory_space<vmem>>, vector<1x256xf32>
    tpu.vector_store %arg24[%c1, %c17_44], %74 {strides = array<i32>} : memref<2x290xf32, #tpu.memory_space<vmem>>, vector<1x256xf32>,
    %cst_45 = arith.constant 0.000000e+00 : f32
    %76 = vector.broadcast %cst_45 : f32 to vector<1x256xf32>
    %c0_46 = arith.constant 0 : index
    %c0_47 = arith.constant 0 : index
    %77 = vector.load %arg24[%c0_46, %c0_47] : memref<2x290xf32, #tpu.memory_space<vmem>>, vector<1x256xf32>
    %c1_48 = arith.constant 1 : index
    %c0_49 = arith.constant 0 : index
    %78 = vector.load %arg24[%c1_48, %c0_49] : memref<2x290xf32, #tpu.memory_space<vmem>>, vector<1x256xf32>
    %c0_50 = arith.constant 0 : index
    %79 = memref.load %arg7[%c0_50] : memref<18xf32, #tpu.memory_space<smem>>
    %80 = vector.broadcast %79 : f32 to vector<1x256xf32>
    %81 = arith.mulf %80, %77 : vector<1x256xf32>
    %c1_51 = arith.constant 1 : index
    %82 = memref.load %arg7[%c1_51] : memref<18xf32, #tpu.memory_space<smem>>
    %83 = vector.broadcast %82 : f32 to vector<1x256xf32>
    %84 = arith.mulf %83, %78 : vector<1x256xf32>
    %85 = arith.addf %81, %84 : vector<1x256xf32>
    %86 = arith.mulf %85, %20 : vector<1x256xf32>
    %87 = arith.addf %76, %86 : vector<1x256xf32>
    %c0_52 = arith.constant 0 : index
    %c1_53 = arith.constant 1 : index
    %88 = vector.load %arg24[%c0_52, %c1_53] : memref<2x290xf32, #tpu.memory_space<vmem>>, vector<1x256xf32>
    %c1_54 = arith.constant 1 : index
    %c1_55 = arith.constant 1 : index
    %89 = vector.load %arg24[%c1_54, %c1_55] : memref<2x290xf32, #tpu.memory_space<vmem>>, vector<1x256xf32>
    %c2 = arith.constant 2 : index
    %90 = memref.load %arg7[%c2] : memref<18xf32, #tpu.memory_space<smem>>
    %91 = vector.broadcast %90 : f32 to vector<1x256xf32>
    %92 = arith.mulf %91, %88 : vector<1x256xf32>
    %c3 = arith.constant 3 : index
    %93 = memref.load %arg7[%c3] : memref<18xf32, #tpu.memory_space<smem>>
    %94 = vector.broadcast %93 : f32 to vector<1x256xf32>
    %95 = arith.mulf %94, %89 : vector<1x256xf32>
    %96 = arith.addf %92, %95 : vector<1x256xf32>
    %97 = arith.addf %87, %96 : vector<1x256xf32>
    %c0_56 = arith.constant 0 : index
    %c2_57 = arith.constant 2 : index
    %98 = vector.load %arg24[%c0_56, %c2_57] : memref<2x290xf32, #tpu.memory_space<vmem>>, vector<1x256xf32>
    %c1_58 = arith.constant 1 : index
    %c2_59 = arith.constant 2 : index
    %99 = vector.load %arg24[%c1_58, %c2_59] : memref<2x290xf32, #tpu.memory_space<vmem>>, vector<1x256xf32>
    %c4 = arith.constant 4 : index
    %100 = memref.load %arg7[%c4] : memref<18xf32, #tpu.memory_space<smem>>
    %101 = vector.broadcast %100 : f32 to vector<1x256xf32>
    %102 = arith.mulf %101, %98 : vector<1x256xf32>
    %c5 = arith.constant 5 : index
    %103 = memref.load %arg7[%c5] : memref<18xf32, #tpu.memory_space<smem>>
    %104 = vector.broadcast %103 : f32 to vector<1x256xf32>
    %105 = arith.mulf %104, %99 : vector<1x256xf32>
    %106 = arith.addf %102, %105 : vector<1x256xf32>
    %107 = arith.mulf %106, %24 : vector<1x256xf32>
    %108 = arith.addf %97, %107 : vector<1x256xf32>
    %c0_60 = arith.constant 0 : index
    %c16 = arith.constant 16 : index
    %109 = vector.load %arg24[%c0_60, %c16] : memref<2x290xf32, #tpu.memory_space<vmem>>, vector<1x256xf32>
    %c1_61 = arith.constant 1 : index
    %c16_62 = arith.constant 16 : index
    %110 = vector.load %arg24[%c1_61, %c16_62] : memref<2x290xf32, #tpu.memory_space<vmem>>, vector<1x256xf32>
    %c6 = arith.constant 6 : index
    %111 = memref.load %arg7[%c6] : memref<18xf32, #tpu.memory_space<smem>>
    %112 = vector.broadcast %111 : f32 to vector<1x256xf32>
    %113 = arith.mulf %112, %109 : vector<1x256xf32>
    %c7 = arith.constant 7 : index
    %114 = memref.load %arg7[%c7] : memref<18xf32, #tpu.memory_space<smem>>
    %115 = vector.broadcast %114 : f32 to vector<1x256xf32>
    %116 = arith.mulf %115, %110 : vector<1x256xf32>
    %117 = arith.addf %113, %116 : vector<1x256xf32>
    %118 = arith.mulf %117, %20 : vector<1x256xf32>
    %119 = arith.addf %108, %118 : vector<1x256xf32>
    %c0_63 = arith.constant 0 : index
    %c17_64 = arith.constant 17 : index
    %120 = vector.load %arg24[%c0_63, %c17_64] : memref<2x290xf32, #tpu.memory_space<vmem>>, vector<1x256xf32>
    %c1_65 = arith.constant 1 : index
    %c17_66 = arith.constant 17 : index
    %121 = vector.load %arg24[%c1_65, %c17_66] : memref<2x290xf32, #tpu.memory_space<vmem>>, vector<1x256xf32>
    %c8 = arith.constant 8 : index
    %122 = memref.load %arg7[%c8] : memref<18xf32, #tpu.memory_space<smem>>
    %123 = vector.broadcast %122 : f32 to vector<1x256xf32>
    %124 = arith.mulf %123, %120 : vector<1x256xf32>
    %c9 = arith.constant 9 : index
    %125 = memref.load %arg7[%c9] : memref<18xf32, #tpu.memory_space<smem>>
    %126 = vector.broadcast %125 : f32 to vector<1x256xf32>
    %127 = arith.mulf %126, %121 : vector<1x256xf32>
    %128 = arith.addf %124, %127 : vector<1x256xf32>
    %129 = arith.addf %119, %128 : vector<1x256xf32>
    %c0_67 = arith.constant 0 : index
    %c18 = arith.constant 18 : index
    %130 = vector.load %arg24[%c0_67, %c18] : memref<2x290xf32, #tpu.memory_space<vmem>>, vector<1x256xf32>
    %c1_68 = arith.constant 1 : index
    %c18_69 = arith.constant 18 : index
    %131 = vector.load %arg24[%c1_68, %c18_69] : memref<2x290xf32, #tpu.memory_space<vmem>>, vector<1x256xf32>
    %c10 = arith.constant 10 : index
    %132 = memref.load %arg7[%c10] : memref<18xf32, #tpu.memory_space<smem>>
    %133 = vector.broadcast %132 : f32 to vector<1x256xf32>
    %134 = arith.mulf %133, %130 : vector<1x256xf32>
    %c11 = arith.constant 11 : index
    %135 = memref.load %arg7[%c11] : memref<18xf32, #tpu.memory_space<smem>>
    %136 = vector.broadcast %135 : f32 to vector<1x256xf32>
    %137 = arith.mulf %136, %131 : vector<1x256xf32>
    %138 = arith.addf %134, %137 : vector<1x256xf32>
    %139 = arith.mulf %138, %24 : vector<1x256xf32>
    %140 = arith.addf %129, %139 : vector<1x256xf32>
    %c0_70 = arith.constant 0 : index
    %c32 = arith.constant 32 : index
    %141 = vector.load %arg24[%c0_70, %c32] : memref<2x290xf32, #tpu.memory_space<vmem>>, vector<1x256xf32>
    %c1_71 = arith.constant 1 : index
    %c32_72 = arith.constant 32 : index
    %142 = vector.load %arg24[%c1_71, %c32_72] : memref<2x290xf32, #tpu.memory_space<vmem>>, vector<1x256xf32>
    %c12 = arith.constant 12 : index
    %143 = memref.load %arg7[%c12] : memref<18xf32, #tpu.memory_space<smem>>
    %144 = vector.broadcast %143 : f32 to vector<1x256xf32>
    %145 = arith.mulf %144, %141 : vector<1x256xf32>
    %c13 = arith.constant 13 : index
    %146 = memref.load %arg7[%c13] : memref<18xf32, #tpu.memory_space<smem>>
    %147 = vector.broadcast %146 : f32 to vector<1x256xf32>
    %148 = arith.mulf %147, %142 : vector<1x256xf32>
    %149 = arith.addf %145, %148 : vector<1x256xf32>
    %150 = arith.mulf %149, %20 : vector<1x256xf32>
    %151 = arith.addf %140, %150 : vector<1x256xf32>
    %c0_73 = arith.constant 0 : index
    %c33 = arith.constant 33 : index
    %152 = vector.load %arg24[%c0_73, %c33] : memref<2x290xf32, #tpu.memory_space<vmem>>, vector<1x256xf32>
    %c1_74 = arith.constant 1 : index
    %c33_75 = arith.constant 33 : index
    %153 = vector.load %arg24[%c1_74, %c33_75] : memref<2x290xf32, #tpu.memory_space<vmem>>, vector<1x256xf32>
    %c14 = arith.constant 14 : index
    %154 = memref.load %arg7[%c14] : memref<18xf32, #tpu.memory_space<smem>>
    %155 = vector.broadcast %154 : f32 to vector<1x256xf32>
    %156 = arith.mulf %155, %152 : vector<1x256xf32>
    %c15 = arith.constant 15 : index
    %157 = memref.load %arg7[%c15] : memref<18xf32, #tpu.memory_space<smem>>
    %158 = vector.broadcast %157 : f32 to vector<1x256xf32>
    %159 = arith.mulf %158, %153 : vector<1x256xf32>
    %160 = arith.addf %156, %159 : vector<1x256xf32>
    %161 = arith.addf %151, %160 : vector<1x256xf32>
    %c0_76 = arith.constant 0 : index
    %c34 = arith.constant 34 : index
    %162 = vector.load %arg24[%c0_76, %c34] : memref<2x290xf32, #tpu.memory_space<vmem>>, vector<1x256xf32>
    %c1_77 = arith.constant 1 : index
    %c34_78 = arith.constant 34 : index
    %163 = vector.load %arg24[%c1_77, %c34_78] : memref<2x290xf32, #tpu.memory_space<vmem>>, vector<1x256xf32>
    %c16_79 = arith.constant 16 : index
    %164 = memref.load %arg7[%c16_79] : memref<18xf32, #tpu.memory_space<smem>>
    %165 = vector.broadcast %164 : f32 to vector<1x256xf32>
    %166 = arith.mulf %165, %162 : vector<1x256xf32>
    %c17_80 = arith.constant 17 : index
    %167 = memref.load %arg7[%c17_80] : memref<18xf32, #tpu.memory_space<smem>>
    %168 = vector.broadcast %167 : f32 to vector<1x256xf32>
    %169 = arith.mulf %168, %163 : vector<1x256xf32>
    %170 = arith.addf %166, %169 : vector<1x256xf32>
    %171 = arith.mulf %170, %24 : vector<1x256xf32>
    %172 = arith.addf %161, %171 : vector<1x256xf32>
    %173 = arith.negf %172 : vector<1x256xf32>
    %174 = math.exp %173 : vector<1x256xf32>
    %cst_81 = arith.constant 1.000000e+00 : f32
    %175 = vector.broadcast %cst_81 : f32 to vector<1x256xf32>
    %176 = arith.addf %175, %174 : vector<1x256xf32>
    %177 = arith.divf %175, %176 : vector<1x256xf32>
    %178 = vector.broadcast %177 : vector<1x256xf32> to vector<32x256xf32>
    %179 = arith.mulf %67, %178 : vector<32x256xf32>
    %cst_82 = arith.constant dense<0.000000e+00> : vector<32xf32>
    %180 = vector.multi_reduction <add>, %179, %cst_82 [1] : vector<32x256xf32> to vector<32xf32>
    %181 = vector.shape_cast %180 : vector<32xf32> to vector<32x1xf32>
    %cst_83 = arith.constant 2.560000e+02 : f32
    %182 = vector.broadcast %cst_83 : f32 to vector<32x1xf32>
    %183 = arith.divf %181, %182 : vector<32x1xf32>
    %c0_84 = arith.constant 0 : index
    %c0_85 = arith.constant 0 : index
    %c0_86 = arith.constant 0 : index
    %184 = vector.load %arg2[%c0_84, %c0_85, %c0_86] : memref<1x16x256xf32, #tpu.memory_space<vmem>>, vector<1x16x256xf32>
    %185 = vector.shape_cast %184 : vector<1x16x256xf32> to vector<16x256xf32>
    %c0_87 = arith.constant 0 : index
    %c0_88 = arith.constant 0 : index
    %186 = vector.load %arg8[%c0_87, %c0_88] : memref<32x16xf32, #tpu.memory_space<vmem>>, vector<32x16xf32>
    %cst_89 = arith.constant dense<0.000000e+00> : vector<32x256xf32>
    %187 = tpu.matmul %186, %185, %cst_89 {dimension_numbers = #tpu.dot_dimension_numbers<[1], [0], [0], [1], [0, 0, 1, 1], [], []>} : vector<32x16xf32>, vector<16x256xf32>, vector<32x256xf32> -> vector<32x256xf32>
    %c0_90 = arith.constant 0 : index
    %c0_91 = arith.constant 0 : index
    %188 = vector.load %arg9[%c0_90, %c0_91] : memref<32x1xf32, #tpu.memory_space<vmem>>, vector<32x1xf32>
    %189 = vector.broadcast %188 : vector<32x1xf32> to vector<32x256xf32>
    %190 = arith.addf %187, %189 : vector<32x256xf32>
    %cst_92 = arith.constant 0.000000e+00 : f32
    %191 = vector.broadcast %cst_92 : f32 to vector<32x256xf32>
    %192 = arith.maximumf %190, %191 : vector<32x256xf32>
    %cst_93 = arith.constant dense<0.000000e+00> : vector<32xf32>
    %193 = vector.multi_reduction <add>, %192, %cst_93 [1] : vector<32x256xf32> to vector<32xf32>
    %194 = vector.shape_cast %193 : vector<32xf32> to vector<32x1xf32>
    %cst_94 = arith.constant 2.560000e+02 : f32
    %195 = vector.broadcast %cst_94 : f32 to vector<32x1xf32>
    %196 = arith.divf %194, %195 : vector<32x1xf32>
    %cst_95 = arith.constant dense<0xFF800000> : vector<32xf32>
    %197 = vector.multi_reduction <maximumf>, %192, %cst_95 [1] : vector<32x256xf32> to vector<32xf32>
    %198 = vector.shape_cast %197 : vector<32xf32> to vector<32x1xf32>
    %c0_96 = arith.constant 0 : index
    %c0_97 = arith.constant 0 : index
    %199 = vector.load %arg10[%c0_96, %c0_97] : memref<2x32xf32, #tpu.memory_space<vmem>>, vector<2x32xf32>
    %cst_98 = arith.constant dense<0.000000e+00> : vector<2x1xf32>
    %200 = tpu.matmul %199, %196, %cst_98 {dimension_numbers = #tpu.dot_dimension_numbers<[1], [0], [0], [1], [0, 0, 1, 1], [], []>} : vector<2x32xf32>, vector<32x1xf32>, vector<2x1xf32> -> vector<2x1xf32>
    %cst_99 = arith.constant 0.000000e+00 : f32
    %201 = vector.broadcast %cst_99 : f32 to vector<2x1xf32>
    %202 = arith.maximumf %200, %201 : vector<2x1xf32>
    %c0_100 = arith.constant 0 : index
    %c0_101 = arith.constant 0 : index
    %203 = vector.load %arg10[%c0_100, %c0_101] : memref<2x32xf32, #tpu.memory_space<vmem>>, vector<2x32xf32>
    %cst_102 = arith.constant dense<0.000000e+00> : vector<2x1xf32>
    %204 = tpu.matmul %203, %198, %cst_102 {dimension_numbers = #tpu.dot_dimension_numbers<[1], [0], [0], [1], [0, 0, 1, 1], [], []>} : vector<2x32xf32>, vector<32x1xf32>, vector<2x1xf32> -> vector<2x1xf32>
    %cst_103 = arith.constant 0.000000e+00 : f32
    %205 = vector.broadcast %cst_103 : f32 to vector<2x1xf32>
    %206 = arith.maximumf %204, %205 : vector<2x1xf32>
    %c0_104 = arith.constant 0 : index
    %c0_105 = arith.constant 0 : index
    %207 = vector.load %arg11[%c0_104, %c0_105] : memref<32x2xf32, #tpu.memory_space<vmem>>, vector<32x2xf32>
    %cst_106 = arith.constant dense<0.000000e+00> : vector<32x1xf32>
    %208 = tpu.matmul %207, %202, %cst_106 {dimension_numbers = #tpu.dot_dimension_numbers<[1], [0], [0], [1], [0, 0, 1, 1], [], []>} : vector<32x2xf32>, vector<2x1xf32>, vector<32x1xf32> -> vector<32x1xf32>
    %c0_107 = arith.constant 0 : index
    %c0_108 = arith.constant 0 : index
    %209 = vector.load %arg11[%c0_107, %c0_108] : memref<32x2xf32, #tpu.memory_space<vmem>>, vector<32x2xf32>
    %cst_109 = arith.constant dense<0.000000e+00> : vector<32x1xf32>
    %210 = tpu.matmul %209, %206, %cst_109 {dimension_numbers = #tpu.dot_dimension_numbers<[1], [0], [0], [1], [0, 0, 1, 1], [], []>} : vector<32x2xf32>, vector<2x1xf32>, vector<32x1xf32> -> vector<32x1xf32>
    %211 = arith.addf %208, %210 : vector<32x1xf32>
    %212 = arith.negf %211 : vector<32x1xf32>
    %213 = math.exp %212 : vector<32x1xf32>
    %cst_110 = arith.constant 1.000000e+00 : f32
    %214 = vector.broadcast %cst_110 : f32 to vector<32x1xf32>
    %215 = arith.addf %214, %213 : vector<32x1xf32>
    %216 = arith.divf %214, %215 : vector<32x1xf32>
    %217 = vector.broadcast %216 : vector<32x1xf32> to vector<32x256xf32>
    %218 = arith.mulf %192, %217 : vector<32x256xf32>
    %cst_111 = arith.constant dense<0.000000e+00> : vector<256xf32>
    %219 = vector.multi_reduction <add>, %218, %cst_111 [0] : vector<32x256xf32> to vector<256xf32>
    %220 = vector.shape_cast %219 : vector<256xf32> to vector<1x256xf32>
    %cst_112 = arith.constant 3.200000e+01 : f32
    %221 = vector.broadcast %cst_112 : f32 to vector<1x256xf32>
    %222 = arith.divf %220, %221 : vector<1x256xf32>
    %c0_113 = arith.constant 0 : index
    %c17_114 = arith.constant 17 : index
    %223 = vector.load %arg24[%c0_113, %c17_114] : memref<2x290xf32, #tpu.memory_space<vmem>>, vector<1x256xf32>
    tpu.vector_store %arg24[%c0_113, %c17_114], %222 {strides = array<i32>} : memref<2x290xf32, #tpu.memory_space<vmem>>, vector<1x256xf32>,
    %cst_115 = arith.constant dense<0xFF800000> : vector<256xf32>
    %224 = vector.multi_reduction <maximumf>, %218, %cst_115 [0] : vector<32x256xf32> to vector<256xf32>
    %225 = vector.shape_cast %224 : vector<256xf32> to vector<1x256xf32>
    %c1_116 = arith.constant 1 : index
    %c17_117 = arith.constant 17 : index
    %226 = vector.load %arg24[%c1_116, %c17_117] : memref<2x290xf32, #tpu.memory_space<vmem>>, vector<1x256xf32>
    tpu.vector_store %arg24[%c1_116, %c17_117], %225 {strides = array<i32>} : memref<2x290xf32, #tpu.memory_space<vmem>>, vector<1x256xf32>,
    %cst_118 = arith.constant 0.000000e+00 : f32
    %227 = vector.broadcast %cst_118 : f32 to vector<1x256xf32>
    %c0_119 = arith.constant 0 : index
    %c0_120 = arith.constant 0 : index
    %228 = vector.load %arg24[%c0_119, %c0_120] : memref<2x290xf32, #tpu.memory_space<vmem>>, vector<1x256xf32>
    %c1_121 = arith.constant 1 : index
    %c0_122 = arith.constant 0 : index
    %229 = vector.load %arg24[%c1_121, %c0_122] : memref<2x290xf32, #tpu.memory_space<vmem>>, vector<1x256xf32>
    %c0_123 = arith.constant 0 : index
    %230 = memref.load %arg12[%c0_123] : memref<18xf32, #tpu.memory_space<smem>>
    %231 = vector.broadcast %230 : f32 to vector<1x256xf32>
    %232 = arith.mulf %231, %228 : vector<1x256xf32>
    %c1_124 = arith.constant 1 : index
    %233 = memref.load %arg12[%c1_124] : memref<18xf32, #tpu.memory_space<smem>>
    %234 = vector.broadcast %233 : f32 to vector<1x256xf32>
    %235 = arith.mulf %234, %229 : vector<1x256xf32>
    %236 = arith.addf %232, %235 : vector<1x256xf32>
    %237 = arith.mulf %236, %20 : vector<1x256xf32>
    %238 = arith.addf %227, %237 : vector<1x256xf32>
    %c0_125 = arith.constant 0 : index
    %c1_126 = arith.constant 1 : index
    %239 = vector.load %arg24[%c0_125, %c1_126] : memref<2x290xf32, #tpu.memory_space<vmem>>, vector<1x256xf32>
    %c1_127 = arith.constant 1 : index
    %c1_128 = arith.constant 1 : index
    %240 = vector.load %arg24[%c1_127, %c1_128] : memref<2x290xf32, #tpu.memory_space<vmem>>, vector<1x256xf32>
    %c2_129 = arith.constant 2 : index
    %241 = memref.load %arg12[%c2_129] : memref<18xf32, #tpu.memory_space<smem>>
    %242 = vector.broadcast %241 : f32 to vector<1x256xf32>
    %243 = arith.mulf %242, %239 : vector<1x256xf32>
    %c3_130 = arith.constant 3 : index
    %244 = memref.load %arg12[%c3_130] : memref<18xf32, #tpu.memory_space<smem>>
    %245 = vector.broadcast %244 : f32 to vector<1x256xf32>
    %246 = arith.mulf %245, %240 : vector<1x256xf32>
    %247 = arith.addf %243, %246 : vector<1x256xf32>
    %248 = arith.addf %238, %247 : vector<1x256xf32>
    %c0_131 = arith.constant 0 : index
    %c2_132 = arith.constant 2 : index
    %249 = vector.load %arg24[%c0_131, %c2_132] : memref<2x290xf32, #tpu.memory_space<vmem>>, vector<1x256xf32>
    %c1_133 = arith.constant 1 : index
    %c2_134 = arith.constant 2 : index
    %250 = vector.load %arg24[%c1_133, %c2_134] : memref<2x290xf32, #tpu.memory_space<vmem>>, vector<1x256xf32>
    %c4_135 = arith.constant 4 : index
    %251 = memref.load %arg12[%c4_135] : memref<18xf32, #tpu.memory_space<smem>>
    %252 = vector.broadcast %251 : f32 to vector<1x256xf32>
    %253 = arith.mulf %252, %249 : vector<1x256xf32>
    %c5_136 = arith.constant 5 : index
    %254 = memref.load %arg12[%c5_136] : memref<18xf32, #tpu.memory_space<smem>>
    %255 = vector.broadcast %254 : f32 to vector<1x256xf32>
    %256 = arith.mulf %255, %250 : vector<1x256xf32>
    %257 = arith.addf %253, %256 : vector<1x256xf32>
    %258 = arith.mulf %257, %24 : vector<1x256xf32>
    %259 = arith.addf %248, %258 : vector<1x256xf32>
    %c0_137 = arith.constant 0 : index
    %c16_138 = arith.constant 16 : index
    %260 = vector.load %arg24[%c0_137, %c16_138] : memref<2x290xf32, #tpu.memory_space<vmem>>, vector<1x256xf32>
    %c1_139 = arith.constant 1 : index
    %c16_140 = arith.constant 16 : index
    %261 = vector.load %arg24[%c1_139, %c16_140] : memref<2x290xf32, #tpu.memory_space<vmem>>, vector<1x256xf32>
    %c6_141 = arith.constant 6 : index
    %262 = memref.load %arg12[%c6_141] : memref<18xf32, #tpu.memory_space<smem>>
    %263 = vector.broadcast %262 : f32 to vector<1x256xf32>
    %264 = arith.mulf %263, %260 : vector<1x256xf32>
    %c7_142 = arith.constant 7 : index
    %265 = memref.load %arg12[%c7_142] : memref<18xf32, #tpu.memory_space<smem>>
    %266 = vector.broadcast %265 : f32 to vector<1x256xf32>
    %267 = arith.mulf %266, %261 : vector<1x256xf32>
    %268 = arith.addf %264, %267 : vector<1x256xf32>
    %269 = arith.mulf %268, %20 : vector<1x256xf32>
    %270 = arith.addf %259, %269 : vector<1x256xf32>
    %c0_143 = arith.constant 0 : index
    %c17_144 = arith.constant 17 : index
    %271 = vector.load %arg24[%c0_143, %c17_144] : memref<2x290xf32, #tpu.memory_space<vmem>>, vector<1x256xf32>
    %c1_145 = arith.constant 1 : index
    %c17_146 = arith.constant 17 : index
    %272 = vector.load %arg24[%c1_145, %c17_146] : memref<2x290xf32, #tpu.memory_space<vmem>>, vector<1x256xf32>
    %c8_147 = arith.constant 8 : index
    %273 = memref.load %arg12[%c8_147] : memref<18xf32, #tpu.memory_space<smem>>
    %274 = vector.broadcast %273 : f32 to vector<1x256xf32>
    %275 = arith.mulf %274, %271 : vector<1x256xf32>
    %c9_148 = arith.constant 9 : index
    %276 = memref.load %arg12[%c9_148] : memref<18xf32, #tpu.memory_space<smem>>
    %277 = vector.broadcast %276 : f32 to vector<1x256xf32>
    %278 = arith.mulf %277, %272 : vector<1x256xf32>
    %279 = arith.addf %275, %278 : vector<1x256xf32>
    %280 = arith.addf %270, %279 : vector<1x256xf32>
    %c0_149 = arith.constant 0 : index
    %c18_150 = arith.constant 18 : index
    %281 = vector.load %arg24[%c0_149, %c18_150] : memref<2x290xf32, #tpu.memory_space<vmem>>, vector<1x256xf32>
    %c1_151 = arith.constant 1 : index
    %c18_152 = arith.constant 18 : index
    %282 = vector.load %arg24[%c1_151, %c18_152] : memref<2x290xf32, #tpu.memory_space<vmem>>, vector<1x256xf32>
    %c10_153 = arith.constant 10 : index
    %283 = memref.load %arg12[%c10_153] : memref<18xf32, #tpu.memory_space<smem>>
    %284 = vector.broadcast %283 : f32 to vector<1x256xf32>
    %285 = arith.mulf %284, %281 : vector<1x256xf32>
    %c11_154 = arith.constant 11 : index
    %286 = memref.load %arg12[%c11_154] : memref<18xf32, #tpu.memory_space<smem>>
    %287 = vector.broadcast %286 : f32 to vector<1x256xf32>
    %288 = arith.mulf %287, %282 : vector<1x256xf32>
    %289 = arith.addf %285, %288 : vector<1x256xf32>
    %290 = arith.mulf %289, %24 : vector<1x256xf32>
    %291 = arith.addf %280, %290 : vector<1x256xf32>
    %c0_155 = arith.constant 0 : index
    %c32_156 = arith.constant 32 : index
    %292 = vector.load %arg24[%c0_155, %c32_156] : memref<2x290xf32, #tpu.memory_space<vmem>>, vector<1x256xf32>
    %c1_157 = arith.constant 1 : index
    %c32_158 = arith.constant 32 : index
    %293 = vector.load %arg24[%c1_157, %c32_158] : memref<2x290xf32, #tpu.memory_space<vmem>>, vector<1x256xf32>
    %c12_159 = arith.constant 12 : index
    %294 = memref.load %arg12[%c12_159] : memref<18xf32, #tpu.memory_space<smem>>
    %295 = vector.broadcast %294 : f32 to vector<1x256xf32>
    %296 = arith.mulf %295, %292 : vector<1x256xf32>
    %c13_160 = arith.constant 13 : index
    %297 = memref.load %arg12[%c13_160] : memref<18xf32, #tpu.memory_space<smem>>
    %298 = vector.broadcast %297 : f32 to vector<1x256xf32>
    %299 = arith.mulf %298, %293 : vector<1x256xf32>
    %300 = arith.addf %296, %299 : vector<1x256xf32>
    %301 = arith.mulf %300, %20 : vector<1x256xf32>
    %302 = arith.addf %291, %301 : vector<1x256xf32>
    %c0_161 = arith.constant 0 : index
    %c33_162 = arith.constant 33 : index
    %303 = vector.load %arg24[%c0_161, %c33_162] : memref<2x290xf32, #tpu.memory_space<vmem>>, vector<1x256xf32>
    %c1_163 = arith.constant 1 : index
    %c33_164 = arith.constant 33 : index
    %304 = vector.load %arg24[%c1_163, %c33_164] : memref<2x290xf32, #tpu.memory_space<vmem>>, vector<1x256xf32>
    %c14_165 = arith.constant 14 : index
    %305 = memref.load %arg12[%c14_165] : memref<18xf32, #tpu.memory_space<smem>>
    %306 = vector.broadcast %305 : f32 to vector<1x256xf32>
    %307 = arith.mulf %306, %303 : vector<1x256xf32>
    %c15_166 = arith.constant 15 : index
    %308 = memref.load %arg12[%c15_166] : memref<18xf32, #tpu.memory_space<smem>>
    %309 = vector.broadcast %308 : f32 to vector<1x256xf32>
    %310 = arith.mulf %309, %304 : vector<1x256xf32>
    %311 = arith.addf %307, %310 : vector<1x256xf32>
    %312 = arith.addf %302, %311 : vector<1x256xf32>
    %c0_167 = arith.constant 0 : index
    %c34_168 = arith.constant 34 : index
    %313 = vector.load %arg24[%c0_167, %c34_168] : memref<2x290xf32, #tpu.memory_space<vmem>>, vector<1x256xf32>
    %c1_169 = arith.constant 1 : index
    %c34_170 = arith.constant 34 : index
    %314 = vector.load %arg24[%c1_169, %c34_170] : memref<2x290xf32, #tpu.memory_space<vmem>>, vector<1x256xf32>
    %c16_171 = arith.constant 16 : index
    %315 = memref.load %arg12[%c16_171] : memref<18xf32, #tpu.memory_space<smem>>
    %316 = vector.broadcast %315 : f32 to vector<1x256xf32>
    %317 = arith.mulf %316, %313 : vector<1x256xf32>
    %c17_172 = arith.constant 17 : index
    %318 = memref.load %arg12[%c17_172] : memref<18xf32, #tpu.memory_space<smem>>
    %319 = vector.broadcast %318 : f32 to vector<1x256xf32>
    %320 = arith.mulf %319, %314 : vector<1x256xf32>
    %321 = arith.addf %317, %320 : vector<1x256xf32>
    %322 = arith.mulf %321, %24 : vector<1x256xf32>
    %323 = arith.addf %312, %322 : vector<1x256xf32>
    %324 = arith.negf %323 : vector<1x256xf32>
    %325 = math.exp %324 : vector<1x256xf32>
    %cst_173 = arith.constant 1.000000e+00 : f32
    %326 = vector.broadcast %cst_173 : f32 to vector<1x256xf32>
    %327 = arith.addf %326, %325 : vector<1x256xf32>
    %328 = arith.divf %326, %327 : vector<1x256xf32>
    %329 = vector.broadcast %328 : vector<1x256xf32> to vector<32x256xf32>
    %330 = arith.mulf %218, %329 : vector<32x256xf32>
    %cst_174 = arith.constant dense<0.000000e+00> : vector<32xf32>
    %331 = vector.multi_reduction <add>, %330, %cst_174 [1] : vector<32x256xf32> to vector<32xf32>
    %332 = vector.shape_cast %331 : vector<32xf32> to vector<32x1xf32>
    %cst_175 = arith.constant 2.560000e+02 : f32
    %333 = vector.broadcast %cst_175 : f32 to vector<32x1xf32>
    %334 = arith.divf %332, %333 : vector<32x1xf32>
    %c0_176 = arith.constant 0 : index
    %c0_177 = arith.constant 0 : index
    %335 = vector.load %arg13[%c0_176, %c0_177] : memref<32x32xf32, #tpu.memory_space<vmem>>, vector<32x32xf32>
    %cst_178 = arith.constant dense<0.000000e+00> : vector<32x1xf32>
    %336 = tpu.matmul %335, %183, %cst_178 {dimension_numbers = #tpu.dot_dimension_numbers<[1], [0], [0], [1], [0, 0, 1, 1], [], []>} : vector<32x32xf32>, vector<32x1xf32>, vector<32x1xf32> -> vector<32x1xf32>
    %c0_179 = arith.constant 0 : index
    %c0_180 = arith.constant 0 : index
    %337 = vector.load %arg14[%c0_179, %c0_180] : memref<32x1xf32, #tpu.memory_space<vmem>>, vector<32x1xf32>
    %338 = arith.addf %336, %337 : vector<32x1xf32>
    %c0_181 = arith.constant 0 : index
    %c0_182 = arith.constant 0 : index
    %339 = vector.load %arg15[%c0_181, %c0_182] : memref<32x32xf32, #tpu.memory_space<vmem>>, vector<32x32xf32>
    %cst_183 = arith.constant dense<0.000000e+00> : vector<32x1xf32>
    %340 = tpu.matmul %339, %334, %cst_183 {dimension_numbers = #tpu.dot_dimension_numbers<[1], [0], [0], [1], [0, 0, 1, 1], [], []>} : vector<32x32xf32>, vector<32x1xf32>, vector<32x1xf32> -> vector<32x1xf32>
    %c0_184 = arith.constant 0 : index
    %c0_185 = arith.constant 0 : index
    %341 = vector.load %arg16[%c0_184, %c0_185] : memref<32x1xf32, #tpu.memory_space<vmem>>, vector<32x1xf32>
    %342 = arith.addf %340, %341 : vector<32x1xf32>
    %c0_186 = arith.constant 0 : index
    %c0_187 = arith.constant 0 : index
    %343 = vector.load %arg17[%c0_186, %c0_187] : memref<32x32xf32, #tpu.memory_space<vmem>>, vector<32x32xf32>
    %344 = arith.addf %338, %342 : vector<32x1xf32>
    %cst_188 = arith.constant dense<0.000000e+00> : vector<32x1xf32>
    %345 = tpu.matmul %343, %344, %cst_188 {dimension_numbers = #tpu.dot_dimension_numbers<[1], [0], [0], [1], [0, 0, 1, 1], [], []>} : vector<32x32xf32>, vector<32x1xf32>, vector<32x1xf32> -> vector<32x1xf32>
    %c0_189 = arith.constant 0 : index
    %c0_190 = arith.constant 0 : index
    %346 = vector.load %arg18[%c0_189, %c0_190] : memref<32x1xf32, #tpu.memory_space<vmem>>, vector<32x1xf32>
    %347 = arith.addf %345, %346 : vector<32x1xf32>
    %cst_191 = arith.constant 1.000000e+00 : f32
    %348 = vector.broadcast %cst_191 : f32 to vector<32x1xf32>
    %349 = arith.addf %347, %348 : vector<32x1xf32>
    %350 = vector.broadcast %349 : vector<32x1xf32> to vector<32x256xf32>
    %351 = arith.mulf %179, %350 : vector<32x256xf32>
    %c0_192 = arith.constant 0 : index
    %c17_193 = arith.constant 17 : index
    %352 = vector.load %arg25[%c0_192, %c17_193] : memref<64x290xf32, #tpu.memory_space<vmem>>, vector<32x256xf32>
    tpu.vector_store %arg25[%c0_192, %c17_193], %351 {strides = array<i32>} : memref<64x290xf32, #tpu.memory_space<vmem>>, vector<32x256xf32>,
    %353 = vector.broadcast %349 : vector<32x1xf32> to vector<32x256xf32>
    %354 = arith.mulf %330, %353 : vector<32x256xf32>
    %c32_194 = arith.constant 32 : index
    %c17_195 = arith.constant 17 : index
    %355 = vector.load %arg25[%c32_194, %c17_195] : memref<64x290xf32, #tpu.memory_space<vmem>>, vector<32x256xf32>
    tpu.vector_store %arg25[%c32_194, %c17_195], %354 {strides = array<i32>} : memref<64x290xf32, #tpu.memory_space<vmem>>, vector<32x256xf32>,
    %c0_196 = arith.constant 0 : index
    %c0_197 = arith.constant 0 : index
    %356 = vector.load %arg25[%c0_196, %c0_197] : memref<64x290xf32, #tpu.memory_space<vmem>>, vector<64x256xf32>
    %357 = vector.broadcast %20 : vector<1x256xf32> to vector<64x256xf32>
    %358 = arith.mulf %356, %357 : vector<64x256xf32>
    %c0_198 = arith.constant 0 : index
    %c0_199 = arith.constant 0 : index
    %359 = vector.load %arg26[%c0_198, %c0_199] : memref<576x256xf32, #tpu.memory_space<vmem>>, vector<64x256xf32>
    tpu.vector_store %arg26[%c0_198, %c0_199], %358 {strides = array<i32>} : memref<576x256xf32, #tpu.memory_space<vmem>>, vector<64x256xf32>,
    %c0_200 = arith.constant 0 : index
    %c1_201 = arith.constant 1 : index
    %360 = vector.load %arg25[%c0_200, %c1_201] : memref<64x290xf32, #tpu.memory_space<vmem>>, vector<64x256xf32>
    %c64 = arith.constant 64 : index
    %c0_202 = arith.constant 0 : index
    %361 = vector.load %arg26[%c64, %c0_202] : memref<576x256xf32, #tpu.memory_space<vmem>>, vector<64x256xf32>
    tpu.vector_store %arg26[%c64, %c0_202], %360 {strides = array<i32>} : memref<576x256xf32, #tpu.memory_space<vmem>>, vector<64x256xf32>,
    %c0_203 = arith.constant 0 : index
    %c2_204 = arith.constant 2 : index
    %362 = vector.load %arg25[%c0_203, %c2_204] : memref<64x290xf32, #tpu.memory_space<vmem>>, vector<64x256xf32>
    %363 = vector.broadcast %24 : vector<1x256xf32> to vector<64x256xf32>
    %364 = arith.mulf %362, %363 : vector<64x256xf32>
    %c128 = arith.constant 128 : index
    %c0_205 = arith.constant 0 : index
    %365 = vector.load %arg26[%c128, %c0_205] : memref<576x256xf32, #tpu.memory_space<vmem>>, vector<64x256xf32>
    tpu.vector_store %arg26[%c128, %c0_205], %364 {strides = array<i32>} : memref<576x256xf32, #tpu.memory_space<vmem>>, vector<64x256xf32>,
    %c0_206 = arith.constant 0 : index
    %c16_207 = arith.constant 16 : index
    %366 = vector.load %arg25[%c0_206, %c16_207] : memref<64x290xf32, #tpu.memory_space<vmem>>, vector<64x256xf32>
    %367 = vector.broadcast %20 : vector<1x256xf32> to vector<64x256xf32>
    %368 = arith.mulf %366, %367 : vector<64x256xf32>
    %c192 = arith.constant 192 : index
    %c0_208 = arith.constant 0 : index
    %369 = vector.load %arg26[%c192, %c0_208] : memref<576x256xf32, #tpu.memory_space<vmem>>, vector<64x256xf32>
    tpu.vector_store %arg26[%c192, %c0_208], %368 {strides = array<i32>} : memref<576x256xf32, #tpu.memory_space<vmem>>, vector<64x256xf32>,
    %c0_209 = arith.constant 0 : index
    %c17_210 = arith.constant 17 : index
    %370 = vector.load %arg25[%c0_209, %c17_210] : memref<64x290xf32, #tpu.memory_space<vmem>>, vector<64x256xf32>
    %c256 = arith.constant 256 : index
    %c0_211 = arith.constant 0 : index
    %371 = vector.load %arg26[%c256, %c0_211] : memref<576x256xf32, #tpu.memory_space<vmem>>, vector<64x256xf32>
    tpu.vector_store %arg26[%c256, %c0_211], %370 {strides = array<i32>} : memref<576x256xf32, #tpu.memory_space<vmem>>, vector<64x256xf32>,
    %c0_212 = arith.constant 0 : index
    %c18_213 = arith.constant 18 : index
    %372 = vector.load %arg25[%c0_212, %c18_213] : memref<64x290xf32, #tpu.memory_space<vmem>>, vector<64x256xf32>
    %373 = vector.broadcast %24 : vector<1x256xf32> to vector<64x256xf32>
    %374 = arith.mulf %372, %373 : vector<64x256xf32>
    %c320 = arith.constant 320 : index
    %c0_214 = arith.constant 0 : index
    %375 = vector.load %arg26[%c320, %c0_214] : memref<576x256xf32, #tpu.memory_space<vmem>>, vector<64x256xf32>
    tpu.vector_store %arg26[%c320, %c0_214], %374 {strides = array<i32>} : memref<576x256xf32, #tpu.memory_space<vmem>>, vector<64x256xf32>,
    %c0_215 = arith.constant 0 : index
    %c32_216 = arith.constant 32 : index
    %376 = vector.load %arg25[%c0_215, %c32_216] : memref<64x290xf32, #tpu.memory_space<vmem>>, vector<64x256xf32>
    %377 = vector.broadcast %20 : vector<1x256xf32> to vector<64x256xf32>
    %378 = arith.mulf %376, %377 : vector<64x256xf32>
    %c384 = arith.constant 384 : index
    %c0_217 = arith.constant 0 : index
    %379 = vector.load %arg26[%c384, %c0_217] : memref<576x256xf32, #tpu.memory_space<vmem>>, vector<64x256xf32>
    tpu.vector_store %arg26[%c384, %c0_217], %378 {strides = array<i32>} : memref<576x256xf32, #tpu.memory_space<vmem>>, vector<64x256xf32>,
    %c0_218 = arith.constant 0 : index
    %c33_219 = arith.constant 33 : index
    %380 = vector.load %arg25[%c0_218, %c33_219] : memref<64x290xf32, #tpu.memory_space<vmem>>, vector<64x256xf32>
    %c448 = arith.constant 448 : index
    %c0_220 = arith.constant 0 : index
    %381 = vector.load %arg26[%c448, %c0_220] : memref<576x256xf32, #tpu.memory_space<vmem>>, vector<64x256xf32>
    tpu.vector_store %arg26[%c448, %c0_220], %380 {strides = array<i32>} : memref<576x256xf32, #tpu.memory_space<vmem>>, vector<64x256xf32>,
    %c0_221 = arith.constant 0 : index
    %c34_222 = arith.constant 34 : index
    %382 = vector.load %arg25[%c0_221, %c34_222] : memref<64x290xf32, #tpu.memory_space<vmem>>, vector<64x256xf32>
    %383 = vector.broadcast %24 : vector<1x256xf32> to vector<64x256xf32>
    %384 = arith.mulf %382, %383 : vector<64x256xf32>
    %c512 = arith.constant 512 : index
    %c0_223 = arith.constant 0 : index
    %385 = vector.load %arg26[%c512, %c0_223] : memref<576x256xf32, #tpu.memory_space<vmem>>, vector<64x256xf32>
    tpu.vector_store %arg26[%c512, %c0_223], %384 {strides = array<i32>} : memref<576x256xf32, #tpu.memory_space<vmem>>, vector<64x256xf32>,
    %c0_224 = arith.constant 0 : index
    %c0_225 = arith.constant 0 : index
    %386 = vector.load %arg19[%c0_224, %c0_225] : memref<16x576xf32, #tpu.memory_space<vmem>>, vector<16x576xf32>
    %c0_226 = arith.constant 0 : index
    %c0_227 = arith.constant 0 : index
    %387 = vector.load %arg26[%c0_226, %c0_227] : memref<576x256xf32, #tpu.memory_space<vmem>>, vector<576x256xf32>
    %cst_228 = arith.constant dense<0.000000e+00> : vector<16x256xf32>
    %388 = tpu.matmul %386, %387, %cst_228 {dimension_numbers = #tpu.dot_dimension_numbers<[1], [0], [0], [1], [0, 0, 1, 1], [], []>} : vector<16x576xf32>, vector<576x256xf32>, vector<16x256xf32> -> vector<16x256xf32>
    %c0_229 = arith.constant 0 : index
    %c0_230 = arith.constant 0 : index
    %389 = vector.load %arg20[%c0_229, %c0_230] : memref<16x1xf32, #tpu.memory_space<vmem>>, vector<16x1xf32>
    %390 = vector.broadcast %389 : vector<16x1xf32> to vector<16x256xf32>
    %391 = arith.addf %388, %390 : vector<16x256xf32>
    %cst_231 = arith.constant 0.000000e+00 : f32
    %392 = vector.broadcast %cst_231 : f32 to vector<16x256xf32>
    %393 = arith.maximumf %391, %392 : vector<16x256xf32>
    %c0_232 = arith.constant 0 : index
    %c0_233 = arith.constant 0 : index
    %394 = vector.load %arg21[%c0_232, %c0_233] : memref<16x16xf32, #tpu.memory_space<vmem>>, vector<16x16xf32>
    %cst_234 = arith.constant dense<0.000000e+00> : vector<16x256xf32>
    %395 = tpu.matmul %394, %393, %cst_234 {dimension_numbers = #tpu.dot_dimension_numbers<[1], [0], [0], [1], [0, 0, 1, 1], [], []>} : vector<16x16xf32>, vector<16x256xf32>, vector<16x256xf32> -> vector<16x256xf32>
    %c0_235 = arith.constant 0 : index
    %c0_236 = arith.constant 0 : index
    %396 = vector.load %arg22[%c0_235, %c0_236] : memref<16x1xf32, #tpu.memory_space<vmem>>, vector<16x1xf32>
    %397 = vector.broadcast %396 : vector<16x1xf32> to vector<16x256xf32>
    %398 = arith.addf %395, %397 : vector<16x256xf32>
    %cst_237 = arith.constant 0.000000e+00 : f32
    %399 = vector.broadcast %cst_237 : f32 to vector<16x256xf32>
    %400 = arith.maximumf %398, %399 : vector<16x256xf32>
    %401 = vector.shape_cast %400 : vector<16x256xf32> to vector<1x16x256xf32>
    %c0_238 = arith.constant 0 : index
    %c0_239 = arith.constant 0 : index
    %c0_240 = arith.constant 0 : index
    %402 = vector.load %arg23[%c0_238, %c0_239, %c0_240] : memref<1x16x256xf32, #tpu.memory_space<vmem>>, vector<1x16x256xf32>
    tpu.vector_store %arg23[%c0_238, %c0_239, %c0_240], %401 {strides = array<i32>} : memref<1x16x256xf32, #tpu.memory_space<vmem>>, vector<1x16x256xf32>,
    return
  }
  func.func @transform_0(%arg0: i32) -> (i32, i32, i32) {
    %c0_i32 = arith.constant 0 : i32
    %c0_i32_0 = arith.constant 0 : i32
    %c0_i32_1 = arith.constant 0 : i32
    return %arg0, %c0_i32, %c0_i32_0 : i32, i32, i32
  }
  func.func @transform_1(%arg0: i32) -> (i32, i32, i32) {
    %c0_i32 = arith.constant 0 : i32
    %c0_i32_0 = arith.constant 0 : i32
    %c0_i32_1 = arith.constant 0 : i32
    return %arg0, %c0_i32, %c0_i32_0 : i32, i32, i32
  }
  func.func @transform_2(%arg0: i32) -> (i32, i32) {
    %c0_i32 = arith.constant 0 : i32
    %c0_i32_0 = arith.constant 0 : i32
    %c0_i32_1 = arith.constant 0 : i32
    return %c0_i32, %c0_i32_0 : i32, i32
  }
  func.func @transform_3(%arg0: i32) -> (i32, i32) {
    %c0_i32 = arith.constant 0 : i32
    %c0_i32_0 = arith.constant 0 : i32
    %c0_i32_1 = arith.constant 0 : i32
    return %c0_i32, %c0_i32_0 : i32, i32
  }
  func.func @transform_4(%arg0: i32) -> (i32, i32) {
    %c0_i32 = arith.constant 0 : i32
    %c0_i32_0 = arith.constant 0 : i32
    %c0_i32_1 = arith.constant 0 : i32
    return %c0_i32, %c0_i32_0 : i32, i32
  }
  func.func @transform_5(%arg0: i32) -> (i32, i32) {
    %c0_i32 = arith.constant 0 : i32
    %c0_i32_0 = arith.constant 0 : i32
    %c0_i32_1 = arith.constant 0 : i32
    return %c0_i32, %c0_i32_0 : i32, i32
  }
  func.func @transform_6(%arg0: i32) -> i32 {
    %c0_i32 = arith.constant 0 : i32
    %c0_i32_0 = arith.constant 0 : i32
    return %c0_i32 : i32
  }
  func.func @transform_7(%arg0: i32) -> (i32, i32) {
    %c0_i32 = arith.constant 0 : i32
    %c0_i32_0 = arith.constant 0 : i32
    %c0_i32_1 = arith.constant 0 : i32
    return %c0_i32, %c0_i32_0 : i32, i32
  }
  func.func @transform_8(%arg0: i32) -> (i32, i32) {
    %c0_i32 = arith.constant 0 : i32
    %c0_i32_0 = arith.constant 0 : i32
    %c0_i32_1 = arith.constant 0 : i32
    return %c0_i32, %c0_i32_0 : i32, i32
  }
  func.func @transform_9(%arg0: i32) -> (i32, i32) {
    %c0_i32 = arith.constant 0 : i32
    %c0_i32_0 = arith.constant 0 : i32
    %c0_i32_1 = arith.constant 0 : i32
    return %c0_i32, %c0_i32_0 : i32, i32
  }
  func.func @transform_10(%arg0: i32) -> (i32, i32) {
    %c0_i32 = arith.constant 0 : i32
    %c0_i32_0 = arith.constant 0 : i32
    %c0_i32_1 = arith.constant 0 : i32
    return %c0_i32, %c0_i32_0 : i32, i32
  }
  func.func @transform_11(%arg0: i32) -> i32 {
    %c0_i32 = arith.constant 0 : i32
    %c0_i32_0 = arith.constant 0 : i32
    return %c0_i32 : i32
  }
  func.func @transform_12(%arg0: i32) -> (i32, i32) {
    %c0_i32 = arith.constant 0 : i32
    %c0_i32_0 = arith.constant 0 : i32
    %c0_i32_1 = arith.constant 0 : i32
    return %c0_i32, %c0_i32_0 : i32, i32
  }
  func.func @transform_13(%arg0: i32) -> (i32, i32) {
    %c0_i32 = arith.constant 0 : i32
    %c0_i32_0 = arith.constant 0 : i32
    %c0_i32_1 = arith.constant 0 : i32
    return %c0_i32, %c0_i32_0 : i32, i32
  }
  func.func @transform_14(%arg0: i32) -> (i32, i32) {
    %c0_i32 = arith.constant 0 : i32
    %c0_i32_0 = arith.constant 0 : i32
    %c0_i32_1 = arith.constant 0 : i32
    return %c0_i32, %c0_i32_0 : i32, i32
  }
  func.func @transform_15(%arg0: i32) -> (i32, i32) {
    %c0_i32 = arith.constant 0 : i32
    %c0_i32_0 = arith.constant 0 : i32
    %c0_i32_1 = arith.constant 0 : i32
    return %c0_i32, %c0_i32_0 : i32, i32
  }
  func.func @transform_16(%arg0: i32) -> (i32, i32) {
    %c0_i32 = arith.constant 0 : i32
    %c0_i32_0 = arith.constant 0 : i32
    %c0_i32_1 = arith.constant 0 : i32
    return %c0_i32, %c0_i32_0 : i32, i32
  }
  func.func @transform_17(%arg0: i32) -> (i32, i32) {
    %c0_i32 = arith.constant 0 : i32
    %c0_i32_0 = arith.constant 0 : i32
    %c0_i32_1 = arith.constant 0 : i32
    return %c0_i32, %c0_i32_0 : i32, i32
  }
  func.func @transform_18(%arg0: i32) -> (i32, i32) {
    %c0_i32 = arith.constant 0 : i32
    %c0_i32_0 = arith.constant 0 : i32
    %c0_i32_1 = arith.constant 0 : i32
    return %c0_i32, %c0_i32_0 : i32, i32
  }
  func.func @transform_19(%arg0: i32) -> (i32, i32) {
    %c0_i32 = arith.constant 0 : i32
    %c0_i32_0 = arith.constant 0 : i32
    %c0_i32_1 = arith.constant 0 : i32
    return %c0_i32, %c0_i32_0 : i32, i32
  }
  func.func @transform_20(%arg0: i32) -> (i32, i32) {
    %c0_i32 = arith.constant 0 : i32
    %c0_i32_0 = arith.constant 0 : i32
    %c0_i32_1 = arith.constant 0 : i32
    return %c0_i32, %c0_i32_0 : i32, i32
  }
  func.func @transform_21(%arg0: i32) -> (i32, i32) {
    %c0_i32 = arith.constant 0 : i32
    %c0_i32_0 = arith.constant 0 : i32
    %c0_i32_1 = arith.constant 0 : i32
    return %c0_i32, %c0_i32_0 : i32, i32
  }
  func.func @transform_22(%arg0: i32) -> (i32, i32, i32) {
    %c0_i32 = arith.constant 0 : i32
    %c0_i32_0 = arith.constant 0 : i32
    %c0_i32_1 = arith.constant 0 : i32
    return %arg0, %c0_i32, %c0_i32_0 : i32, i32, i32
  }
}

</mosaic_0001>

<bundles_post_ra>
// kernel: module_1_start_forward.1
= control target key start
LH: loop header
LB: loop body
LE: loop exit
PB: predicated region body
PF: predicated region fallthrough
CT: control target
= control target key end

     0   :  { %s8410_s0 = inlined_call_operand.vmem [shape: f32[2,32,256], index: 0, kind: input, shape index: {}]   ;;  %s8411_s1 = inlined_call_operand.vmem [shape: f32[2,16,256], index: 1, kind: input, shape index: {}]   ;;  %s8412_s2 = inlined_call_operand.vmem [shape: f32[32,32], index: 2, kind: input, shape index: {}]   ;;  %s8413_s3 = inlined_call_operand.vmem [shape: f32[32,1], index: 3, kind: input, shape index: {}]   ;;  %s8414_s4 = inlined_call_operand.vmem [shape: f32[2,32], index: 4, kind: input, shape index: {}]   ;;  %s8415_s5 = inlined_call_operand.vmem [shape: f32[32,2], index: 5, kind: input, shape index: {}]   ;;  %s8416_s6 = inlined_call_operand.vmem [shape: f32[18], index: 6, kind: input, shape index: {}]   ;;  %s8417_s7 = inlined_call_operand.vmem [shape: f32[32,16], index: 7, kind: input, shape index: {}]   ;;  %s8418_s8 = inlined_call_operand.vmem [shape: f32[32,1], index: 8, kind: input, shape index: {}]   ;;  %s8419_s9 = inlined_call_operand.vmem [shape: f32[2,32], index: 9, kind: input, shape index: {}]   ;;  %s8420_s10 = inlined_call_operand.vmem [shape: f32[32,2], index: 10, kind: input, shape index: {}]   ;;  %s8421_s11 = inlined_call_operand.vmem [shape: f32[18], index: 11, kind: input, shape index: {}]   ;;  %s8422_s12 = inlined_call_operand.vmem [shape: f32[32,32], index: 12, kind: input, shape index: {}]   ;;  %s8423_s13 = inlined_call_operand.vmem [shape: f32[32,1], index: 13, kind: input, shape index: {}]   ;;  %s8424_s14 = inlined_call_operand.vmem [shape: f32[32,32], index: 14, kind: input, shape index: {}]   ;;  %s8425_s15 = inlined_call_operand.vmem [shape: f32[32,1], index: 15, kind: input, shape index: {}]   ;;  %s8426_s16 = inlined_call_operand.vmem [shape: f32[32,32], index: 16, kind: input, shape index: {}]   ;;  %s8427_s17 = inlined_call_operand.vmem [shape: f32[32,1], index: 17, kind: input, shape index: {}]   ;;  %s8428_s18 = inlined_call_operand.vmem [shape: f32[16,576], index: 18, kind: input, shape index: {}]   ;;  %s8429_s19 = inlined_call_operand.vmem [shape: f32[16,1], index: 19, kind: input, shape index: {}]   ;;  %s8430_s20 = inlined_call_operand.vmem [shape: f32[16,16], index: 20, kind: input, shape index: {}]   ;;  %s8431_s21 = inlined_call_operand.vmem [shape: f32[16,1], index: 21, kind: input, shape index: {}]   ;;  %s8432_s22 = inlined_call_operand.vmem [shape: f32[2,16,256], index: 22, kind: output, shape index: {}]  }
   0x1   :  { %8510 = sst [smem:[#allocation48_spill]] %s8410_s0 }
   0x2   :  { %8511 = sst [smem:[#allocation49_spill]] %s8411_s1 }
   0x3   :  { %8512 = sst [smem:[#allocation50_spill]] %s8412_s2 }
   0x4   :  { %8513 = sst [smem:[#allocation51_spill]] %s8413_s3 }
   0x5   :  { %8514 = sst [smem:[#allocation52_spill]] %s8414_s4 }
   0x6   :  { %8515 = sst [smem:[#allocation53_spill]] %s8415_s5 }
   0x7   :  { %8516 = sst [smem:[#allocation54_spill]] %s8416_s6 }
   0x8   :  { %8517 = sst [smem:[#allocation55_spill]] %s8421_s11 }
   0x9   :  { %27 = vsyncpa [#allocation6], 0 }
   0xa   :  { %28 = vsyncpa [#allocation8], 0  ;;  %s6262_s3 = smov 0  }
   0xb LB: > { %8518 = sst [smem:[#allocation11_spill]] %s6124_s3  ;;  %s6268_s28 = sadd.s32 4294967295, %s6124_s3   ;;  %s6124_s3 = sphi %s6262_s3, %s34_s3  }
   0xc   : > { %p4949_p0 = scmp.ge.s32.totalorder %s6124_s3, 1  ;;  %p537_p1 = scmp.lt.s32.totalorder %s6124_s3, 3 }
   0xd   : > { %s8519_s4 = sld [smem:[#allocation54_spill]]  ;;  %p8436_p3 = scmp.eq.s32.totalorder %s6268_s28, 0 }
   0xe   : > { %p6275_p2 = pnand %p4949_p0, %p537_p1  ;;  %s8521_s11 = sld [smem:[#allocation55_spill]] }
  0x10   : > { %s8520_s23 = scalar_select %p6275_p2, 1, 0 }
  0x11   : > { %p5493_p4 = pneg %p6275_p2 }
  0x13   : > { %s562_s0 = sshll.u32 %s8519_s4, 4  ;;  %p6287_p5 = pnand %p8436_p3, %p5493_p4  ;;  %s563_s0 = int_to_ptr.vmem [resolvable:$true] %s562_s0 }
  0x14   : > { %s585_s24 = sshll.u32 %s8521_s11, 4  ;;  %s6080_s25 = scalar_lea.vmem %s563_s0, 16  ;;  %s586_s24 = int_to_ptr.vmem [resolvable:$true] %s585_s24 }
  0x15   : > { %p6081_p6 = scmp.ne.s32.totalorder %s563_s0, %s6080_s25  ;;  %p6082_p7 = pneg %p6287_p5 }
  0x16   : > { %p6088_p10 = scmp.lt.s32.totalorder %s563_s0, %s563_s0  ;;  %p6089_p11 = scmp.lt.s32.totalorder %s6080_s25, %s6080_s25 }
  0x17   : > { %p6083_p8 = pnand %p6082_p7, %p6081_p6 }
  0x18   : > { %p6090_p12 = por %p6089_p11, %p6088_p10 }
  0x19   : > { %p6084_p9 = pneg %p6083_p8 }
  0x1b   : > { %p6091_p13 = pnand %p6090_p12, %p6084_p9 }
  0x1d   : > { %6094 = shalt.err (!%p6091_p13)
}
  0x1e   : > { %s6126_s26 = smov [#allocation5]   ;;  %s6095_s2 = scalar_lea.vmem %s586_s24, 16 }
  0x1f   : > { %5496 = dma.vmem_to_smem (!%p6287_p5), %s563_s0, 16, %s6126_s26, [#allocation6]  }
  0x20   : > { %p6096_p0 = scmp.ne.s32.totalorder %s586_s24, %s6095_s2  ;;  %p6103_p3 = scmp.lt.s32.totalorder %s586_s24, %s586_s24 }
  0x21   : > { %p6104_p2 = scmp.lt.s32.totalorder %s6095_s2, %s6095_s2 }
  0x22   : > { %p6098_p1 = pnand %p6096_p0, %p6082_p7 }
  0x23   : > { %p6105_p6 = por %p6104_p2, %p6103_p3 }
  0x24   : > { %p6099_p4 = pneg %p6098_p1 }
  0x26   : > { %p6106_p8 = pnand %p6105_p6, %p6099_p4 }
  0x28   : > { %6109 = shalt.err (!%p6106_p8)
}
  0x29   : > { %s6127_s27 = smov [#allocation7]   ;;  %p8523_p9 = scmp.ne.s32.totalorder %s8520_s23, 0 }
  0x2a   : > { %5499 = dma.vmem_to_smem (!%p6287_p5), %s586_s24, 16, %s6127_s27, [#allocation8]  }
  0x2b   : > { %644 = sbr.rel (%p8523_p9) target bundleno = 3237 (0xca5), region = 108 }
  0x32   : > { %p8524_p10 = scmp.eq.s32.totalorder %s6268_s28, 0 }
  0x34   : > { %6115 = dma.done.wait (%p8524_p10), [#allocation6], 16   ;;  %p8525_p11 = pmov %p8524_p10 }
  0x35   : > { %p8526_p7 = pmov %p8524_p10 }
  0x36   : > { %6117 = vsyncadd (%p8525_p11), [#allocation6], 4294967280 }
  0x37   : > { %6119 = dma.done.wait (%p8526_p7), [#allocation8], 16   ;;  %p8527_p2 = pmov %p8526_p7 }
  0x39   : > { %6121 = vsyncadd (%p8527_p2), [#allocation8], 4294967280 }
  0x3a   : > { %654 = sfence }
  0x3b   : > { %p716_p3 = scmp.lt.s32.totalorder %s6268_s28, 1  ;;  %v8465_v0 = vmov 0.0   ;;  %s8528_s4 = sld [smem:[#allocation51_spill]]  ;;  %v6129_v2 = vmov 0   ;;  %vm828_vm0 = vcmask 261120   ;;  %vm1545_vm1 = vcmask 130048  }
  0x3c   : > { %905 = vmatprep.mubr.f32.mxu0 %v8465_v0  ;;  %5533 = vset.pattern.permute.xlu0 %v6129_v2  ;;  %s8529_s29 = sld [smem:[#allocation48_spill]]  ;;  %s8530_s23 = sld [smem:[#allocation49_spill]]  ;;  %v1703_v28 = vld [vmem:[%s8417_s7] sm:$0xff]  ;;  %v1704_v29 = vld [vmem:[%s8417_s7 + $0x8] sm:$0xff]  ;;  %v1705_v30 = vld [vmem:[%s8417_s7 + $0x10] sm:$0xff]  ;;  %vm6131_vm2 = vmmov 0  }
  0x3d   : > { %s8671_s28 = smov (!%p716_p3, %s6268_s28), 1  ;;  %5534 = vset.pattern.permute.xlu1 %v6129_v2  ;;  %s8531_s5 = sld [smem:[#allocation50_spill]]  ;;  %v1706_v31 = vld [vmem:[%s8417_s7 + $0x18] sm:$0xff]  ;;  %5135 = vmatprep.mubr.msk.f32.mxu1 %vm6131_vm2, %v8465_v0  ;;  %vm1117_vm3 = vcmask 15360   ;;  %vm1130_vm4 = vcmask 1041408   ;;  %vm770_vm5 = vcmask 132096  }
  0x3e   : > { %s5060_s1 = sshll.u32 %s8671_s28, 6  ;;  %s8439_s26 = sshll.u32 %s8671_s28, 5  ;;  %vm772_vm6 = vcmask 271496   ;;  %vm774_vm7 = vcmask 138240   ;;  %771 = vst.msk [vmem:[#allocation2] sm:$0x3] %vm770_vm5, %v8465_v0 }
  0x3f   : > { %s8532_s24 = sld [smem:[#allocation52_spill]]  ;;  %s8533_s25 = sld [smem:[#allocation53_spill]]  ;;  %773 = vst.msk [vmem:[#allocation2 + $0x4] sm:$0x3] %vm772_vm6, %v8465_v0  ;;  %vm1584_vm15 = vcmask 146432   ;;  %vm1529_vm5 = vcmask 1031168  }
  0x40   : > { %775 = vst.msk [vmem:[#allocation3] sm:$0xff] %vm774_vm7, %v8465_v0  ;;  %776 = vst.msk [vmem:[#allocation3 + $0x18] sm:$0xff] %vm774_vm7, %v8465_v0  ;;  %s4987_s11 = sld [smem:[#allocation5 + $0x2]]  ;;  %s8442_s6 = smov 2   ;;  %vm1553_vm6 = vcmask 916480  }
  0x41   : > { %v804_v1 = vld [vmem:[%s8528_s4] sm:$0xff]  ;;  %v806_v3 = vld [vmem:[%s8528_s4 + $0x10] sm:$0xff]  ;;  %v805_v4 = vld [vmem:[%s8528_s4 + $0x8] sm:$0xff]  ;;  %777 = vst.msk [vmem:[#allocation3 + $0x30] sm:$0xff] %vm774_vm7, %v8465_v0  ;;  %s8444_s2 = smov 18   ;;  %s8447_s27 = smov 127  }
  0x42   : > { %810 = vperm.xlu0 %5533, %v804_v1   ;;  %820 = vperm.xlu1 %5534, %v806_v3   ;;  %v807_v5 = vld [vmem:[%s8528_s4 + $0x18] sm:$0xff]  ;;  %s720_s30 = scalar_lea.vmem %s8529_s29, %s5060_s1  ;;  %s725_s3 = scalar_lea.vmem %s8530_s23, %s8439_s26  ;;  %778 = vst.msk [vmem:[#allocation3 + $0x48] sm:$0xff] %vm774_vm7, %v8465_v0  ;;  %779 = vst.msk [vmem:[#allocation3 + $0x60] sm:$0xff] %vm774_vm7, %v8465_v0 }
  0x43   : > { %v793_v6 = vld [vmem:[%s720_s30 + $0x8] sm:$0xff]  ;;  %v795_v7 = vld [vmem:[%s720_s30 + $0x18] sm:$0xff]  ;;  %v792_v8 = vld [vmem:[%s720_s30] sm:$0xff]  ;;  %s8440_s23 = smov 17   ;;  %780 = vst.msk [vmem:[#allocation3 + $0x78] sm:$0xff] %vm774_vm7, %v8465_v0  ;;  %s4988_s1 = sld [smem:[#allocation5 + $0x3]] }
  0x44   : > { %v5245_v9 = vpack.c.bf16 %v795_v7, %v793_v6  ;;  %v794_v10 = vld [vmem:[%s720_s30 + $0x10] sm:$0xff]  ;;  %v797_v11 = vld [vmem:[%s720_s30 + $0x28] sm:$0xff]  ;;  %v799_v12 = vld [vmem:[%s720_s30 + $0x38] sm:$0xff]  ;;  %781 = vst.msk [vmem:[#allocation3 + $0x90] sm:$0xff] %vm774_vm7, %v8465_v0  ;;  %s8445_s29 = smov 34   ;;  %s4992_s0 = sld [smem:[#allocation5 + $0x7]] }
  0x45   : > { %v5247_v13 = vpack.c.bf16 %v794_v10, %v792_v8  ;;  %v5249_v14 = vpack.c.bf16 %v799_v12, %v797_v11  ;;  %v796_v15 = vld [vmem:[%s720_s30 + $0x20] sm:$0xff]  ;;  %v798_v16 = vld [vmem:[%s720_s30 + $0x30] sm:$0xff]  ;;  %v1700_v17 = vld [vmem:[%s725_s3 + $0x8] sm:$0xff]  ;;  %782 = vst.msk [vmem:[#allocation3 + $0xa8] sm:$0xff] %vm774_vm7, %v8465_v0  ;;  %s4991_s30 = sld [smem:[#allocation5 + $0x6]]  ;;  %s6682_s26 = sld [smem:[#allocation5 + $0x9]] }
  0x46   : > { %815 = vperm.xlu0 %5533, %v805_v4   ;;  %825 = vperm.xlu1 %5534, %v807_v5   ;;  %v1702_v18 = vld [vmem:[%s725_s3 + $0x18] sm:$0xff]  ;;  %v5251_v19 = vpack.c.bf16 %v798_v16, %v796_v15  ;;  %v1699_v21 = vld [vmem:[%s725_s3] sm:$0xff]  ;;  %v1701_v22 = vld [vmem:[%s725_s3 + $0x10] sm:$0xff]  ;;  %v6130_v5 = vmov 0.0|0.0   ;;  %s8446_s3 = smov 32   ;;  %s6731_s4 = sld [smem:[#allocation7 + $0x6]] }
  0x47   : > { %5246 = vmatprep.subr.bf16.mxu0 %v5245_v9  ;;  %v5265_v20 = vpack.c.bf16 %v1702_v18, %v1700_v17  ;;  %v800_v23 = vld [vmem:[%s8531_s5] sm:$0xff]  ;;  %v5267_v24 = vpack.c.bf16 %v1701_v22, %v1699_v21  ;;  %v801_v25 = vld [vmem:[%s8531_s5 + $0x8] sm:$0xff]  ;;  %v802_v26 = vld [vmem:[%s8531_s5 + $0x10] sm:$0xff]  ;;  %5253 = vmatprep.subr.bf16.mxu1 %v6130_v5 }
  0x48   : > { %5248 = vmatpush1.bf16.msra.mxu0 %v5247_v13  ;;  %v803_v27 = vld [vmem:[%s8531_s5 + $0x18] sm:$0xff]  ;;  %v1707_v6 = vld [vmem:[%s8418_s8] sm:$0xff]  ;;  %v1709_v9 = vld [vmem:[%s8418_s8 + $0x10] sm:$0xff]  ;;  %s8550_s5 = smov 95  }
  0x49   : > { %5250 = vmatprep.subr.bf16.mxu0 %v5249_v14  ;;  %v1710_v14 = vld [vmem:[%s8418_s8 + $0x18] sm:$0xff]  ;;  %v1708_v17 = vld [vmem:[%s8418_s8 + $0x8] sm:$0xff] }
  0x4c   : > { %5252 = vmatpush1.bf16.msra.mxu0 %v5251_v19 }
  0x4d   : > { %5266 = vmatprep.subr.bf16.mxu0 %v5265_v20 }
  0x4f   : > { %4966 = vmatmul.mubr.msk.f32.vlgmr.msra.gmra.mrb[0].mxu0 %vm828_vm0, %v800_v23 }
  0x50   : > { %911 = vmatprep.mubr.f32.mxu0 %v8465_v0  ;;  %5268 = vmatpush1.bf16.msra.mxu0 %v5267_v24 }
  0x51   : > { %5275 = vmatprep.subr.bf16.mxu0 %v6130_v5 }
  0x53   : > { %4967 = vmatmul.mubr.msk.f32.gmra.mrb[2].mxu0 %vm828_vm0, %v801_v25 }
  0x54   : > { %917 = vmatprep.mubr.f32.mxu0 %v8465_v0 }
  0x57   : > { %4968 = vmatmul.mubr.msk.f32.gmra.mrb[4].mxu0 %vm828_vm0, %v802_v26 }
  0x58   : > { %923 = vmatprep.mubr.f32.mxu0 %v8465_v0 }
  0x5b   : > { %4969 = vmatmul.mubr.msk.f32.gmra.mrb[6].mxu0 %vm828_vm0, %v803_v27 }
  0x5c   : > { %1807 = vmatprep.mubr.f32.mxu0 %v8465_v0 }
  0x5f   : > { %5004 = vmatmul.mubr.msk.f32.vlgmr.msra.gmra.mrb[8].mxu0 %vm1545_vm1, %v1703_v28 }
  0x60   : > { %1813 = vmatprep.mubr.f32.mxu0 %v8465_v0 }
  0x63   : > { %5005 = vmatmul.mubr.msk.f32.gmra.mrb[10].mxu0 %vm1545_vm1, %v1704_v29 }
  0x64   : > { %1819 = vmatprep.mubr.f32.mxu0 %v8465_v0 }
  0x67   : > { %5006 = vmatmul.mubr.msk.f32.gmra.mrb[12].mxu0 %vm1545_vm1, %v1705_v30 }
  0x68   : > { %1825 = vmatprep.mubr.f32.mxu0 %v8465_v0 }
  0x6b   : > { %5007 = vmatmul.mubr.msk.f32.gmra.mrb[14].mxu0 %vm1545_vm1, %v1706_v31 }
  0x6c   : > { %5184 = vmatprep.mubr.msk.f32.mxu0 %vm6131_vm2, %v8465_v0 }
  0xc1   : > { %v811_v32 = vpop.permute.xlu0 %810  ;;  %v821_v43 = vpop.permute.xlu1 %820 }
  0xc5   : > { %v816_v37 = vpop.permute.xlu0 %815  ;;  %v826_v54 = vpop.permute.xlu1 %825 }
 0x122   : > { %v907_v33 = vpop.f32.mrb[0].mxu0 }
 0x123   : > { %v908_v34 = vadd.f32 %v907_v33, %v811_v32  ;;  %v909_v35 = vpop.f32.mrb[1].mxu0 }
 0x124   : > { %v910_v36 = vadd.f32 %v909_v35, %v811_v32 }
 0x125   : > { %v6373_v38 = vmax.f32 %v908_v34, 0.0  ;;  %v967_v34 = vld [vmem:[%s8532_s24] sm:$0x3]  ;;  %s8443_s24 = smov 16  }
 0x126   : > { %v6375_v39 = vmax.f32 %v910_v36, 0.0  ;;  %v913_v40 = vpop.f32.mrb[2].mxu0 }
 0x127   : > { %v914_v41 = vadd.f32 %v913_v40, %v816_v37  ;;  %v915_v42 = vpop.f32.mrb[3].mxu0 }
 0x128   : > { %v916_v44 = vadd.f32 %v915_v42, %v816_v37  ;;  %v938_v45 = vadd.f32 %v6375_v39, %v6373_v38  ;;  %v955_v60 = vmax.f32 %v6373_v38, %v6375_v39 }
 0x129   : > { %v6379_v46 = vmax.f32 %v914_v41, 0.0 }
 0x12a   : > { %v6381_v47 = vmax.f32 %v916_v44, 0.0  ;;  %v919_v48 = vpop.f32.mrb[4].mxu0  ;;  %939 = vadd.xlane.f32.xlu0 %v938_v45 }
 0x12b   : > { %v920_v49 = vadd.f32 %v919_v48, %v821_v43  ;;  %v921_v50 = vpop.f32.mrb[5].mxu0 }
 0x12c   : > { %v922_v51 = vadd.f32 %v921_v50, %v821_v43  ;;  %v941_v52 = vadd.f32 %v6381_v47, %v6379_v46  ;;  %v958_v3 = vmax.f32 %v6379_v46, %v6381_v47 }
 0x12d   : > { %v6385_v53 = vmax.f32 %v920_v49, 0.0 }
 0x12e   : > { %v6387_v55 = vmax.f32 %v922_v51, 0.0  ;;  %v925_v56 = vpop.f32.mrb[6].mxu0  ;;  %942 = vadd.xlane.f32.xlu1 %v941_v52 }
 0x12f   : > { %v926_v57 = vadd.f32 %v925_v56, %v826_v54  ;;  %v927_v58 = vpop.f32.mrb[7].mxu0 }
 0x130   : > { %v928_v59 = vadd.f32 %v927_v58, %v826_v54  ;;  %v944_v61 = vadd.f32 %v6387_v55, %v6385_v53  ;;  %v961_v1 = vmax.f32 %v6385_v53, %v6387_v55 }
 0x131   : > { %v6393_v62 = vmax.f32 %v926_v57, 0.0 }
 0x132   : > { %v6395_v63 = vmax.f32 %v928_v59, 0.0  ;;  %956 = vmax.xlane.f32.xlu1 %v955_v60  ;;  %945 = vadd.xlane.f32.xlu0 %v944_v61  ;;  %v1809_v7 = vpop.f32.mrb[8].mxu0 }
 0x133   : > { %v1811_v8 = vpop.f32.mrb[9].mxu0 }
 0x134   : > { %v947_v2 = vadd.f32 %v6395_v63, %v6393_v62  ;;  %v964_v4 = vmax.f32 %v6393_v62, %v6395_v63 }
 0x136   : > { %962 = vmax.xlane.f32.xlu1 %v961_v1  ;;  %948 = vadd.xlane.f32.xlu0 %v947_v2  ;;  %v1815_v10 = vpop.f32.mrb[10].mxu0 }
 0x137   : > { %v1817_v11 = vpop.f32.mrb[11].mxu0 }
 0x13a   : > { %959 = vmax.xlane.f32.xlu0 %v958_v3  ;;  %v1821_v12 = vpop.f32.mrb[12].mxu0 }
 0x13b   : > { %v1823_v13 = vpop.f32.mrb[13].mxu0 }
 0x13e   : > { %965 = vmax.xlane.f32.xlu0 %v964_v4  ;;  %v1827_v15 = vpop.f32.mrb[14].mxu0 }
 0x13f   : > { %v1829_v16 = vpop.f32.mrb[15].mxu0 }
 0x147   : > { %1713 = vperm.xlu1 %5534, %v1707_v6  }
 0x14b   : > { %1723 = vperm.xlu1 %5534, %v1709_v9   ;;  %v1113_v9 = vld [vmem:[%s8533_s25] sm:$0xff] }
 0x14f   : > { %1728 = vperm.xlu1 %5534, %v1710_v14  }
 0x154   : > { %1718 = vperm.xlu0 %5533, %v1708_v17  }
 0x1b7   : > { %v940_v18 = vpop.xlane.xlu0 %939 }
 0x1b8   : > { %v951_v20 = vmul.f32 0.00390625, %v940_v18 }
 0x1bb   : > { %v943_v19 = vpop.xlane.xlu1 %942 }
 0x1bc   : > { %v952_v21 = vmul.f32 0.00390625, %v943_v19 }
 0x1be   : > { %v5254_v22 = vpack.c.bf16 %v952_v21, %v951_v20 }
 0x1bf   : > { %v957_v23 = vpop.xlane.xlu1 %956  ;;  %v946_v24 = vpop.xlane.xlu0 %945 }
 0x1c0   : > { %5255 = vmatpush3.bf16.msra.mxu1 %v5254_v22  ;;  %v953_v27 = vmul.f32 0.00390625, %v946_v24  ;;  %v1114_v22 = vld [vmem:[%s8533_s25 + $0x8] sm:$0xff] }
 0x1c1   : > { %5256 = vmatprep.subr.bf16.mxu1 %v6130_v5 }
 0x1c3   : > { %v963_v25 = vpop.xlane.xlu1 %962  ;;  %v949_v26 = vpop.xlane.xlu0 %948 }
 0x1c4   : > { %v954_v28 = vmul.f32 0.00390625, %v949_v26 }
 0x1c6   : > { %v5257_v29 = vpack.c.bf16 %v954_v28, %v953_v27  ;;  %v1116_v27 = vld [vmem:[%s8533_s25 + $0x18] sm:$0xff] }
 0x1c7   : > { %v1714_v30 = vpop.permute.xlu1 %1713  ;;  %v960_v31 = vpop.xlane.xlu0 %959 }
 0x1c8   : > { %v1810_v32 = vadd.f32 %v1809_v7, %v1714_v30  ;;  %v1812_v33 = vadd.f32 %v1811_v8, %v1714_v30  ;;  %5258 = vmatpush3.bf16.msra.mxu1 %v5257_v29  ;;  %v5260_v37 = vpack.c.bf16 %v960_v31, %v957_v23 }
 0x1c9   : > { %5259 = vmatprep.subr.bf16.mxu1 %v6130_v5 }
 0x1ca   : > { %v6428_v35 = vmax.f32 %v1810_v32, 0.0  ;;  %v6430_v36 = vmax.f32 %v1812_v33, 0.0 }
 0x1cb   : > { %v1724_v40 = vpop.permute.xlu1 %1723  ;;  %5136 = vmatmul.mubr.msk.f32.vlgmr.msra.gmra.mrb[0].mxu1 %vm828_vm0, %v967_v34  ;;  %v966_v41 = vpop.xlane.xlu0 %965 }
 0x1cc   : > { %v1822_v42 = vadd.f32 %v1821_v12, %v1724_v40  ;;  %v1824_v43 = vadd.f32 %v1823_v13, %v1724_v40  ;;  %5261 = vmatpush3.bf16.msra.mxu1 %v5260_v37  ;;  %v1856_v44 = vmax.f32 %v6428_v35, %v6430_v36  ;;  %5146 = vmatprep.mubr.msk.f32.mxu1 %vm6131_vm2, %v8465_v0  ;;  %v2014_v40 = vld [vmem:[%s8420_s10] sm:$0xff] }
 0x1cd   : > { %5262 = vmatprep.subr.bf16.mxu1 %v6130_v5  ;;  %v5263_v49 = vpack.c.bf16 %v966_v41, %v963_v25  ;;  %v1840_v6 = vadd.f32 %v6430_v36, %v6428_v35  ;;  %v1115_v25 = vld [vmem:[%s8533_s25 + $0x10] sm:$0xff] }
 0x1ce   : > { %v6438_v45 = vmax.f32 %v1822_v42, 0.0  ;;  %v6440_v48 = vmax.f32 %v1824_v43, 0.0  ;;  %1857 = vmax.xlane.f32.xlu0 %v1856_v44  ;;  %v2016_v44 = vld [vmem:[%s8420_s10 + $0x10] sm:$0xff] }
 0x1cf   : > { %v1729_v50 = vpop.permute.xlu1 %1728 }
 0x1d0   : > { %v1828_v51 = vadd.f32 %v1827_v15, %v1729_v50  ;;  %v1830_v52 = vadd.f32 %v1829_v16, %v1729_v50  ;;  %5264 = vmatpush3.bf16.msra.mxu1 %v5263_v49  ;;  %v1862_v54 = vmax.f32 %v6438_v45, %v6440_v48  ;;  %v1846_v8 = vadd.f32 %v6440_v48, %v6438_v45  ;;  %v1868_v16 = vld [vmem:[%s8419_s9] sm:$0x3]  ;;  %v2017_v49 = vld [vmem:[%s8420_s10 + $0x18] sm:$0xff] }
 0x1d2   : > { %v6444_v56 = vmax.f32 %v1828_v51, 0.0  ;;  %v6446_v57 = vmax.f32 %v1830_v52, 0.0  ;;  %1863 = vmax.xlane.f32.xlu0 %v1862_v54 }
 0x1d3   : > { %5147 = vmatmul.mubr.msk.f32.vlgmr.msra.gmra.mrb[2].mxu1 %vm828_vm0, %v967_v34  ;;  %v1719_v58 = vpop.permute.xlu0 %1718 }
 0x1d4   : > { %v1816_v59 = vadd.f32 %v1815_v10, %v1719_v58  ;;  %v1818_v60 = vadd.f32 %v1817_v11, %v1719_v58  ;;  %v1865_v61 = vmax.f32 %v6444_v56, %v6446_v57  ;;  %v1849_v7 = vadd.f32 %v6446_v57, %v6444_v56  ;;  %5151 = vmatprep.mubr.msk.f32.mxu1 %vm1117_vm3, %v1113_v9 }
 0x1d6   : > { %v6451_v1 = vmax.f32 %v1816_v59, 0.0  ;;  %v6453_v2 = vmax.f32 %v1818_v60, 0.0  ;;  %1866 = vmax.xlane.f32.xlu0 %v1865_v61 }
 0x1d8   : > { %v1859_v3 = vmax.f32 %v6451_v1, %v6453_v2  ;;  %v1843_v4 = vadd.f32 %v6453_v2, %v6451_v1 }
 0x1da   : > { %1860 = vmax.xlane.f32.xlu1 %v1859_v3  ;;  %1844 = vadd.xlane.f32.xlu0 %v1843_v4 }
 0x1de   : > { %1841 = vadd.xlane.f32.xlu1 %v1840_v6  ;;  %1850 = vadd.xlane.f32.xlu0 %v1849_v7 }
 0x1e2   : > { %1847 = vadd.xlane.f32.xlu1 %v1846_v8 }
 0x25b   : > { %v1858_v10 = vpop.xlane.xlu0 %1857 }
 0x25f   : > { %v1864_v11 = vpop.xlane.xlu0 %1863 }
 0x263   : > { %v1867_v14 = vpop.xlane.xlu0 %1866 }
 0x264   : > { %v5279_v15 = vpack.c.bf16 %v1867_v14, %v1864_v11 }
 0x267   : > { %v1861_v12 = vpop.xlane.xlu1 %1860  ;;  %v1845_v26 = vpop.xlane.xlu0 %1844 }
 0x268   : > { %v5276_v13 = vpack.c.bf16 %v1861_v12, %v1858_v10  ;;  %v1853_v30 = vmul.f32 0.00390625, %v1845_v26 }
 0x26a   : > { %5277 = vmatpush3.bf16.msra.mxu0 %v5276_v13 }
 0x26b   : > { %5278 = vmatprep.subr.bf16.mxu0 %v6130_v5  ;;  %v1842_v23 = vpop.xlane.xlu1 %1841  ;;  %v1851_v31 = vpop.xlane.xlu0 %1850 }
 0x26c   : > { %v1852_v28 = vmul.f32 0.00390625, %v1842_v23  ;;  %v1855_v34 = vmul.f32 0.00390625, %v1851_v31 }
 0x26e   : > { %5280 = vmatpush3.bf16.msra.mxu0 %v5279_v15  ;;  %v5270_v32 = vpack.c.bf16 %v1853_v30, %v1852_v28 }
 0x26f   : > { %v1848_v29 = vpop.xlane.xlu1 %1847 }
 0x270   : > { %v1854_v33 = vmul.f32 0.00390625, %v1848_v29 }
 0x271   : > { %5185 = vmatmul.mubr.msk.f32.vlgmr.msra.gmra.mrb[16].mxu0 %vm828_vm0, %v1868_v16 }
 0x272   : > { %v5273_v37 = vpack.c.bf16 %v1855_v34, %v1854_v33 }
 0x29e   : > { %v1037_v17 = vpop.f32.mrb[0].mxu1 }
 0x29f   : > { %v5137_v18 = vpop.f32.mrb[1].mxu1  ;;  %v1041_v24 = vmax.f32 %v1037_v17, 0.0 }
 0x2a6   : > { %v1108_v19 = vpop.f32.mrb[2].mxu1 }
 0x2a7   : > { %v1112_v20 = vmax.f32 %v1108_v19, 0.0  ;;  %v5148_v21 = vpop.f32.mrb[3].mxu1 }
 0x2a9   : > { %5149 = vmatprep.subr.msk.mxu1 %vm1130_vm4, %v1112_v20 }
 0x2aa   : > { %5150 = vmatpush3.msk.msra.mxu1 %vm1130_vm4, %v1112_v20 }
 0x2ab   : > { %5152 = vmatmul.mubr.msk.f32.vlgmr.msra.gmra.mrb[4].mxu1 %vm1117_vm3, %v1114_v22  ;;  %5157 = vmatprep.subr.msk.mxu1 %vm1130_vm4, %v1041_v24 }
 0x2ac   : > { %5158 = vmatpush3.msk.msra.mxu1 %vm1130_vm4, %v1041_v24  ;;  %5154 = vmatprep.mubr.msk.f32.mxu1 %vm1117_vm3, %v1115_v25 }
 0x2ad   : > { %5269 = vmatprep.subr.bf16.mxu1 %v6130_v5 }
 0x2af   : > { %5155 = vmatmul.mubr.msk.f32.gmra.mrb[6].mxu1 %vm1117_vm3, %v1116_v27 }
 0x2b0   : > { %5159 = vmatprep.mubr.msk.f32.mxu1 %vm1117_vm3, %v1113_v9 }
 0x2b3   : > { %5160 = vmatmul.mubr.msk.f32.vlgmr.msra.gmra.mrb[4].mxu1 %vm1117_vm3, %v1114_v22 }
 0x2b4   : > { %5271 = vmatpush3.bf16.msra.mxu1 %v5270_v32  ;;  %5162 = vmatprep.mubr.msk.f32.mxu1 %vm1117_vm3, %v1115_v25 }
 0x2b5   : > { %5272 = vmatprep.subr.bf16.mxu1 %v6130_v5  ;;  %v2015_v5 = vld [vmem:[%s8420_s10 + $0x8] sm:$0xff] }
 0x2b7   : > { %5163 = vmatmul.mubr.msk.f32.gmra.mrb[6].mxu1 %vm1117_vm3, %v1116_v27 }
 0x2b8   : > { %5274 = vmatpush3.bf16.msra.mxu1 %v5273_v37  ;;  %5173 = vmatprep.mubr.msk.f32.mxu1 %vm6131_vm2, %v8465_v0  ;;  %vm1646_vm2 = vcmask 277504  }
 0x2bb   : > { %5174 = vmatmul.mubr.msk.f32.vlgmr.msra.gmra.mrb[8].mxu1 %vm828_vm0, %v1868_v16 }
 0x2bc   : > { %5189 = vmatprep.mubr.msk.f32.mxu1 %vm1117_vm3, %v2014_v40 }
 0x344   : > { %v2009_v41 = vpop.f32.mrb[16].mxu0 }
 0x345   : > { %v2013_v42 = vmax.f32 %v2009_v41, 0.0  ;;  %v5186_v43 = vpop.f32.mrb[17].mxu0 }
 0x347   : > { %5187 = vmatprep.subr.msk.mxu1 %vm1130_vm4, %v2013_v42 }
 0x348   : > { %5188 = vmatpush3.msk.msra.mxu1 %vm1130_vm4, %v2013_v42 }
 0x349   : > { %5190 = vmatmul.mubr.msk.f32.vlgmr.msra.gmra.mrb[10].mxu1 %vm1117_vm3, %v2015_v5 }
 0x34a   : > { %5192 = vmatprep.mubr.msk.f32.mxu1 %vm1117_vm3, %v2016_v44 }
 0x34d   : > { %5193 = vmatmul.mubr.msk.f32.gmra.mrb[12].mxu1 %vm1117_vm3, %v2017_v49 }
 0x34e   : > { %5197 = vmatprep.mubr.msk.f32.mxu1 %vm1117_vm3, %v2014_v40 }
 0x386   : > { %v5161_v50 = vpop.f32.mrb[4].mxu1 }
 0x387   : > { %v4983_v51 = vmul.f32 -1.442695, %v5161_v50  ;;  %v1288_v52 = vpop.f32.mrb[5].mxu1 }
 0x388   : > { %v4982_v54 = vmul.f32 -1.442695, %v1288_v52 }
 0x389   : > { %6040 = vpow2.f32 %v4983_v51 }
 0x38a   : > { %6042 = vpow2.f32 %v4982_v54  ;;  %v5164_v58 = vpop.f32.mrb[6].mxu1 }
 0x38b   : > { %v4985_v59 = vmul.f32 -1.442695, %v5164_v58  ;;  %v1298_v60 = vpop.f32.mrb[7].mxu1 }
 0x38c   : > { %v4984_v61 = vmul.f32 -1.442695, %v1298_v60 }
 0x38d   : > { %6044 = vpow2.f32 %v4985_v59 }
 0x38e   : > { %6046 = vpow2.f32 %v4984_v61  ;;  %v1938_v3 = vpop.f32.mrb[8].mxu1 }
 0x38f   : > { %v1942_v4 = vmax.f32 %v1938_v3, 0.0  ;;  %v5175_v6 = vpop.f32.mrb[9].mxu1 }
 0x391   : > { %5195 = vmatprep.subr.msk.mxu1 %vm1130_vm4, %v1942_v4 }
 0x392   : > { %5196 = vmatpush3.msk.msra.mxu1 %vm1130_vm4, %v1942_v4  ;;  %vm1491_vm4 = vcmask 1039360  }
 0x393   : > { %v6041_v7 = vpop.eup %6040  ;;  %5198 = vmatmul.mubr.msk.f32.vlgmr.msra.gmra.mrb[10].mxu1 %vm1117_vm3, %v2015_v5 }
 0x394   : > { %v6043_v8 = vpop.eup %6042  ;;  %v1320_v9 = vadd.f32 1.0, %v6041_v7  ;;  %5200 = vmatprep.mubr.msk.f32.mxu1 %vm1117_vm3, %v2016_v44 }
 0x395   : > { %v1319_v10 = vadd.f32 1.0, %v6043_v8 }
 0x396   : > { %6048 = vrcp.f32 %v1320_v9 }
 0x397   : > { %v6045_v11 = vpop.eup %6044  ;;  %6050 = vrcp.f32 %v1319_v10  ;;  %5201 = vmatmul.mubr.msk.f32.gmra.mrb[12].mxu1 %vm1117_vm3, %v2017_v49 }
 0x398   : > { %v6047_v12 = vpop.eup %6046  ;;  %v1322_v14 = vadd.f32 1.0, %v6045_v11 }
 0x399   : > { %v1321_v13 = vadd.f32 1.0, %v6047_v12 }
 0x39b   : > { %6052 = vrcp.f32 %v1321_v13 }
 0x39c   : > { %6054 = vrcp.f32 %v1322_v14 }
 0x3a0   : > { %v6049_v15 = vpop.eup %6048 }
 0x3a1   : > { %v6051_v16 = vpop.eup %6050  ;;  %1338 = vperm.xlu0 %5533, %v6049_v15  }
 0x3a2   : > { %1333 = vperm.xlu1 %5534, %v6051_v16  }
 0x3a5   : > { %v6053_v17 = vpop.eup %6052 }
 0x3a6   : > { %1343 = vperm.xlu1 %5534, %v6053_v17   ;;  %v6055_v18 = vpop.eup %6054 }
 0x3aa   : > { %1348 = vperm.xlu1 %5534, %v6055_v18   ;;  %v6132_v18 = vmov 1966171168  }
 0x420   : > { %v1339_v21 = vpop.permute.xlu0 %1338 }
 0x421   : > { %v1334_v19 = vpop.permute.xlu1 %1333  ;;  %v6524_v22 = vmul.f32 %v1339_v21, %v6379_v46  ;;  %v6527_v23 = vmul.f32 %v1339_v21, %v6381_v47  ;;  %v731_v21 = vlaneseq }
 0x422   : > { %v6530_v24 = vmul.f32 %v1334_v19, %v6373_v38  ;;  %v6533_v25 = vmul.f32 %v1334_v19, %v6375_v39  ;;  %v1384_v19 = vunpack.c.l.s4 %v6132_v18 }
 0x423   : > { %vm1403_vm8 = vcmp.ge.s32.totalorder %v731_v21, 17  ;;  %vm1404_vm9 = vcmp.lt.s32.totalorder %v731_v21, 273 }
 0x424   : > { %v1359_v38 = vadd.f32 %v6524_v22, %v6530_v24  ;;  %v1368_v39 = vadd.f32 %v6527_v23, %v6533_v25  ;;  %vm6630_vm10 = vmand %vm1403_vm8, %vm1404_vm9  ;;  %vm1570_vm8 = vcmask 908288   ;;  %vm1592_vm9 = vcmask 900096  }
 0x425   : > { %v1344_v20 = vpop.permute.xlu1 %1343 }
 0x426   : > { %v6536_v27 = vmul.f32 %v1344_v20, %v6385_v53  ;;  %v6539_v28 = vmul.f32 %v1344_v20, %v6387_v55 }
 0x428   : > { %v1360_v47 = vadd.f32 %v1359_v38, %v6536_v27  ;;  %v1369_v53 = vadd.f32 %v1368_v39, %v6539_v28  ;;  %v1407_v31 = vmax.f32 %v6530_v24, %v6536_v27  ;;  %v1416_v32 = vmax.f32 %v6533_v25, %v6539_v28 }
 0x429   : > { %v1349_v26 = vpop.permute.xlu1 %1348 }
 0x42a   : > { %v6542_v29 = vmul.f32 %v1349_v26, %v6393_v62  ;;  %v6545_v46 = vmul.f32 %v1349_v26, %v6395_v63 }
 0x42c   : > { %v1408_v55 = vmax.f32 %v6524_v22, %v6542_v29  ;;  %v1417_v62 = vmax.f32 %v6527_v23, %v6545_v46  ;;  %v1361_v30 = vadd.f32 %v1360_v47, %v6542_v29  ;;  %v1370_v63 = vadd.f32 %v1369_v53, %v6545_v46 }
 0x42e   : > { %v1409_v33 = vmax.f32 %v1407_v31, %v1408_v55  ;;  %v1418_v34 = vmax.f32 %v1416_v32, %v1417_v62  ;;  %v1362_v37 = vrot.slane %v1361_v30, 4  ;;  %v1371_v40 = vrot.slane %v1370_v63, 4 }
 0x430   : > { %v1410_v42 = vrot.slane %v1409_v33, 4  ;;  %v1419_v43 = vrot.slane %v1418_v34, 4  ;;  %v1363_v49 = vadd.f32 %v1362_v37, %v1361_v30  ;;  %v1372_v50 = vadd.f32 %v1371_v40, %v1370_v63 }
 0x431   : > { %v1385_v30 = vunpack.c.0.s8 %v1384_v19  ;;  %v6563_v63 = vshrl.u32 %v731_v21, 7 }
 0x432   : > { %v1411_v54 = vmax.f32 %v1409_v33, %v1410_v42  ;;  %v1420_v58 = vmax.f32 %v1418_v34, %v1419_v43  ;;  %v1364_v61 = vrot.slane %v1363_v49, 2  ;;  %v1373_v3 = vrot.slane %v1372_v50, 2 }
 0x433   : > { %v6566_v37 = vsub.s32 %v1385_v30, %v6563_v63 }
 0x434   : > { %v1412_v6 = vrot.slane %v1411_v54, 2  ;;  %v1421_v7 = vrot.slane %v1420_v58, 2  ;;  %v1365_v8 = vadd.f32 %v1364_v61, %v1363_v49  ;;  %v1374_v9 = vadd.f32 %v1373_v3, %v1372_v50 }
 0x436   : > { %v1413_v11 = vmax.f32 %v1411_v54, %v1412_v6  ;;  %v1422_v12 = vmax.f32 %v1420_v58, %v1421_v7  ;;  %v1366_v15 = vrot.slane %v1365_v8, 1  ;;  %v1375_v16 = vrot.slane %v1374_v9, 1 }
 0x438   : > { %v1414_v26 = vrot.slane %v1413_v11, 1  ;;  %v1423_v38 = vrot.slane %v1422_v12, 1  ;;  %v1367_v53 = vadd.f32 %v1366_v15, %v1365_v8  ;;  %v1376_v55 = vadd.f32 %v1375_v16, %v1374_v9 }
 0x43a   : > { %v1415_v31 = vmax.f32 %v1413_v11, %v1414_v26  ;;  %v1424_v32 = vmax.f32 %v1422_v12, %v1423_v38  ;;  %v1378_v33 = vmul.f32 0.03125, %v1367_v53  ;;  %v1379_v34 = vmul.f32 0.03125, %v1376_v55 }
 0x43c   : > { %v1427_v40 = vcombine.low %v1415_v31, %v1424_v32  ;;  %v1382_v42 = vcombine.low %v1378_v33, %v1379_v34 }
 0x43e   : > { %v1389_v49 = vrot.slane %v1382_v42, %v6566_v37 }
 0x466   : > { %v5199_v41 = vpop.f32.mrb[10].mxu1 }
 0x467   : > { %v5021_v5 = vmul.f32 -1.442695, %v5199_v41  ;;  %v2187_v44 = vpop.f32.mrb[11].mxu1 }
 0x468   : > { %v5020_v51 = vmul.f32 -1.442695, %v2187_v44 }
 0x469   : > { %6056 = vpow2.f32 %v5021_v5  ;;  %v1434_v5 = vrot.slane %v1427_v40, %v6566_v37 }
 0x46a   : > { %6058 = vpow2.f32 %v5020_v51  ;;  %v5202_v52 = vpop.f32.mrb[12].mxu1 }
 0x46b   : > { %v5023_v59 = vmul.f32 -1.442695, %v5202_v52  ;;  %v2197_v60 = vpop.f32.mrb[13].mxu1  ;;  %v1441_v51 = vrot.slane %v1434_v5, %v6566_v37  ;;  %v1396_v52 = vrot.slane %v1389_v49, %v6566_v37 }
 0x46c   : > { %v5022_v4 = vmul.f32 -1.442695, %v2197_v60 }
 0x46d   : > { %6060 = vpow2.f32 %v5023_v59 }
 0x46e   : > { %6062 = vpow2.f32 %v5022_v4  ;;  %v732_v4 = vand.u32 127, %v731_v21 }
 0x470   : > { %v738_v38 = vand.u32 15, %v732_v4 }
 0x472   : > { %vm758_vm11 = vcmp.ge.s32.totalorder %v738_v38, 1  ;;  %vm764_vm13 = vcmp.le.s32.totalorder %v738_v38, 14 }
 0x473   : > { %v6057_v10 = vpop.eup %6056 }
 0x474   : > { %v6059_v13 = vpop.eup %6058  ;;  %v2219_v14 = vadd.f32 1.0, %v6057_v10  ;;  %v733_v10 = vadd.s32 128, %v732_v4 }
 0x475   : > { %v2218_v17 = vadd.f32 1.0, %v6059_v13 }
 0x476   : > { %6064 = vrcp.f32 %v2219_v14 }
 0x477   : > { %v6061_v20 = vpop.eup %6060  ;;  %6066 = vrcp.f32 %v2218_v17 }
 0x478   : > { %v6063_v39 = vpop.eup %6062  ;;  %v2221_v47 = vadd.f32 1.0, %v6061_v20 }
 0x479   : > { %v2220_v62 = vadd.f32 1.0, %v6063_v39  ;;  %v745_v39 = vand.u32 15, %v733_v10 }
 0x47a   : > { %6068 = vrcp.f32 %v2221_v47 }
 0x47b   : > { %6070 = vrcp.f32 %v2220_v62  ;;  %vm759_vm12 = vcmp.ge.s32.totalorder %v745_v39, 1  ;;  %vm765_vm14 = vcmp.le.s32.totalorder %v745_v39, 14 }
 0x480   : > { %v6065_v41 = vpop.eup %6064 }
 0x481   : > { %v6067_v43 = vpop.eup %6066  ;;  %2237 = vperm.xlu1 %5534, %v6065_v41  }
 0x482   : > { %2232 = vperm.xlu0 %5533, %v6067_v43  }
 0x484   : > { %v6069_v44 = vpop.eup %6068 }
 0x485   : > { %v6071_v50 = vpop.eup %6070  ;;  %2247 = vperm.xlu1 %5534, %v6069_v44  }
 0x486   : > { %2242 = vperm.xlu0 %5533, %v6071_v50  }
 0x489   : > { %1442 = vrot.lane.b32.xlu1 %v1441_v51, %s8440_s23  ;;  %v6643_v51 = vsel %vm758_vm11, 1.0, %v8465_v0  ;;  %vm1632_vm11 = vcmask 777216  }
 0x48a   : > { %1397 = vrot.lane.b32.xlu0 %v1396_v52, %s8440_s23  ;;  %v6646_v52 = vsel %vm759_vm12, 1.0, %v8465_v0  ;;  %vm1654_vm12 = vcmask 769024  }
 0x500   : > { %v2238_v54 = vpop.permute.xlu1 %2237 }
 0x501   : > { %v2233_v58 = vpop.permute.xlu0 %2232  ;;  %v6593_v59 = vmul.f32 %v2238_v54, %v6451_v1  ;;  %v6596_v60 = vmul.f32 %v2238_v54, %v6453_v2 }
 0x502   : > { %v6599_v61 = vmul.f32 %v2233_v58, %v6428_v35  ;;  %v6602_v3 = vmul.f32 %v2233_v58, %v6430_v36 }
 0x504   : > { %v2248_v6 = vpop.permute.xlu1 %2247  ;;  %v2258_v1 = vadd.f32 %v6593_v59, %v6599_v61  ;;  %v2267_v35 = vadd.f32 %v6596_v60, %v6602_v3 }
 0x505   : > { %v6605_v7 = vmul.f32 %v2248_v6, %v6444_v56  ;;  %v6608_v8 = vmul.f32 %v2248_v6, %v6446_v57  ;;  %v2243_v9 = vpop.permute.xlu0 %2242 }
 0x506   : > { %v6615_v36 = vmul.f32 %v2243_v9, %v6438_v45  ;;  %v6618_v2 = vmul.f32 %v2243_v9, %v6440_v48  ;;  %v6649_v9 = vsel %vm764_vm13, 1.0, %v8465_v0  ;;  %vm783_vm13 = vcmask 277640  }
 0x507   : > { %v2302_v56 = vmax.f32 %v6593_v59, %v6605_v7  ;;  %v2311_v57 = vmax.f32 %v6596_v60, %v6608_v8  ;;  %785 = vst.msk [vmem:[#allocation3 + $0x28] sm:$0xff] %vm783_vm13, %v8465_v0  ;;  %784 = vst.msk [vmem:[#allocation3 + $0x10] sm:$0xff] %vm783_vm13, %v8465_v0 }
 0x508   : > { %v2259_v11 = vadd.f32 %v2258_v1, %v6615_v36  ;;  %v2268_v12 = vadd.f32 %v2267_v35, %v6618_v2  ;;  %v2301_v13 = vmax.f32 %v6599_v61, %v6615_v36  ;;  %v2310_v45 = vmax.f32 %v6602_v3, %v6618_v2  ;;  %v1443_v14 = vpop.permute.xlu1 %1442  ;;  %786 = vst.msk [vmem:[#allocation3 + $0x40] sm:$0xff] %vm783_vm13, %v8465_v0 }
 0x509   : > { %v1444_v15 = vrot.slane %v1443_v14, 7  ;;  %v1398_v16 = vpop.permute.xlu0 %1397  ;;  %v6652_v1 = vsel %vm765_vm14, 1.0, %v8465_v0  ;;  %787 = vst.msk [vmem:[#allocation3 + $0x58] sm:$0xff] %vm783_vm13, %v8465_v0  ;;  %788 = vst.msk [vmem:[#allocation3 + $0x70] sm:$0xff] %vm783_vm13, %v8465_v0  ;;  %vm2912_vm14 = vcmask 1047688  }
 0x50a   : > { %v2260_v17 = vadd.f32 %v2259_v11, %v6605_v7  ;;  %v2269_v18 = vadd.f32 %v2268_v12, %v6608_v8  ;;  %v2303_v19 = vmax.f32 %v2301_v13, %v2302_v56  ;;  %v2312_v20 = vmax.f32 %v2310_v45, %v2311_v57  ;;  %789 = vst.msk [vmem:[#allocation3 + $0x88] sm:$0xff] %vm783_vm13, %v8465_v0 }
 0x50b   : > { %v1445_v21 = vsel %vm774_vm7, %v1444_v15, %v1443_v14  ;;  %v1399_v26 = vrot.slane %v1398_v16, 7  ;;  %v1460_v11 = vcombine.low %v6643_v51, %v6646_v52  ;;  %v1504_v14 = vcombine.low %v6649_v9, %v6652_v1  ;;  %790 = vst.msk [vmem:[#allocation3 + $0xa0] sm:$0xff] %vm783_vm13, %v8465_v0  ;;  %791 = vst.msk [vmem:[#allocation3 + $0xb8] sm:$0xff] %vm783_vm13, %v8465_v0 }
 0x50c   : > { %v2261_v47 = vrot.slane %v2260_v17, 4  ;;  %v2270_v53 = vrot.slane %v2269_v18, 4  ;;  %v2304_v55 = vrot.slane %v2303_v19, 4  ;;  %v2313_v62 = vrot.slane %v2312_v20, 4 }
 0x50d   : > { %1448 = vst.msk [vmem:[#allocation2 + $0x1] ss:$2 sm:$0x7] %vm6630_vm10, %v1445_v21  ;;  %v1400_v30 = vsel %vm774_vm7, %v1399_v26, %v1398_v16 }
 0x50e   : > { %v2262_v31 = vadd.f32 %v2261_v47, %v2260_v17  ;;  %v2271_v32 = vadd.f32 %v2270_v53, %v2269_v18  ;;  %v2305_v33 = vmax.f32 %v2303_v19, %v2304_v55  ;;  %v2314_v34 = vmax.f32 %v2312_v20, %v2313_v62  ;;  %1406 = vst.msk [vmem:[#allocation2] ss:$2 sm:$0x7] %vm6630_vm10, %v1400_v30 }
 0x50f   : > { %v1467_v19 = vrot.slane %v1460_v11, %v6566_v37  ;;  %v1511_v20 = vrot.slane %v1504_v14, %v6566_v37  ;;  %v1481_v53 = vstv %s4987_s11  ;;  %v1484_v55 = vstv %s4988_s1  ;;  %s6678_s11 = sld [smem:[#allocation5 + $0x4]]  ;;  %s6680_s1 = sld [smem:[#allocation5 + $0x5]] }
 0x510   : > { %v2263_v40 = vrot.slane %v2262_v31, 2  ;;  %v2272_v41 = vrot.slane %v2271_v32, 2  ;;  %v2306_v42 = vrot.slane %v2305_v33, 2  ;;  %v2315_v43 = vrot.slane %v2314_v34, 2 }
 0x511   : > { %v6667_v26 = vrot.slane %v1467_v19, %v6566_v37  ;;  %v1518_v38 = vrot.slane %v1511_v20, %v6566_v37 }
 0x512   : > { %v2307_v5 = vmax.f32 %v2305_v33, %v2306_v42  ;;  %v2316_v44 = vmax.f32 %v2314_v34, %v2315_v43  ;;  %v2264_v49 = vadd.f32 %v2263_v40, %v2262_v31  ;;  %v2273_v50 = vadd.f32 %v2272_v41, %v2271_v32 }
 0x513   : > { %v1536_v33 = vstv %s4991_s30  ;;  %v1539_v34 = vstv %s4992_s0  ;;  %s6709_s30 = sld [smem:[#allocation7 + $0x2]]  ;;  %s6711_s0 = sld [smem:[#allocation7 + $0x4]] }
 0x514   : > { %v2308_v54 = vrot.slane %v2307_v5, 1  ;;  %v2317_v58 = vrot.slane %v2316_v44, 1  ;;  %v2265_v4 = vrot.slane %v2264_v49, 1  ;;  %v2274_v6 = vrot.slane %v2273_v50, 1 }
 0x515   : > { %v1478_v39 = vld [vmem:[#allocation2] ss:$2 sm:$0x7]  ;;  %v1479_v47 = vld [vmem:[#allocation2 + $0x1] ss:$2 sm:$0x7] }
 0x516   : > { %v2309_v35 = vmax.f32 %v2307_v5, %v2308_v54  ;;  %v2318_v56 = vmax.f32 %v2316_v44, %v2317_v58  ;;  %v2266_v57 = vadd.f32 %v2265_v4, %v2264_v49  ;;  %v2275_v10 = vadd.f32 %v2274_v6, %v2273_v50  ;;  %v1533_v31 = vld [vmem:[#allocation2] ss:$2 sm:$0x7]  ;;  %v1534_v32 = vld [vmem:[#allocation2 + $0x1] ss:$2 sm:$0x7] }
 0x517   : > { %v1482_v62 = vmul.f32 %v1481_v53, %v1478_v39  ;;  %v1485_v30 = vmul.f32 %v1484_v55, %v1479_v47  ;;  %v6696_v41 = vld [vmem:[#allocation2 + $0x1] ss:$2 sm:$0x7]  ;;  %v1496_v5 = vstv %s6678_s11  ;;  %v1499_v44 = vstv %s6680_s1  ;;  %v1596_v6 = vld [vmem:[#allocation2] ss:$2 sm:$0x7] }
 0x518   : > { %v2321_v12 = vcombine.low %v2309_v35, %v2318_v56  ;;  %v2276_v13 = vmul.f32 0.03125, %v2266_v57  ;;  %v2277_v45 = vmul.f32 0.03125, %v2275_v10  ;;  %v6698_v42 = vld [vmem:[#allocation2 + $0x1] ss:$2 sm:$0x7]  ;;  %v1537_v50 = vmul.f32 %v1536_v33, %v1533_v31  ;;  %s6720_s11 = sld [smem:[#allocation7 + $0x3]] }
 0x519   : > { %v1540_v54 = vmul.f32 %v1539_v34, %v1534_v32  ;;  %v6704_v58 = vld [vmem:[#allocation2 + $0x1] ss:$2 sm:$0x3]  ;;  %v6706_v35 = vld [vmem:[#allocation2] ss:$2 sm:$0x7] }
 0x51a   : > { %v2328_v15 = vrot.slane %v2321_v12, %v6566_v37  ;;  %v2280_v16 = vcombine.low %v2276_v13, %v2277_v45  ;;  %v1558_v4 = vld [vmem:[#allocation2 + $0x1] ss:$2 sm:$0x7]  ;;  %v6713_v11 = vld [vmem:[#allocation2] ss:$2 sm:$0x3]  ;;  %v1497_v12 = vmul.f32 %v1496_v5, %v1478_v39  ;;  %v1500_v13 = vmul.f32 %v1499_v44, %v1479_v47 }
 0x51b   : > { %v1557_v45 = vld [vmem:[#allocation2] ss:$2 sm:$0x7]  ;;  %s6722_s1 = sld [smem:[#allocation7 + $0x5]]  ;;  %v1541_v19 = vadd.f32 %v1540_v54, %v1537_v50  ;;  %v1563_v39 = vstv %s6682_s26  ;;  %s6743_s26 = sld [smem:[#allocation7 + $0x7]]  ;;  %v2356_v44 = vstv %s6709_s30 }
 0x51c   : > { %v2335_v17 = vrot.slane %v2328_v15, %v6566_v37  ;;  %v2287_v18 = vrot.slane %v2280_v16, %v6566_v37  ;;  %v1501_v55 = vadd.f32 %v1500_v13, %v1497_v12  ;;  %s6763_s30 = sld [smem:[#allocation7 + $0x8]] }
 0x51e   : > { %2336 = vrot.lane.b32.xlu1 %v2335_v17, %s8440_s23  ;;  %v2294_v21 = vrot.slane %v2287_v18, %v6566_v37  ;;  %v1486_v37 = vadd.f32 %v1485_v30, %v1482_v62  ;;  %v2359_v13 = vstv %s6720_s11  ;;  %s6774_s11 = sld [smem:[#allocation7 + $0x9]] }
 0x520   : > { %2295 = vrot.lane.b32.xlu0 %v2294_v21, %s8440_s23  ;;  %s6684_s23 = sld [smem:[#allocation5 + $0xa]] }
 0x522   : > { %1542 = vrot.lane.b32.xlu1 %v6667_v26, %s8443_s24  ;;  %s6688_s24 = sld [smem:[#allocation5 + $0x8]] }
 0x524   : > { %1519 = vrot.lane.b32.xlu0 %v1518_v38, %s8442_s6  ;;  %s6686_s6 = sld [smem:[#allocation5 + $0xb]] }
 0x526   : > { %1605 = vrot.lane.b32.xlu1 %v6667_v26, %s8446_s3  ;;  %s6694_s3 = sld [smem:[#allocation5 + $0xe]]  ;;  %v1575_v16 = vstv %s6684_s23  ;;  %s6734_s23 = sld [smem:[#allocation5 + $0x10]] }
 0x527   : > { %v1576_v62 = vmul.f32 %v1575_v16, %v1557_v45 }
 0x528   : > { %1581 = vrot.lane.b32.xlu0 %v1518_v38, %s8444_s2  ;;  %s6690_s2 = sld [smem:[#allocation5 + $0xc]] }
 0x52a   : > { %1488 = vrot.lane.b32.xlu1 %v1486_v37, %s8447_s27  ;;  %s6702_s27 = sld [smem:[#allocation5 + $0xf]]  ;;  %v1578_v17 = vstv %s6686_s6  ;;  %s6736_s6 = sld [smem:[#allocation5 + $0x11]] }
 0x52b   : > { %v1579_v30 = vmul.f32 %v1578_v17, %v1558_v4 }
 0x52c   : > { %1643 = vrot.lane.b32.xlu0 %v1518_v38, %s8445_s29  ;;  %s6692_s29 = sld [smem:[#allocation5 + $0xd]]  ;;  %v1560_v38 = vstv %s6688_s24  ;;  %s8450_s24 = smov 112  }
 0x52d   : > { %v1561_v34 = vmul.f32 %v1560_v38, %v1557_v45  ;;  %v1580_v50 = vadd.f32 %v1579_v30, %v1576_v62  ;;  %v2373_v45 = vstv %s6722_s1  ;;  %s6783_s1 = sld [smem:[#allocation7 + $0xe]] }
 0x52e   : > { %v1599_v37 = vstv %s6690_s2  ;;  %s6749_s2 = sld [smem:[#allocation7 + $0xa]] }
 0x52f   : > { %v1600_v54 = vmul.f32 %v1599_v37, %v1596_v6  ;;  %v2390_v37 = vstv %s6743_s26  ;;  %s6792_s26 = sld [smem:[#allocation7 + $0xf]] }
 0x532   : > { %v1602_v31 = vstv %s6692_s29  ;;  %s8458_s29 = smov 126  }
 0x590   : > { %v2337_v40 = vpop.permute.xlu1 %2336 }
 0x591   : > { %v2338_v43 = vrot.slane %v2337_v40, 7 }
 0x592   : > { %v2296_v49 = vpop.permute.xlu0 %2295 }
 0x593   : > { %v2339_v56 = vsel %vm774_vm7, %v2338_v43, %v2337_v40  ;;  %v2297_v57 = vrot.slane %v2296_v49, 7  ;;  %v1564_v40 = vmul.f32 %v1563_v39, %v1558_v4 }
 0x594   : > { %v1543_v10 = vpop.permute.xlu1 %1542  ;;  %2341 = vst.msk [vmem:[#allocation2 + $0x1] ss:$2 sm:$0x7] %vm6630_vm10, %v2339_v56  ;;  %v1603_v56 = vmul.f32 %v1602_v31, %v6696_v41  ;;  %v1640_v31 = vstv %s6736_s6  ;;  %s8454_s6 = smov 96  }
 0x595   : > { %v2298_v14 = vsel %vm774_vm7, %v2297_v57, %v2296_v49  ;;  %v1544_v15 = vrot.slane %v1543_v10, 7  ;;  %v2370_v49 = vstv %s6711_s0  ;;  %v1622_v57 = vstv %s6694_s3  ;;  %s6769_s3 = sld [smem:[#allocation7 + $0xc]]  ;;  %s8462_s0 = smov 111  }
 0x596   : > { %v1520_v18 = vpop.permute.xlu0 %1519  ;;  %2300 = vst.msk [vmem:[#allocation2] ss:$2 sm:$0x7] %vm6630_vm10, %v2298_v14  ;;  %v1625_v14 = vstv %s6702_s27  ;;  %s8452_s27 = smov 110   ;;  %v1604_v39 = vadd.f32 %v1603_v56, %v1600_v54  ;;  %v1641_v54 = vmul.f32 %v1640_v31, %v6698_v42  ;;  %vm1615_vm10 = vcmask 785408  }
 0x597   : > { %v6727_v20 = vsel %vm1545_vm1, %v1544_v15, %v1543_v10  ;;  %v1521_v21 = vrot.slane %v1520_v18, 7  ;;  %v1565_v15 = vadd.f32 %v1564_v40, %v1561_v34  ;;  %v1626_v62 = vmul.f32 %v1625_v14, %v6698_v42 }
 0x598   : > { %v1606_v47 = vpop.permute.xlu1 %1605  ;;  %v1548_v53 = vmul.f32 %v6727_v20, %v1541_v19  ;;  %v2387_v19 = vstv %s6731_s4  ;;  %s6780_s4 = sld [smem:[#allocation7 + $0xd]] }
 0x599   : > { %v6739_v48 = vsel %vm1117_vm3, %v1521_v21, %v1520_v18  ;;  %v1607_v43 = vrot.slane %v1606_v47, 7 }
 0x59a   : > { %1550 = vrot.lane.b32.xlu1 %v1548_v53, %s8450_s24  ;;  %v1582_v32 = vpop.permute.xlu0 %1581  ;;  %v1524_v33 = vmul.f32 %v6739_v48, %v1501_v55  ;;  %s6754_s24 = sld [smem:[#allocation7 + $0xb]]  ;;  %v1637_v55 = vstv %s6734_s23  ;;  %s6786_s23 = sld [smem:[#allocation7 + $0x10]] }
 0x59b   : > { %v1583_v5 = vrot.slane %v1582_v32, 7  ;;  %v2354_v12 = vld [vmem:[#allocation2 + $0x1] ss:$2 sm:$0x7]  ;;  %v6766_v41 = vsel %vm828_vm0, %v1607_v43, %v1606_v47  ;;  %v1623_v47 = vmul.f32 %v1622_v57, %v6706_v35 }
 0x59c   : > { %1526 = vrot.lane.b32.xlu0 %v1524_v33, %s8458_s29  ;;  %v2360_v38 = vmul.f32 %v2359_v13, %v2354_v12  ;;  %v2374_v53 = vmul.f32 %v2373_v45, %v2354_v12  ;;  %v2385_v30 = vld [vmem:[#allocation2 + $0x1] ss:$2 sm:$0x7]  ;;  %v1610_v33 = vmul.f32 %v6766_v41, %v1604_v39  ;;  %v2404_v45 = vstv %s6763_s30  ;;  %s8456_s30 = smov 94  }
 0x59d   : > { %v6757_v4 = vsel %vm1584_vm15, %v1583_v5, %v1582_v32  ;;  %v2353_v10 = vld [vmem:[#allocation2] ss:$2 sm:$0x7]  ;;  %v1627_v56 = vadd.f32 %v1626_v62, %v1623_v47  ;;  %v2402_v57 = vld [vmem:[#allocation2 + $0x1] ss:$2 sm:$0x7]  ;;  %v2452_v62 = vstv %s6783_s1 }
 0x59e   : > { %v1587_v16 = vmul.f32 %v6757_v4, %v1580_v50  ;;  %v2357_v17 = vmul.f32 %v2356_v44, %v2353_v10  ;;  %v2371_v6 = vmul.f32 %v2370_v49, %v2353_v10  ;;  %v2384_v18 = vld [vmem:[#allocation2] ss:$2 sm:$0x7]  ;;  %v1644_v21 = vpop.permute.xlu0 %1643  ;;  %v2418_v44 = vstv %s6749_s2  ;;  %s6795_s2 = sld [smem:[#allocation7 + $0x11]] }
 0x59f   : > { %v2388_v40 = vmul.f32 %v2387_v19, %v2384_v18  ;;  %v1645_v43 = vrot.slane %v1644_v21, 7  ;;  %v2401_v5 = vld [vmem:[#allocation2] ss:$2 sm:$0x7]  ;;  %v2391_v49 = vmul.f32 %v2390_v37, %v2385_v30  ;;  %v1638_v50 = vmul.f32 %v1637_v55, %v6706_v35  ;;  %s4986_s1 = sld [smem:[#allocation5 + $0x1]] }
 0x5a0   : > { %1567 = vrot.lane.b32.xlu0 %v1565_v15, %s8462_s0  ;;  %1589 = vrot.lane.b32.xlu1 %v1587_v16, %s8452_s27  ;;  %v2361_v32 = vadd.f32 %v2360_v38, %v2357_v17  ;;  %v2375_v34 = vadd.f32 %v2374_v53, %v2371_v6  ;;  %s8536_s27 = smov 127   ;;  %v2421_v10 = vstv %s6754_s24  ;;  %v2419_v14 = vmul.f32 %v2418_v44, %v2401_v5  ;;  %v2432_v16 = vld [vmem:[#allocation2] ss:$2 sm:$0x7]  ;;  %s8537_s24 = smov 112  }
 0x5a1   : > { %v2392_v13 = vadd.f32 %v2391_v49, %v2388_v40  ;;  %v1647_v15 = vsel %vm1646_vm2, %v1645_v43, %v1644_v21  ;;  %v2435_v35 = vstv %s6769_s3  ;;  %v1642_v42 = vadd.f32 %v1641_v54, %v1638_v50  ;;  %v2433_v19 = vld [vmem:[#allocation2 + $0x1] ss:$2 sm:$0x7]  ;;  %v2449_v47 = vld [vmem:[#allocation2] ss:$2 sm:$0x7] }
 0x5a2   : > { %v2376_v12 = vmul.f32 %v2375_v34, %v6739_v48  ;;  %v2407_v17 = vstv %s6774_s11  ;;  %v2422_v6 = vmul.f32 %v2421_v10, %v2402_v57  ;;  %v2405_v18 = vmul.f32 %v2404_v45, %v2401_v5  ;;  %s8538_s3 = smov 110   ;;  %s8539_s11 = smov 96  }
 0x5a3   : > { %v2438_v48 = vstv %s6780_s4  ;;  %v2393_v38 = vmul.f32 %v2392_v13, %v6727_v20  ;;  %v1649_v21 = vmul.f32 %v1647_v15, %v1642_v42  ;;  %v2436_v53 = vmul.f32 %v2435_v35, %v2432_v16  ;;  %s1451_s4 = sld [smem:[#allocation5]]  ;;  %v1489_v13 = vpop.permute.xlu1 %1488 }
 0x5a4   : > { %2363 = vrot.lane.b32.xlu0 %v2361_v32, %s8536_s27  ;;  %1612 = vrot.lane.b32.xlu1 %v1610_v33, %s8454_s6  ;;  %s8460_s6 = smov 95   ;;  %v2423_v39 = vadd.f32 %v2422_v6, %v2419_v14  ;;  %v2408_v55 = vmul.f32 %v2407_v17, %v2402_v57  ;;  %v2466_v30 = vstv %s6786_s23  ;;  %v2439_v37 = vmul.f32 %v2438_v48, %v2433_v19  ;;  %v2450_v32 = vld [vmem:[#allocation2 + $0x1] ss:$2 sm:$0x7]  ;;  %s2344_s23 = sld [smem:[#allocation7]] }
 0x5a5   : > { %v2455_v33 = vstv %s6792_s26  ;;  %v2469_v34 = vstv %s6795_s2  ;;  %v2453_v43 = vmul.f32 %v2452_v62, %v2449_v47  ;;  %v2467_v5 = vmul.f32 %v2466_v30, %v2449_v47  ;;  %s5024_s26 = sld [smem:[#allocation7 + $0x1]]  ;;  %v2343_v30 = vld [vmem:[#allocation2 + $0x1] ss:$2 sm:$0x3] }
 0x5a6   : > { %v2409_v31 = vadd.f32 %v2408_v55, %v2405_v18  ;;  %v2424_v40 = vmul.f32 %v2423_v39, %v6757_v4  ;;  %v2440_v20 = vadd.f32 %v2439_v37, %v2436_v53  ;;  %v2456_v44 = vmul.f32 %v2455_v33, %v2450_v32  ;;  %v2342_v39 = vld [vmem:[#allocation2] ss:$2 sm:$0x3] }
 0x5a7   : > { %v2470_v49 = vmul.f32 %v2469_v34, %v2450_v32  ;;  %v1455_v10 = vstv %s4986_s1  ;;  %v1490_v14 = vrot.slane %v1489_v13, 1 }
 0x5a8   : > { %2378 = vrot.lane.b32.xlu0 %v2376_v12, %s8458_s29  ;;  %1629 = vrot.lane.b32.xlu1 %v1627_v56, %s8460_s6  ;;  %v2441_v50 = vmul.f32 %v2440_v20, %v6766_v41  ;;  %v2457_v54 = vadd.f32 %v2456_v44, %v2453_v43  ;;  %v1456_v12 = vmul.f32 %v1455_v10, %v6704_v58 }
 0x5a9   : > { %v2471_v56 = vadd.f32 %v2470_v49, %v2467_v5  ;;  %v1452_v4 = vstv %s1451_s4  ;;  %v1492_v35 = vsel %vm1491_vm4, %v1489_v13, %v1490_v14  ;;  %s8544_s4 = smov 34  }
 0x5aa   : > { %v1453_v45 = vmul.f32 %v1452_v4, %v6713_v11  ;;  %v2345_v53 = vstv %s2344_s23  ;;  %s8541_s23 = smov 18  }
 0x5ab   : > { %v2472_v57 = vmul.f32 %v2471_v56, %v1647_v15  ;;  %v2348_v37 = vstv %s5024_s26  ;;  %v2346_v33 = vmul.f32 %v2345_v53, %v2342_v39  ;;  %s8542_s26 = smov 16  }
 0x5ac   : > { %2395 = vrot.lane.b32.xlu0 %v2393_v38, %s8537_s24  ;;  %1651 = vrot.lane.b32.xlu1 %v1649_v21, %s8456_s30  ;;  %v1457_v41 = vadd.f32 %v1456_v12, %v1453_v45  ;;  %v2349_v20 = vmul.f32 %v2348_v37, %v2343_v30 }
 0x5ae   : > { %v1476_v15 = vmul.f32 %v6667_v26, %v1457_v41  ;;  %v2350_v49 = vadd.f32 %v2349_v20, %v2346_v33 }
 0x5b0   : > { %2411 = vrot.lane.b32.xlu0 %v2409_v31, %s8462_s0  ;;  %2426 = vrot.lane.b32.xlu1 %v2424_v40, %s8538_s3  ;;  %v1494_v18 = vadd.f32 %v1492_v35, %v1476_v15  ;;  %v2351_v45 = vmul.f32 %v2350_v49, %v6667_v26  ;;  %s8584_s0 = smov 126  }
 0x5b4   : > { %2443 = vrot.lane.b32.xlu0 %v2441_v50, %s8539_s11  ;;  %2459 = vrot.lane.b32.xlu1 %v2457_v54, %s8460_s6  ;;  %s8543_s6 = smov 2  }
 0x5b8   : > { %2474 = vrot.lane.b32.xlu0 %v2472_v57, %s8456_s30  ;;  %s8540_s30 = smov 32  }
 0x60c   : > { %v1551_v16 = vpop.permute.xlu1 %1550 }
 0x60d   : > { %v1552_v17 = vrot.slane %v1551_v16, 1 }
 0x60e   : > { %v1527_v42 = vpop.permute.xlu0 %1526 }
 0x60f   : > { %v1528_v6 = vrot.slane %v1527_v42, 1  ;;  %v1554_v38 = vsel %vm1553_vm6, %v1551_v16, %v1552_v17 }
 0x611   : > { %v1530_v58 = vsel %vm1529_vm5, %v1527_v42, %v1528_v6 }
 0x612   : > { %v1532_v19 = vadd.f32 %v1530_v58, %v1494_v18  ;;  %v1590_v11 = vpop.permute.xlu1 %1589  ;;  %v1568_v48 = vpop.permute.xlu0 %1567 }
 0x613   : > { %v1569_v21 = vrot.slane %v1568_v48, 1  ;;  %v1591_v47 = vrot.slane %v1590_v11, 1 }
 0x614   : > { %v1556_v55 = vadd.f32 %v1554_v38, %v1532_v19 }
 0x615   : > { %v1571_v62 = vsel %vm1570_vm8, %v1568_v48, %v1569_v21  ;;  %v1593_v43 = vsel %vm1592_vm9, %v1590_v11, %v1591_v47 }
 0x616   : > { %v1573_v31 = vadd.f32 %v1571_v62, %v1556_v55  ;;  %v1613_v32 = vpop.permute.xlu1 %1612  ;;  %v2364_v34 = vpop.permute.xlu0 %2363 }
 0x617   : > { %v1614_v40 = vrot.slane %v1613_v32, 1  ;;  %v2365_v5 = vrot.slane %v2364_v34, 1 }
 0x618   : > { %v1595_v44 = vadd.f32 %v1593_v43, %v1573_v31 }
 0x619   : > { %v1616_v56 = vsel %vm1615_vm10, %v1613_v32, %v1614_v40  ;;  %v2366_v10 = vsel %vm1491_vm4, %v2364_v34, %v2365_v5 }
 0x61a   : > { %v1630_v50 = vpop.permute.xlu1 %1629  ;;  %v2379_v54 = vpop.permute.xlu0 %2378  ;;  %v1618_v13 = vadd.f32 %v1616_v56, %v1595_v44  ;;  %v2368_v42 = vadd.f32 %v2366_v10, %v2351_v45 }
 0x61b   : > { %v1631_v57 = vrot.slane %v1630_v50, 1  ;;  %v2380_v4 = vrot.slane %v2379_v54, 1 }
 0x61d   : > { %v1633_v12 = vsel %vm1632_vm11, %v1630_v50, %v1631_v57  ;;  %v2381_v16 = vsel %vm1529_vm5, %v2379_v54, %v2380_v4  ;;  %v1667_v57 = vsub.s32 0, %v6563_v63  ;;  %v1671_v4 = vsub.s32 1, %v6563_v63 }
 0x61e   : > { %v1652_v14 = vpop.permute.xlu1 %1651  ;;  %v2396_v41 = vpop.permute.xlu0 %2395  ;;  %v1635_v17 = vadd.f32 %v1633_v12, %v1618_v13  ;;  %v2383_v58 = vadd.f32 %v2381_v16, %v2368_v42 }
 0x61f   : > { %v1653_v35 = vrot.slane %v1652_v14, 1  ;;  %v2397_v15 = vrot.slane %v2396_v41, 1 }
 0x621   : > { %v1655_v6 = vsel %vm1654_vm12, %v1652_v14, %v1653_v35  ;;  %v2398_v18 = vsel %vm1553_vm6, %v2396_v41, %v2397_v15 }
 0x622   : > { %v1657_v19 = vadd.f32 %v1655_v6, %v1635_v17  ;;  %v2427_v11 = vpop.permute.xlu1 %2426  ;;  %v2412_v48 = vpop.permute.xlu0 %2411  ;;  %v2400_v39 = vadd.f32 %v2398_v18, %v2383_v58 }
 0x623   : > { %v2428_v38 = vrot.slane %v2427_v11, 1  ;;  %v2413_v21 = vrot.slane %v2412_v48, 1 }
 0x624   : > { %v5003_v26 = vmul.f32 -1.442695, %v1657_v19 }
 0x625   : > { %v2414_v53 = vsel %vm1570_vm8, %v2412_v48, %v2413_v21  ;;  %v2429_v30 = vsel %vm1592_vm9, %v2427_v11, %v2428_v38 }
 0x626   : > { %6072 = vpow2.f32 %v5003_v26  ;;  %v2416_v55 = vadd.f32 %v2414_v53, %v2400_v39  ;;  %v2460_v47 = vpop.permute.xlu1 %2459  ;;  %v2444_v62 = vpop.permute.xlu0 %2443 }
 0x627   : > { %v2461_v37 = vrot.slane %v2460_v47, 1  ;;  %v2445_v31 = vrot.slane %v2444_v62, 1 }
 0x628   : > { %v2431_v32 = vadd.f32 %v2429_v30, %v2416_v55 }
 0x629   : > { %v2446_v33 = vsel %vm1615_vm10, %v2444_v62, %v2445_v31  ;;  %v2462_v20 = vsel %vm1632_vm11, %v2460_v47, %v2461_v37  ;;  %v2522_v37 = vld [vmem:[%s8422_s12 + $0x8] sm:$0xff]  ;;  %v2523_v31 = vld [vmem:[%s8422_s12 + $0x10] sm:$0xff] }
 0x62a   : > { %v2448_v34 = vadd.f32 %v2446_v33, %v2431_v32  ;;  %v2475_v40 = vpop.permute.xlu0 %2474 }
 0x62b   : > { %v2476_v43 = vrot.slane %v2475_v40, 1 }
 0x62c   : > { %v2464_v5 = vadd.f32 %v2462_v20, %v2448_v34  ;;  %v2524_v20 = vld [vmem:[%s8422_s12 + $0x18] sm:$0xff] }
 0x62d   : > { %v2477_v44 = vsel %vm1654_vm12, %v2475_v40, %v2476_v43 }
 0x62e   : > { %v2479_v49 = vadd.f32 %v2477_v44, %v2464_v5  ;;  %v2626_v5 = vld [vmem:[%s8424_s14] sm:$0xff] }
 0x630   : > { %v6073_v50 = vpop.eup %6072  ;;  %v5041_v54 = vmul.f32 -1.442695, %v2479_v49 }
 0x631   : > { %v1661_v56 = vadd.f32 1.0, %v6073_v50 }
 0x632   : > { %6074 = vpow2.f32 %v5041_v54 }
 0x633   : > { %6076 = vrcp.f32 %v1661_v56 }
 0x63c   : > { %v6075_v10 = vpop.eup %6074 }
 0x63d   : > { %v6077_v12 = vpop.eup %6076  ;;  %v2483_v13 = vadd.f32 1.0, %v6075_v10  ;;  %v2629_v10 = vld [vmem:[%s8424_s14 + $0x18] sm:$0xff] }
 0x63e   : > { %v1668_v45 = vrot.slane %v6077_v12, %v1667_v57  ;;  %v1672_v14 = vrot.slane %v6077_v12, %v1671_v4  ;;  %v2731_v12 = vld [vmem:[%s8426_s16] sm:$0xff] }
 0x63f   : > { %6078 = vrcp.f32 %v2483_v13  ;;  %5239 = vmatprep.mubr.msk.f32.mxu1 %vm828_vm0, %v2731_v12  ;;  %v5540_v13 = vpack.i.bf16 %v6646_v52, %v6643_v51 }
 0x640   : > { %v6842_v41 = vmul.f32 %v1668_v45, %v6524_v22  ;;  %v6845_v16 = vmul.f32 %v1672_v14, %v6527_v23  ;;  %v6848_v35 = vmul.f32 %v1668_v45, %v6530_v24  ;;  %v6851_v15 = vmul.f32 %v1672_v14, %v6533_v25 }
 0x641   : > { %v6854_v63 = vmul.f32 %v1668_v45, %v6536_v27  ;;  %v6857_v42 = vmul.f32 %v1672_v14, %v6539_v28  ;;  %v6864_v23 = vmul.f32 %v1668_v45, %v6542_v29  ;;  %v6867_v24 = vmul.f32 %v1672_v14, %v6545_v46  ;;  %v2526_v14 = vld [vmem:[%s8423_s13 + $0x8] sm:$0xff] }
 0x642   : > { %v1686_v17 = vadd.f32 %v6845_v16, %v6842_v41  ;;  %v1683_v22 = vadd.f32 %v6851_v15, %v6848_v35  ;;  %v5535_v45 = vpack.i.bf16 %v6652_v1, %v6649_v9 }
 0x643   : > { %v1689_v25 = vadd.f32 %v6857_v42, %v6854_v63  ;;  %v1692_v27 = vadd.f32 %v6867_v24, %v6864_v23 }
 0x644   : > { %1687 = vadd.xlane.f32.xlu0 %v1686_v17  ;;  %1684 = vadd.xlane.f32.xlu1 %v1683_v22  ;;  %v2631_v17 = vld [vmem:[%s8425_s15 + $0x8] sm:$0xff]  ;;  %v2525_v22 = vld [vmem:[%s8423_s13] sm:$0xff] }
 0x645   : > { %v5453_v9 = vadd.f32 %v2631_v17, %v2526_v14 }
 0x648   : > { %1690 = vadd.xlane.f32.xlu0 %v1689_v25  ;;  %1693 = vadd.xlane.f32.xlu1 %v1692_v27  ;;  %v2630_v27 = vld [vmem:[%s8425_s15] sm:$0xff] }
 0x649   : > { %v6079_v28 = vpop.eup %6078 }
 0x64a   : > { %v2490_v6 = vrot.slane %v6079_v28, %v1667_v57  ;;  %v2494_v18 = vrot.slane %v6079_v28, %v1671_v4  ;;  %v2627_v57 = vld [vmem:[%s8424_s14 + $0x8] sm:$0xff]  ;;  %v2628_v4 = vld [vmem:[%s8424_s14 + $0x10] sm:$0xff]  ;;  %v2528_v28 = vld [vmem:[%s8423_s13 + $0x18] sm:$0xff] }
 0x64c   : > { %v6874_v58 = vmul.f32 %v2490_v6, %v6593_v59  ;;  %v6877_v29 = vmul.f32 %v2494_v18, %v6596_v60  ;;  %v6880_v46 = vmul.f32 %v2490_v6, %v6599_v61  ;;  %v6883_v19 = vmul.f32 %v2494_v18, %v6602_v3 }
 0x64d   : > { %v6886_v11 = vmul.f32 %v2490_v6, %v6605_v7  ;;  %v6889_v48 = vmul.f32 %v2494_v18, %v6608_v8  ;;  %v6896_v60 = vmul.f32 %v2490_v6, %v6615_v36  ;;  %v6899_v61 = vmul.f32 %v2494_v18, %v6618_v2  ;;  %v2521_v8 = vld [vmem:[%s8422_s12] sm:$0xff]  ;;  %v2633_v6 = vld [vmem:[%s8425_s15 + $0x18] sm:$0xff] }
 0x64e   : > { %v2508_v38 = vadd.f32 %v6877_v29, %v6874_v58  ;;  %v2505_v59 = vadd.f32 %v6883_v19, %v6880_v46  ;;  %5211 = vmatprep.mubr.msk.f32.mxu0 %vm828_vm0, %v2521_v8  ;;  %v5457_v8 = vadd.f32 %v2633_v6, %v2528_v28 }
 0x64f   : > { %v2514_v3 = vadd.f32 %v6889_v48, %v6886_v11  ;;  %v2511_v7 = vadd.f32 %v6899_v61, %v6896_v60 }
 0x650   : > { %2509 = vadd.xlane.f32.xlu1 %v2508_v38  ;;  %2506 = vadd.xlane.f32.xlu0 %v2505_v59  ;;  %v2527_v38 = vld [vmem:[%s8423_s13 + $0x10] sm:$0xff] }
 0x654   : > { %2515 = vadd.xlane.f32.xlu1 %v2514_v3  ;;  %2512 = vadd.xlane.f32.xlu0 %v2511_v7 }
 0x665   : > { %5536 = vrot.lane.b32.xlu1 %v5535_v45, %s8541_s23 }
 0x669   : > { %5546 = vrot.lane.b32.xlu1 %v5535_v45, %s8543_s6  ;;  %s8545_s6 = smov 17  }
 0x66a   : > { %5541 = vrot.lane.b32.xlu0 %v5540_v13, %s8540_s30 }
 0x66e   : > { %5551 = vrot.lane.b32.xlu0 %v5540_v13, %s8542_s26 }
 0x672   : > { %5556 = vrot.lane.b32.xlu0 %v5535_v45, %s8544_s4  ;;  %s8546_s4 = smov 111  }
 0x6d1   : > { %v1685_v36 = vpop.xlane.xlu1 %1684  ;;  %v1688_v21 = vpop.xlane.xlu0 %1687 }
 0x6d2   : > { %v1695_v2 = vmul.f32 0.00390625, %v1685_v36  ;;  %v1696_v26 = vmul.f32 0.00390625, %v1688_v21  ;;  %v2632_v21 = vld [vmem:[%s8425_s15 + $0x10] sm:$0xff] }
 0x6d4   : > { %v5281_v39 = vpack.c.bf16 %v1696_v26, %v1695_v2 }
 0x6d5   : > { %v1694_v53 = vpop.xlane.xlu1 %1693  ;;  %v1691_v55 = vpop.xlane.xlu0 %1690 }
 0x6d6   : > { %v1698_v47 = vmul.f32 0.00390625, %v1694_v53  ;;  %v1697_v62 = vmul.f32 0.00390625, %v1691_v55  ;;  %5282 = vmatprep.subr.bf16.mxu0 %v5281_v39 }
 0x6d7   : > { %5284 = vmatpush3.bf16.msra.mxu0 %v5281_v39 }
 0x6d8   : > { %v5285_v30 = vpack.c.bf16 %v1698_v47, %v1697_v62  ;;  %v2732_v47 = vld [vmem:[%s8426_s16 + $0x8] sm:$0xff]  ;;  %v2733_v62 = vld [vmem:[%s8426_s16 + $0x10] sm:$0xff] }
 0x6da   : > { %5286 = vmatprep.subr.bf16.mxu0 %v5285_v30 }
 0x6db   : > { %5288 = vmatpush3.bf16.msra.mxu0 %v5285_v30  ;;  %v2734_v30 = vld [vmem:[%s8426_s16 + $0x18] sm:$0xff] }
 0x6dd   : > { %v2510_v32 = vpop.xlane.xlu1 %2509  ;;  %v2507_v33 = vpop.xlane.xlu0 %2506 }
 0x6de   : > { %v2518_v34 = vmul.f32 0.00390625, %v2510_v32  ;;  %v2517_v40 = vmul.f32 0.00390625, %v2507_v33  ;;  %5212 = vmatmul.mubr.msk.f32.vlgmr.msra.gmra.mrb[18].mxu0 %vm828_vm0, %v2522_v37  ;;  %v2740_v37 = vld [vmem:[%s8427_s17 + $0x8] sm:$0xff] }
 0x6df   : > { %5214 = vmatprep.mubr.msk.f32.mxu0 %vm828_vm0, %v2523_v31  ;;  %v2739_v31 = vld [vmem:[%s8427_s17] sm:$0xff] }
 0x6e0   : > { %v5289_v43 = vpack.c.bf16 %v2518_v34, %v2517_v40 }
 0x6e1   : > { %v2516_v44 = vpop.xlane.xlu1 %2515  ;;  %v2513_v49 = vpop.xlane.xlu0 %2512 }
 0x6e2   : > { %v2520_v50 = vmul.f32 0.00390625, %v2516_v44  ;;  %v2519_v54 = vmul.f32 0.00390625, %v2513_v49  ;;  %5290 = vmatprep.subr.bf16.mxu0 %v5289_v43  ;;  %5215 = vmatmul.mubr.msk.f32.gmra.mrb[20].mxu0 %vm828_vm0, %v2524_v20  ;;  %v2742_v20 = vld [vmem:[%s8427_s17 + $0x18] sm:$0xff] }
 0x6e3   : > { %5292 = vmatpush3.bf16.msra.mxu0 %v5289_v43  ;;  %5225 = vmatprep.mubr.msk.f32.mxu0 %vm828_vm0, %v2626_v5  ;;  %v2741_v5 = vld [vmem:[%s8427_s17 + $0x10] sm:$0xff] }
 0x6e4   : > { %v5293_v56 = vpack.c.bf16 %v2520_v50, %v2519_v54 }
 0x6e5   : > { %v7000_v12 = vpop.permute.xlu0 %5541 }
 0x6e6   : > { %5294 = vmatprep.subr.bf16.mxu0 %v5293_v56 }
 0x6e7   : > { %5296 = vmatpush3.bf16.msra.mxu0 %v5293_v56 }
 0x6e9   : > { %v7012_v45 = vpop.permute.xlu0 %5551 }
 0x6ea   : > { %5226 = vmatmul.mubr.msk.f32.vlgmr.msra.gmra.mrb[18].mxu0 %vm828_vm0, %v2627_v57 }
 0x6eb   : > { %5228 = vmatprep.mubr.msk.f32.mxu0 %vm828_vm0, %v2628_v4 }
 0x6ee   : > { %5229 = vmatmul.mubr.msk.f32.gmra.mrb[20].mxu0 %vm828_vm0, %v2629_v10  ;;  %v6998_v10 = vpop.permute.xlu1 %5536 }
 0x6f2   : > { %v7010_v13 = vpop.permute.xlu1 %5546 }
 0x7bd   : > { %v5227_v25 = vpop.f32.mrb[18].mxu0 }
 0x7be   : > { %v2712_v1 = vpop.f32.mrb[19].mxu0  ;;  %v5454_v59 = vadd.f32 %v5453_v9, %v5227_v25  ;;  %v7016_v25 = vpop.permute.xlu0 %5556 }
 0x7bf   : > { %v5455_v18 = vadd.f32 %v2712_v1, %v2525_v22 }
 0x7c1   : > { %v5456_v3 = vadd.f32 %v5455_v18, %v2630_v27  ;;  %v5230_v7 = vpop.f32.mrb[20].mxu0 }
 0x7c2   : > { %v2722_v36 = vpop.f32.mrb[21].mxu0  ;;  %v5458_v39 = vadd.f32 %v5457_v8, %v5230_v7 }
 0x7c3   : > { %v5459_v2 = vadd.f32 %v2722_v36, %v2527_v38  ;;  %v5297_v26 = vpack.c.bf16 %v5454_v59, %v5456_v3 }
 0x7c5   : > { %v5460_v53 = vadd.f32 %v5459_v2, %v2632_v21  ;;  %5298 = vmatprep.subr.bf16.mxu1 %v5297_v26 }
 0x7c6   : > { %5300 = vmatpush3.bf16.msra.mxu1 %v5297_v26 }
 0x7c7   : > { %v5301_v55 = vpack.c.bf16 %v5458_v39, %v5460_v53 }
 0x7c9   : > { %5302 = vmatprep.subr.bf16.mxu1 %v5301_v55 }
 0x7ca   : > { %5304 = vmatpush3.bf16.msra.mxu1 %v5301_v55 }
 0x7cd   : > { %5240 = vmatmul.mubr.msk.f32.vlgmr.msra.gmra.mrb[14].mxu1 %vm828_vm0, %v2732_v47 }
 0x7ce   : > { %5242 = vmatprep.mubr.msk.f32.mxu1 %vm828_vm0, %v2733_v62 }
 0x7d1   : > { %5243 = vmatmul.mubr.msk.f32.gmra.mrb[16].mxu1 %vm828_vm0, %v2734_v30 }
 0x8a0   : > { %v5241_v32 = vpop.f32.mrb[14].mxu1 }
 0x8a1   : > { %v2827_v33 = vadd.f32 %v5241_v32, %v2740_v37  ;;  %v2821_v34 = vpop.f32.mrb[15].mxu1 }
 0x8a2   : > { %v2822_v40 = vadd.f32 %v2821_v34, %v2739_v31 }
 0x8a3   : > { %v2841_v43 = vadd.f32 1.0, %v2827_v33 }
 0x8a4   : > { %v2840_v44 = vadd.f32 1.0, %v2822_v40  ;;  %v5244_v49 = vpop.f32.mrb[16].mxu1 }
 0x8a5   : > { %v2837_v50 = vadd.f32 %v5244_v49, %v2742_v20  ;;  %2851 = vperm.xlu1 %5534, %v2841_v43   ;;  %v2831_v54 = vpop.f32.mrb[17].mxu1 }
 0x8a6   : > { %v2832_v56 = vadd.f32 %v2831_v54, %v2741_v5  ;;  %2846 = vperm.xlu0 %5533, %v2840_v44  }
 0x8a7   : > { %v2843_v57 = vadd.f32 1.0, %v2837_v50 }
 0x8a8   : > { %v2842_v4 = vadd.f32 1.0, %v2832_v56 }
 0x8aa   : > { %2856 = vperm.xlu1 %5534, %v2842_v4   ;;  %2861 = vperm.xlu0 %5533, %v2843_v57  }
 0x924   : > { %v2852_v14 = vpop.permute.xlu1 %2851 }
 0x925   : > { %v2866_v17 = vmul.f32 %v2852_v14, %v6842_v41  ;;  %v2867_v22 = vmul.f32 %v2852_v14, %v6845_v16  ;;  %v2927_v9 = vmul.f32 %v2852_v14, %v6874_v58  ;;  %v2928_v1 = vmul.f32 %v2852_v14, %v6877_v29  ;;  %v2847_v27 = vpop.permute.xlu0 %2846 }
 0x926   : > { %v2865_v28 = vmul.f32 %v2847_v27, %v6851_v15  ;;  %v2864_v41 = vmul.f32 %v2847_v27, %v6848_v35  ;;  %v2926_v16 = vmul.f32 %v2847_v27, %v6883_v19  ;;  %v2925_v6 = vmul.f32 %v2847_v27, %v6880_v46 }
 0x927   : > { %2884 = vrot.lane.b32.xlu1 %v2866_v17, %s8545_s6  ;;  %2886 = vrot.lane.b32.xlu0 %v2867_v22, %s8545_s6  ;;  %v7128_v14 = vunpack.i.h.bf16 %v6998_v10  ;;  %v7131_v17 = vunpack.i.l.bf16 %v6998_v10  ;;  %v7144_v27 = vunpack.i.h.bf16 %v7010_v13  ;;  %v7147_v10 = vunpack.i.l.bf16 %v7010_v13 }
 0x929   : > { %v2862_v58 = vpop.permute.xlu0 %2861  ;;  %v2857_v19 = vpop.permute.xlu1 %2856 }
 0x92a   : > { %v2871_v29 = vmul.f32 %v2862_v58, %v6867_v24  ;;  %v2870_v18 = vmul.f32 %v2862_v58, %v6864_v23  ;;  %v2932_v35 = vmul.f32 %v2862_v58, %v6889_v48  ;;  %v2931_v15 = vmul.f32 %v2862_v58, %v6886_v11 }
 0x92b   : > { %2945 = vrot.lane.b32.xlu1 %v2927_v9, %s8545_s6  ;;  %2947 = vrot.lane.b32.xlu0 %v2928_v1, %s8545_s6  ;;  %v2869_v46 = vmul.f32 %v2857_v19, %v6857_v42  ;;  %v2868_v38 = vmul.f32 %v2857_v19, %v6854_v63  ;;  %v2930_v23 = vmul.f32 %v2857_v19, %v6899_v61 }
 0x92c   : > { %v2929_v24 = vmul.f32 %v2857_v19, %v6896_v60 }
 0x92f   : > { %2882 = vrot.lane.b32.xlu0 %v2865_v28, %s8545_s6  ;;  %2880 = vrot.lane.b32.xlu1 %v2864_v41, %s8545_s6  ;;  %v7150_v28 = vunpack.i.h.bf16 %v7012_v45  ;;  %v7153_v41 = vunpack.i.l.bf16 %v7012_v45 }
 0x931   : > { %8547 = vst [vmem:[#allocation12_spill] sm:$0xff] %v7153_v41  ;;  %v7194_v19 = vsel %vm1545_vm1, %v7153_v41, %v7150_v28 }
 0x933   : > { %2943 = vrot.lane.b32.xlu0 %v2926_v16, %s8545_s6  ;;  %2941 = vrot.lane.b32.xlu1 %v2925_v6, %s8545_s6  ;;  %v7160_v16 = vunpack.i.h.bf16 %v7000_v12  ;;  %v7163_v6 = vunpack.i.l.bf16 %v7000_v12 }
 0x937   : > { %2894 = vrot.lane.b32.xlu0 %v2871_v29, %s8545_s6  ;;  %2892 = vrot.lane.b32.xlu1 %v2870_v18, %s8545_s6  ;;  %v7173_v18 = vsel %vm1584_vm15, %v7131_v17, %v7128_v14 }
 0x93b   : > { %2955 = vrot.lane.b32.xlu0 %v2932_v35, %s8545_s6  ;;  %2953 = vrot.lane.b32.xlu1 %v2931_v15, %s8545_s6  ;;  %v7189_v15 = vsel %vm1117_vm3, %v7147_v10, %v7144_v27 }
 0x93f   : > { %2890 = vrot.lane.b32.xlu0 %v2869_v46, %s8545_s6  ;;  %2888 = vrot.lane.b32.xlu1 %v2868_v38, %s8545_s6 }
 0x943   : > { %2951 = vrot.lane.b32.xlu0 %v2930_v23, %s8545_s6  ;;  %2949 = vrot.lane.b32.xlu1 %v2929_v24, %s8545_s6  ;;  %v7207_v24 = vsel %vm828_vm0, %v7163_v6, %v7160_v16  ;;  %vm4511_vm0 = vcmask 523264  }
 0x999   : > { %v2885_v11 = vpop.permute.xlu1 %2884  ;;  %v2887_v48 = vpop.permute.xlu0 %2886 }
 0x99a   : > { %2916 = vst.msk [vmem:[#allocation3 + $0x18] sm:$0xff] %vm2912_vm14, %v2885_v11  ;;  %v7050_v42 = vsel %vm774_vm7, %v2885_v11, %v2887_v48 }
 0x99b   : > { %2918 = vst.msk [vmem:[#allocation3 + $0x28] sm:$0xff] %vm774_vm7, %v2887_v48  ;;  %2917 = vst [vmem:[#allocation3 + $0x20] sm:$0xff] %v7050_v42  ;;  %v3004_v2 = vmul.f32 %v6646_v52, %v7050_v42  ;;  %v7215_v48 = vmul.f32 %v7194_v19, %v7050_v42 }
 0x99d   : > { %v2946_v63 = vpop.permute.xlu1 %2945  ;;  %v2948_v61 = vpop.permute.xlu0 %2947  ;;  %8548 = vst [vmem:[#allocation13_spill] sm:$0xff] %v7215_v48 }
 0x99e   : > { %2976 = vst.msk [vmem:[#allocation3 + $0x78] sm:$0xff] %vm2912_vm14, %v2946_v63  ;;  %v7056_v60 = vsel %vm774_vm7, %v2946_v63, %v2948_v61 }
 0x99f   : > { %2978 = vst.msk [vmem:[#allocation3 + $0x88] sm:$0xff] %vm774_vm7, %v2948_v61  ;;  %2977 = vst [vmem:[#allocation3 + $0x80] sm:$0xff] %v7056_v60 }
 0x9a1   : > { %v2881_v59 = vpop.permute.xlu1 %2880  ;;  %v2883_v3 = vpop.permute.xlu0 %2882  ;;  %v7083_v47 = vld [vmem:[#allocation3 + $0x18] sm:$0xff] }
 0x9a2   : > { %v7060_v7 = vld [vmem:[#allocation3 + $0x28] sm:$0xff]  ;;  %2913 = vst.msk [vmem:[#allocation3] sm:$0xff] %vm2912_vm14, %v2881_v59  ;;  %v7064_v8 = vsel %vm774_vm7, %v2881_v59, %v2883_v3  ;;  %v3003_v34 = vmul.f32 %v6643_v51, %v7083_v47 }
 0x9a3   : > { %2915 = vst.msk [vmem:[#allocation3 + $0x10] sm:$0xff] %vm774_vm7, %v2883_v3  ;;  %v7069_v36 = vpack.i.bf16 %v7060_v7, %v7050_v42  ;;  %v3002_v21 = vmul.f32 %v6646_v52, %v7064_v8 }
 0x9a5   : > { %5561 = vrot.lane.b32.xlu1 %v7069_v36, %s8546_s4  ;;  %v2942_v26 = vpop.permute.xlu1 %2941  ;;  %v2944_v39 = vpop.permute.xlu0 %2943  ;;  %v5305_v53 = vpack.c.bf16 %v3004_v2, %v3002_v21  ;;  %v7107_v49 = vld [vmem:[#allocation3 + $0x78] sm:$0xff]  ;;  %v3012_v21 = vmul.f32 %v6646_v52, %v7056_v60 }
 0x9a6   : > { %2973 = vst.msk [vmem:[#allocation3 + $0x60] sm:$0xff] %vm2912_vm14, %v2942_v26  ;;  %v7079_v55 = vsel %vm774_vm7, %v2942_v26, %v2944_v39  ;;  %v7101_v40 = vld [vmem:[#allocation3 + $0x88] sm:$0xff] }
 0x9a7   : > { %2975 = vst.msk [vmem:[#allocation3 + $0x70] sm:$0xff] %vm774_vm7, %v2944_v39  ;;  %2974 = vst [vmem:[#allocation3 + $0x68] sm:$0xff] %v7079_v55  ;;  %5306 = vmatprep.subr.bf16.mxu1 %v5305_v53  ;;  %v7120_v56 = vpack.i.bf16 %v7101_v40, %v7056_v60  ;;  %v3010_v23 = vmul.f32 %v6646_v52, %v7079_v55 }
 0x9a9   : > { %v2893_v62 = vpop.permute.xlu1 %2892  ;;  %v2895_v30 = vpop.permute.xlu0 %2894  ;;  %v7085_v37 = vld [vmem:[#allocation3] sm:$0xff] }
 0x9aa   : > { %2922 = vst.msk [vmem:[#allocation3 + $0x48] sm:$0xff] %vm2912_vm14, %v2893_v62  ;;  %v7089_v31 = vsel %vm774_vm7, %v2893_v62, %v2895_v30  ;;  %v7094_v32 = vpack.i.bf16 %v7083_v47, %v7085_v37  ;;  %v3001_v33 = vmul.f32 %v6643_v51, %v7085_v37  ;;  %v7244_v62 = vunpack.i.h.bf16 %v7016_v25 }
 0x9ab   : > { %2924 = vst.msk [vmem:[#allocation3 + $0x58] sm:$0xff] %vm774_vm7, %v2895_v30  ;;  %2923 = vst [vmem:[#allocation3 + $0x50] sm:$0xff] %v7089_v31  ;;  %v3008_v1 = vmul.f32 %v6646_v52, %v7089_v31  ;;  %v7180_v35 = vmul.f32 %v7173_v18, %v7089_v31  ;;  %v7211_v11 = vmul.f32 %v7189_v15, %v7089_v31 }
 0x9ac   : > { %5566 = vrot.lane.b32.xlu1 %v7094_v32, %s8546_s4  ;;  %v5307_v20 = vpack.c.bf16 %v3003_v34, %v3001_v33  ;;  %8549 = vst [vmem:[#allocation14_spill] sm:$0xff] %v7244_v62  ;;  %v7254_v34 = vmul.f32 %v7207_v24, %v7089_v31  ;;  %v7355_v33 = vmul.f32 %v7153_v41, %v7083_v47 }
 0x9ad   : > { %v2954_v43 = vpop.permute.xlu1 %2953  ;;  %v2956_v5 = vpop.permute.xlu0 %2955  ;;  %v7105_v44 = vld [vmem:[#allocation3 + $0x60] sm:$0xff] }
 0x9ae   : > { %2982 = vst.msk [vmem:[#allocation3 + $0xa8] sm:$0xff] %vm2912_vm14, %v2954_v43  ;;  %v7111_v50 = vsel %vm774_vm7, %v2954_v43, %v2956_v5  ;;  %v7116_v54 = vpack.i.bf16 %v7107_v49, %v7105_v44  ;;  %5308 = vmatpush1.bf16.msra.mxu1 %v5307_v20  ;;  %v3009_v2 = vmul.f32 %v6643_v51, %v7105_v44  ;;  %8562 = vst [vmem:[#allocation26_spill] sm:$0xff] %v7355_v33 }
 0x9af   : > { %2984 = vst.msk [vmem:[#allocation3 + $0xb8] sm:$0xff] %vm774_vm7, %v2956_v5  ;;  %2983 = vst [vmem:[#allocation3 + $0xb0] sm:$0xff] %v7111_v50  ;;  %v7198_v46 = vmul.f32 %v7173_v18, %v7111_v50  ;;  %v5313_v20 = vpack.c.bf16 %v3012_v21, %v3010_v23  ;;  %v7292_v23 = vmul.f32 %v7207_v24, %v7111_v50 }
 0x9b0   : > { %5576 = vrot.lane.b32.xlu0 %v7116_v54, %s8546_s4  ;;  %5571 = vrot.lane.b32.xlu1 %v7120_v56, %s8546_s4 }
 0x9b1   : > { %v2889_v57 = vpop.permute.xlu1 %2888  ;;  %v2891_v4 = vpop.permute.xlu0 %2890  ;;  %v7176_v12 = vld [vmem:[#allocation3 + $0x48] sm:$0xff]  ;;  %8552 = vst [vmem:[#allocation16_spill] sm:$0xff] %v7292_v23  ;;  %v3705_v23 = vmul.f32 %v7131_v17, %v7085_v37 }
 0x9b2   : > { %2919 = vst.msk [vmem:[#allocation3 + $0x30] sm:$0xff] %vm2912_vm14, %v2889_v57  ;;  %v7135_v22 = vsel %vm774_vm7, %v2889_v57, %v2891_v4  ;;  %v3007_v61 = vmul.f32 %v6643_v51, %v7176_v12  ;;  %v7227_v3 = vmul.f32 %v7131_v17, %v7176_v12  ;;  %v7241_v53 = vmul.f32 %v7163_v6, %v7176_v12 }
 0x9b3   : > { %2921 = vst.msk [vmem:[#allocation3 + $0x40] sm:$0xff] %vm774_vm7, %v2891_v4  ;;  %2920 = vst [vmem:[#allocation3 + $0x38] sm:$0xff] %v7135_v22  ;;  %v3006_v9 = vmul.f32 %v6646_v52, %v7135_v22  ;;  %v3011_v57 = vmul.f32 %v6643_v51, %v7107_v49  ;;  %v3016_v4 = vmul.f32 %v6646_v52, %v7111_v50 }
 0x9b4   : > { %5586 = vrot.lane.b32.xlu0 %v7094_v32, %s8536_s27  ;;  %5581 = vrot.lane.b32.xlu1 %v7069_v36, %s8536_s27 }
 0x9b5   : > { %v2950_v13 = vpop.permute.xlu1 %2949  ;;  %v2952_v58 = vpop.permute.xlu0 %2951  ;;  %v5309_v29 = vpack.c.bf16 %v3008_v1, %v3006_v9  ;;  %v7233_v26 = vld [vmem:[#allocation3 + $0xa8] sm:$0xff] }
 0x9b6   : > { %2979 = vst.msk [vmem:[#allocation3 + $0x90] sm:$0xff] %vm2912_vm14, %v2950_v13  ;;  %v7167_v45 = vsel %vm774_vm7, %v2950_v13, %v2952_v58  ;;  %v7276_v1 = vmul.f32 %v7131_v17, %v7233_v26  ;;  %v7278_v13 = vld [vmem:[#allocation3 + $0x10] sm:$0xff]  ;;  %v3015_v21 = vmul.f32 %v6643_v51, %v7233_v26  ;;  %v7333_v0 = vmul.f32 %v7147_v10, %v7233_v26 }
 0x9b7   : > { %2981 = vst.msk [vmem:[#allocation3 + $0xa0] sm:$0xff] %vm774_vm7, %v2952_v58  ;;  %2980 = vst [vmem:[#allocation3 + $0x98] sm:$0xff] %v7167_v45  ;;  %5310 = vmatprep.subr.bf16.mxu1 %v5309_v29  ;;  %v3014_v43 = vmul.f32 %v6646_v52, %v7167_v45  ;;  %v7288_v52 = vmul.f32 %v7163_v6, %v7233_v26 }
 0x9b8   : > { %5596 = vrot.lane.b32.xlu0 %v7116_v54, %s8536_s27  ;;  %5591 = vrot.lane.b32.xlu1 %v7120_v56, %s8536_s27  ;;  %8559 = vst [vmem:[#allocation23_spill] sm:$0xff] %v7333_v0 }
 0x9b9   : > { %v7200_v38 = vld [vmem:[#allocation3 + $0x30] sm:$0xff] }
 0x9ba   : > { %v3005_v63 = vmul.f32 %v6643_v51, %v7200_v38  ;;  %v7223_v59 = vmul.f32 %v7131_v17, %v7200_v38  ;;  %v7237_v39 = vmul.f32 %v7163_v6, %v7200_v38  ;;  %v7380_v48 = vmul.f32 %v7153_v41, %v7200_v38  ;;  %v7400_v33 = vld [vmem:[#allocation3 + $0x38] sm:$0xff] }
 0x9bc   : > { %5601 = vrot.lane.b32.xlu0 %v7069_v36, %s8550_s5  ;;  %5606 = vrot.lane.b32.xlu1 %v7094_v32, %s8550_s5  ;;  %v5311_v30 = vpack.c.bf16 %v3007_v61, %v3005_v63  ;;  %v7264_v32 = vmul.f32 %v7189_v15, %v7111_v50  ;;  %v7295_v63 = vunpack.i.l.bf16 %v7016_v25  ;;  %v5315_v61 = vpack.c.bf16 %v3011_v57, %v3009_v2  ;;  %v7329_v57 = vld [vmem:[#allocation3 + $0x70] sm:$0xff] }
 0x9bd   : > { %v7258_v5 = vld [vmem:[#allocation3 + $0x90] sm:$0xff]  ;;  %v7309_v25 = vmul.f32 %v7173_v18, %v7135_v22  ;;  %v7323_v2 = vmul.f32 %v7150_v28, %v7060_v7  ;;  %8567 = vst [vmem:[#allocation31_spill] sm:$0xff] %v7380_v48 }
 0x9be   : > { %8551 = vst [vmem:[#allocation15_spill] sm:$0xff] %v7264_v32  ;;  %5312 = vmatpush1.bf16.msra.mxu1 %v5311_v30  ;;  %v7272_v9 = vmul.f32 %v7131_v17, %v7258_v5  ;;  %v3013_v58 = vmul.f32 %v6643_v51, %v7258_v5  ;;  %v7284_v29 = vmul.f32 %v7163_v6, %v7258_v5  ;;  %8553 = vst [vmem:[#allocation17_spill] sm:$0xff] %v7295_v63  ;;  %v7436_v48 = vld [vmem:[#allocation3 + $0x98] sm:$0xff] }
 0x9bf   : > { %5314 = vmatprep.subr.bf16.mxu1 %v5313_v20  ;;  %v5317_v20 = vpack.c.bf16 %v3016_v4, %v3014_v43  ;;  %8554 = vst [vmem:[#allocation18_spill] sm:$0xff] %v7309_v25  ;;  %v7319_v51 = vmul.f32 %v7147_v10, %v7176_v12  ;;  %8557 = vst [vmem:[#allocation21_spill] sm:$0xff] %v7323_v2  ;;  %v7327_v43 = vmul.f32 %v7147_v10, %v7258_v5 }
 0x9c0   : > { %5611 = vrot.lane.b32.xlu0 %v7120_v56, %s8550_s5  ;;  %5616 = vrot.lane.b32.xlu1 %v7116_v54, %s8550_s5  ;;  %v7313_v56 = vmul.f32 %v7147_v10, %v7200_v38  ;;  %v5640_v54 = vpack.i.bf16 %v7278_v13, %v7064_v8  ;;  %v5319_v4 = vpack.c.bf16 %v3015_v21, %v3013_v58 }
 0x9c1   : > { %8556 = vst [vmem:[#allocation20_spill] sm:$0xff] %v7319_v51  ;;  %8558 = vst [vmem:[#allocation22_spill] sm:$0xff] %v7327_v43  ;;  %v7347_v58 = vmul.f32 %v7153_v41, %v7085_v37  ;;  %v3710_v21 = vmul.f32 %v7128_v14, %v7060_v7  ;;  %v7360_v36 = vsel %vm1646_vm2, %v7295_v63, %v7244_v62  ;;  %v7404_v51 = vld [vmem:[#allocation3 + $0x40] sm:$0xff] }
 0x9c2   : > { %8555 = vst [vmem:[#allocation19_spill] sm:$0xff] %v7313_v56  ;;  %5316 = vmatpush1.bf16.msra.mxu1 %v5315_v61  ;;  %v7337_v61 = vmul.f32 %v7173_v18, %v7167_v45  ;;  %8563 = vst [vmem:[#allocation27_spill] sm:$0xff] %v7360_v36  ;;  %v7370_v30 = vmul.f32 %v7244_v62, %v7278_v13  ;;  %v7374_v43 = vmul.f32 %v7207_v24, %v7135_v22  ;;  %v7392_v62 = vld [vmem:[#allocation3 + $0x58] sm:$0xff] }
 0x9c3   : > { %5318 = vmatprep.subr.bf16.mxu1 %v5317_v20  ;;  %8561 = vst [vmem:[#allocation25_spill] sm:$0xff] %v7347_v58  ;;  %v5645_v20 = vpack.i.bf16 %v7329_v57, %v7079_v55  ;;  %v7396_v58 = vld [vmem:[#allocation3 + $0x50] sm:$0xff]  ;;  %v3722_v56 = vmul.f32 %v7128_v14, %v7101_v40  ;;  %v7408_v25 = vmul.f32 %v7207_v24, %v7167_v45  ;;  %8577 = vst [vmem:[#allocation41_spill] sm:$0xff] %v7436_v48 }
 0x9c4   : > { %8560 = vst [vmem:[#allocation24_spill] sm:$0xff] %v7337_v61  ;;  %5641 = vrot.lane.b32.xlu1 %v5640_v54, %s8550_s5  ;;  %5621 = vrot.lane.b32.xlu0 %v5640_v54, %s8546_s4  ;;  %v7366_v61 = vmul.f32 %v7360_v36, %v7064_v8  ;;  %8565 = vst [vmem:[#allocation29_spill] sm:$0xff] %v7370_v30  ;;  %v7386_v36 = vld [vmem:[#allocation3 + $0x68] sm:$0xff]  ;;  %v3881_v32 = vmul.f32 %v7163_v6, %v7085_v37 }
 0x9c5   : > { %8566 = vst [vmem:[#allocation30_spill] sm:$0xff] %v7374_v43  ;;  %8569 = vst [vmem:[#allocation33_spill] sm:$0xff] %v7386_v36  ;;  %v3709_v43 = vmul.f32 %v7173_v18, %v7050_v42  ;;  %v7412_v0 = vmul.f32 %v7194_v19, %v7386_v36  ;;  %v7430_v36 = vld [vmem:[#allocation3 + $0xa0] sm:$0xff] }
 0x9c6   : > { %5320 = vmatpush1.bf16.msra.mxu1 %v5319_v4  ;;  %8564 = vst [vmem:[#allocation28_spill] sm:$0xff] %v7366_v61  ;;  %v7384_v4 = vmul.f32 %v7153_v41, %v7176_v12  ;;  %8570 = vst [vmem:[#allocation34_spill] sm:$0xff] %v7396_v58  ;;  %v7416_v61 = vmul.f32 %v7150_v28, %v7329_v57  ;;  %v3721_v41 = vmul.f32 %v7173_v18, %v7056_v60 }
 0x9c7   : > { %v5650_v2 = vpack.i.bf16 %v3710_v21, %v3709_v43  ;;  %8571 = vst [vmem:[#allocation35_spill] sm:$0xff] %v7408_v25  ;;  %8572 = vst [vmem:[#allocation36_spill] sm:$0xff] %v7412_v0  ;;  %v7420_v43 = vmul.f32 %v7396_v58, %v7194_v19  ;;  %v7424_v21 = vmul.f32 %v7150_v28, %v7392_v62 }
 0x9c8   : > { %8568 = vst [vmem:[#allocation32_spill] sm:$0xff] %v7384_v4  ;;  %5646 = vrot.lane.b32.xlu1 %v5645_v20, %s8550_s5  ;;  %5626 = vrot.lane.b32.xlu0 %v5645_v20, %s8546_s4  ;;  %8573 = vst [vmem:[#allocation37_spill] sm:$0xff] %v7416_v61  ;;  %v7434_v25 = vmul.f32 %v7189_v15, %v7400_v33  ;;  %v5660_v30 = vpack.i.bf16 %v3722_v56, %v3721_v41 }
 0x9c9   : > { %8574 = vst [vmem:[#allocation38_spill] sm:$0xff] %v7420_v43  ;;  %8575 = vst [vmem:[#allocation39_spill] sm:$0xff] %v7424_v21  ;;  %v7456_v4 = vmul.f32 %v7295_v63, %v7176_v12  ;;  %v7462_v43 = vmul.f32 %v7189_v15, %v7436_v48  ;;  %v7466_v41 = vmul.f32 %v7144_v27, %v7430_v36 }
 0x9ca   : > { %8576 = vst [vmem:[#allocation40_spill] sm:$0xff] %v7434_v25  ;;  %v3708_v56 = vmul.f32 %v7131_v17, %v7083_v47  ;;  %v3884_v21 = vmul.f32 %v7163_v6, %v7083_v47  ;;  %v3717_v25 = vmul.f32 %v7131_v17, %v7105_v44  ;;  %v3720_v58 = vmul.f32 %v7131_v17, %v7107_v49 }
 0x9cb   : > { %8580 = vst [vmem:[#allocation44_spill] sm:$0xff] %v7456_v4  ;;  %v7494_v4 = vmul.f32 %v7150_v28, %v7404_v51  ;;  %v3886_v17 = vmul.f32 %v7160_v16, %v7060_v7 }
 0x9cc   : > { %5651 = vrot.lane.b32.xlu1 %v5650_v2, %s8538_s3  ;;  %5631 = vrot.lane.b32.xlu0 %v5640_v54, %s8536_s27  ;;  %v7444_v54 = vmul.f32 %v7144_v27, %v7404_v51  ;;  %v7448_v2 = vmul.f32 %v7295_v63, %v7200_v38  ;;  %v5655_v0 = vpack.i.bf16 %v3708_v56, %v3705_v23  ;;  %v7486_v63 = vld [vmem:[#allocation3 + $0xb0] sm:$0xff] }
 0x9cd   : > { %v5675_v61 = vpack.i.bf16 %v3884_v21, %v3881_v32  ;;  %8582 = vst [vmem:[#allocation46_spill] sm:$0xff] %v7486_v63  ;;  %8583 = vst [vmem:[#allocation47_spill] sm:$0xff] %v7494_v4  ;;  %v3896_v32 = vmul.f32 %v7163_v6, %v7107_v49  ;;  %v3214_v23 = vmul.f32 %v7144_v27, %v7060_v7 }
 0x9ce   : > { %8578 = vst [vmem:[#allocation42_spill] sm:$0xff] %v7444_v54  ;;  %8579 = vst [vmem:[#allocation43_spill] sm:$0xff] %v7448_v2  ;;  %v7490_v2 = vld [vmem:[#allocation3 + $0xb8] sm:$0xff]  ;;  %v5665_v21 = vpack.i.bf16 %v3720_v58, %v3717_v25  ;;  %v7508_v54 = vmul.f32 %v7194_v19, %v7486_v63  ;;  %v7520_v25 = vmul.f32 %v7150_v28, %v7430_v36 }
 0x9cf   : > { %v3213_v58 = vmul.f32 %v7189_v15, %v7050_v42  ;;  %v3898_v4 = vmul.f32 %v7160_v16, %v7101_v40 }
 0x9d0   : > { %5661 = vrot.lane.b32.xlu1 %v5660_v30, %s8538_s3  ;;  %5636 = vrot.lane.b32.xlu0 %v5645_v20, %s8536_s27  ;;  %v3893_v30 = vmul.f32 %v7163_v6, %v7105_v44  ;;  %v7484_v20 = vmul.f32 %v7194_v19, %v7400_v33  ;;  %v7516_v6 = vmul.f32 %v7194_v19, %v7436_v48 }
 0x9d1   : > { %v5690_v63 = vpack.i.bf16 %v3214_v23, %v3213_v58  ;;  %v3209_v23 = vmul.f32 %v7147_v10, %v7085_v37  ;;  %v3895_v37 = vmul.f32 %v7160_v16, %v7329_v57 }
 0x9d2   : > { %8581 = vst [vmem:[#allocation45_spill] sm:$0xff] %v7484_v20  ;;  %v3226_v20 = vmul.f32 %v7144_v27, %v7101_v40  ;;  %v3212_v40 = vmul.f32 %v7147_v10, %v7083_v47  ;;  %v3894_v47 = vmul.f32 %v7207_v24, %v7079_v55 }
 0x9d4   : > { %5656 = vrot.lane.b32.xlu0 %v5655_v0, %s8538_s3  ;;  %5676 = vrot.lane.b32.xlu1 %v5675_v61, %s8539_s11  ;;  %v5685_v0 = vpack.i.bf16 %v3896_v32, %v3893_v30  ;;  %v7512_v61 = vmul.f32 %v7150_v28, %v7490_v2  ;;  %v3885_v30 = vmul.f32 %v7207_v24, %v7050_v42 }
 0x9d5   : > { %v3225_v42 = vmul.f32 %v7189_v15, %v7056_v60  ;;  %v5725_v58 = vpack.i.bf16 %v3895_v37, %v3894_v47  ;;  %v3892_v37 = vmul.f32 %v7160_v16, %v7392_v62 }
 0x9d6   : > { %v6010_v32 = vpack.i.bf16 %v7512_v61, %v7508_v54  ;;  %v5670_v48 = vpack.i.bf16 %v3886_v17, %v3885_v30  ;;  %v3883_v17 = vmul.f32 %v7160_v16, %v7278_v13  ;;  %v3707_v30 = vmul.f32 %v7128_v14, %v7278_v13 }
 0x9d7   : > { %v8641_v54 = vpack.i.bf16 %v7520_v25, %v7516_v6 }
 0x9d8   : > { %5666 = vrot.lane.b32.xlu0 %v5665_v21, %s8538_s3  ;;  %5686 = vrot.lane.b32.xlu1 %v5685_v0, %s8539_s11  ;;  %v3897_v21 = vmul.f32 %v7207_v24, %v7056_v60  ;;  %v5700_v0 = vpack.i.bf16 %v3226_v20, %v3225_v42  ;;  %v3224_v20 = vmul.f32 %v7147_v10, %v7107_v49 }
 0x9d9   : > { %v3719_v49 = vmul.f32 %v7128_v14, %v7329_v57 }
 0x9da   : > { %v5680_v56 = vpack.i.bf16 %v3898_v4, %v3897_v21  ;;  %v3221_v4 = vmul.f32 %v7147_v10, %v7105_v44  ;;  %v3706_v44 = vmul.f32 %v7173_v18, %v7064_v8  ;;  %v5750_v21 = vpack.i.bf16 %v7176_v12, %v7200_v38 }
 0x9db   : > { %v3718_v10 = vmul.f32 %v7173_v18, %v7079_v55  ;;  %v3210_v12 = vmul.f32 %v7189_v15, %v7064_v8  ;;  %v3223_v18 = vmul.f32 %v7144_v27, %v7329_v57 }
 0x9dc   : > { %5691 = vrot.lane.b32.xlu1 %v5690_v63, %s8584_s0  ;;  %5671 = vrot.lane.b32.xlu0 %v5670_v48, %s8539_s11  ;;  %v3882_v48 = vmul.f32 %v7207_v24, %v7064_v8  ;;  %v5695_v63 = vpack.i.bf16 %v3212_v40, %v3209_v23  ;;  %v5710_v42 = vpack.i.bf16 %v3707_v30, %v3706_v44 }
 0x9dd   : > { %v5715_v24 = vpack.i.bf16 %v3719_v49, %v3718_v10  ;;  %v3211_v23 = vmul.f32 %v7144_v27, %v7278_v13  ;;  %v5775_v40 = vpack.i.bf16 %v7490_v2, %v7111_v50  ;;  %v5810_v50 = vpack.i.bf16 %v7430_v36, %v7167_v45  ;;  %v8590_v49 = vld [vmem:[#allocation16_spill] sm:$0xff] }
 0x9de   : > { %v5720_v60 = vpack.i.bf16 %v3883_v17, %v3882_v48  ;;  %v5765_v17 = vpack.i.bf16 %v7392_v62, %v7089_v31  ;;  %v3387_v48 = vmul.f32 %v7150_v28, %v7278_v13  ;;  %v3386_v31 = vmul.f32 %v7194_v19, %v7064_v8 }
 0x9df   : > { %v5730_v38 = vpack.i.bf16 %v3211_v23, %v3210_v12  ;;  %v8585_v8 = vpack.i.bf16 %v7227_v3, %v7223_v59  ;;  %v8587_v13 = vpack.i.bf16 %v7241_v53, %v7237_v39  ;;  %v3904_v30 = vmul.f32 %v7160_v16, %v7490_v2 }
 0x9e0   : > { %5701 = vrot.lane.b32.xlu1 %v5700_v0, %s8584_s0  ;;  %5681 = vrot.lane.b32.xlu0 %v5680_v56, %s8539_s11  ;;  %v5705_v56 = vpack.i.bf16 %v3224_v20, %v3221_v4  ;;  %v5760_v0 = vpack.i.bf16 %v7233_v26, %v7258_v5  ;;  %v3222_v26 = vmul.f32 %v7189_v15, %v7079_v55 }
 0x9e1   : > { %v5805_v55 = vpack.i.bf16 %v7404_v51, %v7135_v22  ;;  %v8586_v22 = vpack.i.bf16 %v7276_v1, %v7272_v9  ;;  %v3716_v15 = vmul.f32 %v7128_v14, %v7392_v62  ;;  %v3728_v9 = vmul.f32 %v7128_v14, %v7490_v2 }
 0x9e2   : > { %v5735_v5 = vpack.i.bf16 %v3223_v18, %v3222_v26  ;;  %v3220_v1 = vmul.f32 %v7144_v27, %v7392_v62  ;;  %v3232_v20 = vmul.f32 %v7144_v27, %v7490_v2  ;;  %v8589_v27 = vld [vmem:[#allocation15_spill] sm:$0xff]  ;;  %v3713_v44 = vmul.f32 %v7128_v14, %v7404_v51  ;;  %v4173_v26 = vld [vmem:[#allocation3 + $0x20] sm:$0xff] }
 0x9e3   : > { %v5835_v3 = vpack.i.bf16 %v3716_v15, %v7180_v35  ;;  %v5845_v53 = vpack.i.bf16 %v3728_v9, %v7198_v46  ;;  %v5865_v10 = vpack.i.bf16 %v3904_v30, %v8590_v49  ;;  %v3725_v18 = vmul.f32 %v7128_v14, %v7430_v36  ;;  %v8598_v15 = vld [vmem:[#allocation27_spill] sm:$0xff]  ;;  %v8599_v14 = vld [vmem:[#allocation14_spill] sm:$0xff] }
 0x9e4   : > { %5696 = vrot.lane.b32.xlu0 %v5695_v63, %s8584_s0  ;;  %5721 = vrot.lane.b32.xlu1 %v5720_v60, %s8539_s11  ;;  %v5740_v63 = vpack.i.bf16 %v3387_v48, %v3386_v31  ;;  %v8588_v60 = vpack.i.bf16 %v7288_v52, %v7284_v29  ;;  %v5875_v35 = vpack.i.bf16 %v3220_v1, %v7211_v11  ;;  %v8592_v48 = vld [vmem:[#allocation20_spill] sm:$0xff]  ;;  %v8593_v31 = vld [vmem:[#allocation19_spill] sm:$0xff]  ;;  %v8602_v49 = vld [vmem:[#allocation22_spill] sm:$0xff] }
 0x9e5   : > { %v5855_v52 = vpack.i.bf16 %v3892_v37, %v7254_v34  ;;  %v3889_v9 = vmul.f32 %v7160_v16, %v7404_v51  ;;  %v8600_v37 = vld [vmem:[#allocation24_spill] sm:$0xff] }
 0x9e8   : > { %5706 = vrot.lane.b32.xlu0 %v5705_v56, %s8584_s0  ;;  %5726 = vrot.lane.b32.xlu1 %v5725_v58, %s8539_s11  ;;  %v5885_v58 = vpack.i.bf16 %v3232_v20, %v8589_v27  ;;  %v5910_v20 = vpack.i.bf16 %v3725_v18, %v8600_v37  ;;  %v8606_v18 = vld [vmem:[#allocation17_spill] sm:$0xff] }
 0x9ec   : > { %5711 = vrot.lane.b32.xlu0 %v5710_v42, %s8538_s3  ;;  %5751 = vrot.lane.b32.xlu1 %v5750_v21, %s8546_s4 }
 0x9f0   : > { %5716 = vrot.lane.b32.xlu0 %v5715_v24, %s8538_s3  ;;  %5761 = vrot.lane.b32.xlu1 %v5760_v0, %s8546_s4  ;;  %v8591_v24 = vld [vmem:[#allocation18_spill] sm:$0xff] }
 0x9f1   : > { %v5895_v34 = vpack.i.bf16 %v3713_v44, %v8591_v24  ;;  %v8601_v44 = vld [vmem:[#allocation23_spill] sm:$0xff] }
 0x9f4   : > { %5731 = vrot.lane.b32.xlu0 %v5730_v38, %s8584_s0  ;;  %5766 = vrot.lane.b32.xlu1 %v5765_v17, %s8536_s27 }
 0x9f8   : > { %5736 = vrot.lane.b32.xlu0 %v5735_v5, %s8584_s0  ;;  %5776 = vrot.lane.b32.xlu1 %v5775_v40, %s8536_s27 }
 0x9fc   : > { %5741 = vrot.lane.b32.xlu0 %v5740_v63, %s8537_s24  ;;  %5791 = vrot.lane.b32.xlu1 %v5750_v21, %s8550_s5  ;;  %v8594_v63 = vpack.i.bf16 %v8592_v48, %v8593_v31 }
 0xa00   : > { %5746 = vrot.lane.b32.xlu0 %v5765_v17, %s8546_s4  ;;  %5801 = vrot.lane.b32.xlu1 %v5760_v0, %s8550_s5 }
 0xa04   : > { %5756 = vrot.lane.b32.xlu0 %v5775_v40, %s8546_s4  ;;  %5806 = vrot.lane.b32.xlu1 %v5805_v55, %s8546_s4 }
 0xa08   : > { %5771 = vrot.lane.b32.xlu0 %v5750_v21, %s8536_s27  ;;  %5811 = vrot.lane.b32.xlu1 %v5810_v50, %s8546_s4 }
 0xa0c   : > { %5781 = vrot.lane.b32.xlu0 %v5760_v0, %s8536_s27  ;;  %5826 = vrot.lane.b32.xlu1 %v5805_v55, %s8550_s5 }
 0xa10   : > { %5786 = vrot.lane.b32.xlu0 %v5765_v17, %s8550_s5  ;;  %5831 = vrot.lane.b32.xlu1 %v5810_v50, %s8550_s5 }
 0xa14   : > { %5796 = vrot.lane.b32.xlu0 %v5775_v40, %s8550_s5  ;;  %5841 = vrot.lane.b32.xlu1 %v8585_v8, %s8538_s3 }
 0xa17   : > { %v7626_v45 = vpop.permute.xlu1 %5561 }
 0xa18   : > { %5816 = vrot.lane.b32.xlu0 %v5805_v55, %s8536_s27  ;;  %5851 = vrot.lane.b32.xlu1 %v8586_v22, %s8538_s3  ;;  %v8595_v55 = vld [vmem:[#allocation21_spill] sm:$0xff]  ;;  %v5564_v1 = vunpack.i.h.bf16 %v7626_v45 }
 0xa1c   : > { %5821 = vrot.lane.b32.xlu0 %v5810_v50, %s8536_s27  ;;  %5861 = vrot.lane.b32.xlu1 %v8587_v13, %s8539_s11  ;;  %v8596_v50 = vld [vmem:[#allocation13_spill] sm:$0xff]  ;;  %v4205_v13 = vmul.f32 %v8598_v15, %v4173_v26  ;;  %s8610_s27 = smov 94  }
 0xa1d   : > { %v8597_v8 = vpack.i.bf16 %v8595_v55, %v8596_v50 }
 0xa1e   : > { %v7635_v59 = vpop.permute.xlu1 %5566 }
 0xa1f   : > { %v5569_v30 = vunpack.i.h.bf16 %v7635_v59 }
 0xa20   : > { %5836 = vrot.lane.b32.xlu0 %v5835_v3, %s8538_s3  ;;  %5871 = vrot.lane.b32.xlu1 %v8588_v60, %s8539_s11  ;;  %v4206_v3 = vmul.f32 %v8599_v14, %v7060_v7  ;;  %v5563_v60 = vunpack.i.l.bf16 %v7626_v45 }
 0xa22   : > { %v7647_v4 = vpop.permute.xlu1 %5571  ;;  %v7649_v39 = vpop.permute.xlu0 %5576  ;;  %v5920_v24 = vpack.i.bf16 %v4206_v3, %v4205_v13 }
 0xa23   : > { %v8505_v47 = vunpack.i.l.bf16 %v7647_v4  ;;  %v5579_v56 = vunpack.i.h.bf16 %v7649_v39  ;;  %v5578_v13 = vunpack.i.l.bf16 %v7649_v39 }
 0xa24   : > { %5846 = vrot.lane.b32.xlu0 %v5845_v53, %s8538_s3  ;;  %5876 = vrot.lane.b32.xlu1 %v5875_v35, %s8584_s0 }
 0xa25   : > { %v7664_v46 = vsel %vm1570_vm8, %v5579_v56, %v8505_v47  ;;  %v4169_v56 = vld [vmem:[#allocation3] sm:$0xff] }
 0xa26   : > { %v7666_v11 = vpop.permute.xlu1 %5581  ;;  %v7668_v29 = vpop.permute.xlu0 %5586  ;;  %v4201_v26 = vmul.f32 %v8606_v18, %v4169_v56  ;;  %v8608_v56 = vld [vmem:[#allocation25_spill] sm:$0xff] }
 0xa28   : > { %5856 = vrot.lane.b32.xlu0 %v5855_v52, %s8539_s11  ;;  %5886 = vrot.lane.b32.xlu1 %v5885_v58, %s8584_s0  ;;  %v4172_v58 = vld [vmem:[#allocation3 + $0x18] sm:$0xff] }
 0xa29   : > { %v4204_v55 = vmul.f32 %v8606_v18, %v4172_v58 }
 0xa2a   : > { %v7678_v42 = vpop.permute.xlu1 %5591  ;;  %v7680_v21 = vpop.permute.xlu0 %5596 }
 0xa2b   : > { %v5593_v0 = vunpack.i.l.bf16 %v7678_v42  ;;  %v5599_v23 = vunpack.i.h.bf16 %v7680_v21 }
 0xa2c   : > { %5866 = vrot.lane.b32.xlu0 %v5865_v10, %s8539_s11  ;;  %5896 = vrot.lane.b32.xlu1 %v5895_v34, %s8538_s3  ;;  %v8603_v10 = vpack.i.bf16 %v8601_v44, %v8602_v49  ;;  %v8605_v34 = vld [vmem:[#allocation30_spill] sm:$0xff]  ;;  %v8612_v44 = vld [vmem:[#allocation28_spill] sm:$0xff] }
 0xa2d   : > { %v7691_v12 = vsel %vm1491_vm4, %v5599_v23, %v5593_v0  ;;  %v5925_v23 = vpack.i.bf16 %v3889_v9, %v8605_v34  ;;  %v8607_v9 = vld [vmem:[#allocation26_spill] sm:$0xff] }
 0xa2e   : > { %v5607_v38 = vpop.permute.xlu1 %5606  ;;  %v5602_v17 = vpop.permute.xlu0 %5601 }
 0xa2f   : > { %v5609_v5 = vunpack.i.h.bf16 %v5607_v38  ;;  %v5603_v40 = vunpack.i.l.bf16 %v5602_v17  ;;  %v5604_v7 = vunpack.i.h.bf16 %v5602_v17  ;;  %v5608_v48 = vunpack.i.l.bf16 %v5607_v38  ;;  %v8611_v38 = vld [vmem:[#allocation29_spill] sm:$0xff] }
 0xa30   : > { %5881 = vrot.lane.b32.xlu0 %v8594_v63, %s8584_s0  ;;  %5901 = vrot.lane.b32.xlu1 %v8597_v8, %s8537_s24  ;;  %v3628_v63 = vsel %vm1570_vm8, %v5563_v60, %v5564_v1  ;;  %v8613_v1 = vpack.i.bf16 %v8611_v38, %v8612_v44  ;;  %v5930_v38 = vpack.i.bf16 %v4204_v55, %v4201_v26  ;;  %v5594_v55 = vunpack.i.h.bf16 %v7678_v42  ;;  %v3369_v42 = vld [vmem:[#allocation3 + $0x80] sm:$0xff] }
 0xa31   : > { %v7704_v22 = vsel %vm1632_vm11, %v5609_v5, %v5603_v40  ;;  %v5568_v5 = vunpack.i.l.bf16 %v7635_v59  ;;  %v8609_v59 = vpack.i.bf16 %v8607_v9, %v8608_v56  ;;  %v7742_v58 = vsel %vm1632_vm11, %v5603_v40, %v5604_v7  ;;  %v8633_v40 = vld [vmem:[#allocation33_spill] sm:$0xff] }
 0xa32   : > { %v5617_v53 = vpop.permute.xlu1 %5616  ;;  %v7713_v35 = vpop.permute.xlu0 %5611  ;;  %v5584_v9 = vunpack.i.h.bf16 %v7666_v11 }
 0xa33   : > { %v5619_v52 = vunpack.i.h.bf16 %v5617_v53  ;;  %v5613_v27 = vunpack.i.l.bf16 %v7713_v35  ;;  %v5618_v3 = vunpack.i.l.bf16 %v5617_v53  ;;  %v5614_v7 = vunpack.i.h.bf16 %v7713_v35 }
 0xa34   : > { %5891 = vrot.lane.b32.xlu0 %v8603_v10, %s8584_s0  ;;  %5911 = vrot.lane.b32.xlu1 %v5910_v20, %s8538_s3 }
 0xa35   : > { %v7724_v45 = vsel %vm1632_vm11, %v5619_v52, %v5613_v27  ;;  %v3627_v52 = vsel %vm1570_vm8, %v5569_v30, %v5563_v60 }
 0xa36   : > { %8604 = vst [vmem:[#allocation15_spill] sm:$0xff] %v7724_v45  ;;  %v5642_v31 = vpop.permute.xlu1 %5641  ;;  %v5622_v17 = vpop.permute.xlu0 %5621 }
 0xa37   : > { %v5644_v50 = vunpack.i.h.bf16 %v5642_v31  ;;  %v5643_v8 = vunpack.i.l.bf16 %v5642_v31  ;;  %v5624_v37 = vunpack.i.h.bf16 %v5622_v17  ;;  %v5623_v20 = vunpack.i.l.bf16 %v5622_v17 }
 0xa38   : > { %5906 = vrot.lane.b32.xlu0 %v8609_v59, %s8537_s24  ;;  %5916 = vrot.lane.b32.xlu1 %v8613_v1, %s8610_s27 }
 0xa39   : > { %v7745_v49 = vsel %vm1632_vm11, %v5608_v48, %v5643_v8  ;;  %v3625_v60 = vsel %vm1570_vm8, %v5568_v5, %v5623_v20  ;;  %v3626_v39 = vsel %vm1570_vm8, %v5623_v20, %v5624_v37  ;;  %v7750_v53 = vsel %vm1632_vm11, %v5643_v8, %v5644_v50  ;;  %v8614_v20 = vld [vmem:[#allocation34_spill] sm:$0xff] }
 0xa3a   : > { %v5371_v10 = vpack.c.bf16 %v3627_v52, %v3625_v60  ;;  %v5647_v34 = vpop.permute.xlu1 %5646  ;;  %v7754_v31 = vpop.permute.xlu0 %5626  ;;  %v5369_v17 = vpack.c.bf16 %v3628_v63, %v3626_v39  ;;  %v5583_v50 = vunpack.i.l.bf16 %v7666_v11  ;;  %v5589_v8 = vunpack.i.h.bf16 %v7668_v29  ;;  %v8616_v39 = vld [vmem:[#allocation32_spill] sm:$0xff] }
 0xa3b   : > { %v5649_v48 = vunpack.i.h.bf16 %v5647_v34  ;;  %v5648_v5 = vunpack.i.l.bf16 %v5647_v34  ;;  %v5628_v37 = vunpack.i.l.bf16 %v7754_v31  ;;  %v4211_v52 = vmul.f32 %v8598_v15, %v8614_v20 }
 0xa3c   : > { %5370 = vmatprep.subr.bf16.mxu0 %v5369_v17  ;;  %5921 = vrot.lane.b32.xlu0 %v5920_v24, %s8610_s27  ;;  %v4212_v63 = vmul.f32 %v8599_v14, %v7392_v62  ;;  %v3901_v24 = vmul.f32 %v7160_v16, %v7430_v36  ;;  %v7790_v60 = vsel %vm1632_vm11, %v5613_v27, %v5614_v7  ;;  %v8635_v62 = vld [vmem:[#allocation47_spill] sm:$0xff] }
 0xa3d   : > { %v7769_v35 = vsel %vm1632_vm11, %v5618_v3, %v5648_v5  ;;  %v7774_v56 = vsel %vm1570_vm8, %v5578_v13, %v5628_v37  ;;  %5926 = vrot.lane.b32.xlu1 %v5925_v23, %s8539_s11  ;;  %5372 = vmatpush1.bf16.msra.mxu0 %v5371_v10  ;;  %v7786_v44 = vsel %vm1632_vm11, %v5648_v5, %v5649_v48  ;;  %v5588_v13 = vunpack.i.l.bf16 %v7668_v29  ;;  %v8617_v10 = vld [vmem:[#allocation31_spill] sm:$0xff] }
 0xa3e   : > { %8615 = vst [vmem:[#allocation16_spill] sm:$0xff] %v7769_v35  ;;  %v7783_v11 = vpop.permute.xlu1 %5651  ;;  %v5632_v3 = vpop.permute.xlu0 %5631  ;;  %v3131_v16 = vsel %vm1491_vm4, %v5589_v8, %v5583_v50  ;;  %v8618_v34 = vpack.i.bf16 %v8616_v39, %v8617_v10  ;;  %v3132_v27 = vsel %vm1491_vm4, %v5583_v50, %v5584_v9  ;;  %v5950_v20 = vpack.i.bf16 %v4212_v63, %v4211_v52 }
 0xa3f   : > { %v5634_v23 = vunpack.i.h.bf16 %v5632_v3  ;;  %v5633_v1 = vunpack.i.l.bf16 %v5632_v3  ;;  %v5598_v3 = vunpack.i.l.bf16 %v7680_v21  ;;  %v7819_v21 = vsel %vm1491_vm4, %v5593_v0, %v5594_v55  ;;  %v8623_v0 = vld [vmem:[#allocation39_spill] sm:$0xff]  ;;  %v8624_v55 = vld [vmem:[#allocation38_spill] sm:$0xff] }
 0xa40   : > { %5946 = vrot.lane.b32.xlu0 %v8618_v34, %s8537_s24  ;;  %v8619_v34 = vld [vmem:[#allocation35_spill] sm:$0xff] }
 0xa41   : > { %v3129_v17 = vsel %vm1491_vm4, %v5588_v13, %v5633_v1  ;;  %5931 = vrot.lane.b32.xlu1 %v5930_v38, %s8610_s27  ;;  %v3130_v29 = vsel %vm1491_vm4, %v5633_v1, %v5634_v23  ;;  %v5935_v59 = vpack.i.bf16 %v3901_v24, %v8619_v34  ;;  %v8620_v13 = vld [vmem:[#allocation37_spill] sm:$0xff]  ;;  %v8621_v23 = vld [vmem:[#allocation36_spill] sm:$0xff]  ;;  %v8627_v34 = vld [vmem:[#allocation42_spill] sm:$0xff] }
 0xa42   : > { %v5323_v7 = vpack.c.bf16 %v3131_v16, %v3129_v17  ;;  %v7804_v48 = vpop.permute.xlu1 %5661  ;;  %v5637_v5 = vpop.permute.xlu0 %5636  ;;  %v5321_v8 = vpack.c.bf16 %v3132_v27, %v3130_v29  ;;  %v8622_v1 = vpack.i.bf16 %v8620_v13, %v8621_v23  ;;  %v3370_v16 = vld [vmem:[#allocation3 + $0x88] sm:$0xff]  ;;  %v8625_v17 = vpack.i.bf16 %v8623_v0, %v8624_v55  ;;  %v3368_v29 = vld [vmem:[#allocation3 + $0x78] sm:$0xff]  ;;  %v8628_v13 = vld [vmem:[#allocation40_spill] sm:$0xff] }
 0xa43   : > { %v5639_v39 = vunpack.i.h.bf16 %v5637_v5  ;;  %v5638_v10 = vunpack.i.l.bf16 %v5637_v5  ;;  %v8626_v5 = vld [vmem:[#allocation12_spill] sm:$0xff]  ;;  %v8629_v23 = vpack.i.bf16 %v8627_v34, %v8628_v13  ;;  %v4214_v34 = vmul.f32 %v8598_v15, %v8633_v40 }
 0xa44   : > { %5322 = vmatprep.subr.bf16.mxu1 %v5321_v8  ;;  %5951 = vrot.lane.b32.xlu0 %v5950_v20, %s8610_s27  ;;  %v8501_v20 = vunpack.i.l.bf16 %v7804_v48  ;;  %v8630_v55 = vld [vmem:[#allocation44_spill] sm:$0xff]  ;;  %v4218_v40 = vmul.f32 %v8599_v14, %v3370_v16 }
 0xa45   : > { %v7810_v38 = vsel %vm1491_vm4, %v5598_v3, %v5638_v10  ;;  %5936 = vrot.lane.b32.xlu1 %v5935_v59, %s8539_s11  ;;  %5324 = vmatpush1.bf16.msra.mxu1 %v5323_v7  ;;  %v7814_v50 = vsel %vm1491_vm4, %v5638_v10, %v5639_v39  ;;  %v3365_v59 = vld [vmem:[#allocation3 + $0x60] sm:$0xff]  ;;  %v3401_v39 = vmul.f32 %v7194_v19, %v3369_v42 }
 0xa46   : > { %v7823_v63 = vpop.permute.xlu0 %5656  ;;  %v7825_v9 = vpop.permute.xlu1 %5676  ;;  %v3397_v8 = vmul.f32 %v8626_v5, %v3365_v59  ;;  %v3402_v10 = vmul.f32 %v7150_v28, %v3370_v16 }
 0xa47   : > { %v5679_v13 = vunpack.i.h.bf16 %v7825_v9 }
 0xa48   : > { %5961 = vrot.lane.b32.xlu0 %v8622_v1, %s8537_s24  ;;  %v3400_v1 = vmul.f32 %v8626_v5, %v3368_v29  ;;  %v5965_v52 = vpack.i.bf16 %v3402_v10, %v3401_v39 }
 0xa49   : > { %5941 = vrot.lane.b32.xlu1 %v8625_v17, %s8537_s24  ;;  %v8631_v17 = vld [vmem:[#allocation43_spill] sm:$0xff] }
 0xa4a   : > { %v7837_v27 = vpop.permute.xlu0 %5666  ;;  %v7839_v7 = vpop.permute.xlu1 %5686  ;;  %v8632_v26 = vpack.i.bf16 %v8630_v55, %v8631_v17  ;;  %v5975_v30 = vpack.i.bf16 %v3400_v1, %v3397_v8  ;;  %v4217_v1 = vmul.f32 %v8598_v15, %v3369_v42  ;;  %v4213_v55 = vmul.f32 %v8606_v18, %v3365_v59 }
 0xa4b   : > { %v5669_v3 = vunpack.i.h.bf16 %v7837_v27  ;;  %v5689_v39 = vunpack.i.h.bf16 %v7839_v7  ;;  %v4216_v42 = vmul.f32 %v8606_v18, %v3368_v29  ;;  %v4208_v59 = vmul.f32 %v8598_v15, %v7400_v33 }
 0xa4c   : > { %5971 = vrot.lane.b32.xlu0 %v8629_v23, %s8584_s0  ;;  %v5990_v24 = vpack.i.bf16 %v4218_v40, %v4217_v1  ;;  %v3374_v40 = vld [vmem:[#allocation3 + $0xa8] sm:$0xff] }
 0xa4d   : > { %v7854_v0 = vsel %vm1592_vm9, %v5669_v3, %v8501_v20  ;;  %5956 = vrot.lane.b32.xlu1 %v8632_v26, %s8610_s27  ;;  %v4215_v3 = vmul.f32 %v8599_v14, %v7329_v57 }
 0xa4e   : > { %v7860_v19 = vpop.permute.xlu1 %5691  ;;  %v5672_v28 = vpop.permute.xlu0 %5671 }
 0xa4f   : > { %v5673_v23 = vunpack.i.l.bf16 %v5672_v28  ;;  %v5980_v57 = vpack.i.bf16 %v4215_v3, %v4214_v34  ;;  %v5674_v17 = vunpack.i.h.bf16 %v5672_v28  ;;  %v3371_v34 = vld [vmem:[#allocation3 + $0x90] sm:$0xff]  ;;  %v8502_v29 = vunpack.i.l.bf16 %v7860_v19 }
 0xa50   : > { %5976 = vrot.lane.b32.xlu0 %v5975_v30, %s8537_s24  ;;  %v4348_v30 = vld [vmem:[%s8428_s18 + $0x18] sm:$0xff]  ;;  %v3403_v33 = vmul.f32 %v8626_v5, %v3371_v34 }
 0xa51   : > { %v7869_v20 = vsel %vm1615_vm10, %v5679_v13, %v5673_v23  ;;  %5966 = vrot.lane.b32.xlu1 %v5965_v52, %s8537_s24  ;;  %v8634_v52 = vpack.i.bf16 %v7466_v41, %v7462_v43  ;;  %4659 = vmatprep.mubr.f32.mxu0 %v4348_v30  ;;  %v5678_v13 = vunpack.i.l.bf16 %v7825_v9  ;;  %v5995_v43 = vpack.i.bf16 %v4216_v42, %v4213_v55 }
 0xa52   : > { %v7872_v26 = vpop.permute.xlu1 %5701  ;;  %v5682_v8 = vpop.permute.xlu0 %5681  ;;  %v4209_v41 = vmul.f32 %v8599_v14, %v7404_v51  ;;  %v7902_v9 = vsel %vm1615_vm10, %v5673_v23, %v5674_v17 }
 0xa53   : > { %v5683_v10 = vunpack.i.l.bf16 %v5682_v8 }
 0xa54   : > { %5986 = vrot.lane.b32.xlu0 %v8634_v52, %s8584_s0  ;;  %v5684_v52 = vunpack.i.h.bf16 %v5682_v8  ;;  %v6005_v42 = vpack.i.bf16 %v4209_v41, %v4208_v59 }
 0xa55   : > { %v7887_v16 = vsel %vm1615_vm10, %v5689_v39, %v5683_v10  ;;  %5981 = vrot.lane.b32.xlu1 %v5980_v57, %s8610_s27 }
 0xa56   : > { %v7893_v28 = vpop.permute.xlu0 %5696  ;;  %v5722_v3 = vpop.permute.xlu1 %5721 }
 0xa57   : > { %v5699_v39 = vunpack.i.h.bf16 %v7893_v28  ;;  %v5724_v30 = vunpack.i.h.bf16 %v5722_v3  ;;  %v5723_v57 = vunpack.i.l.bf16 %v5722_v3  ;;  %v5698_v6 = vunpack.i.l.bf16 %v7893_v28 }
 0xa58   : > { %5991 = vrot.lane.b32.xlu0 %v5990_v24, %s8610_s27  ;;  %v5688_v24 = vunpack.i.l.bf16 %v7839_v7  ;;  %v3406_v7 = vmul.f32 %v8626_v5, %v3374_v40 }
 0xa59   : > { %v7907_v1 = vsel %vm1529_vm5, %v5699_v39, %v8502_v29  ;;  %v7910_v51 = vsel %vm1615_vm10, %v5678_v13, %v5723_v57  ;;  %5996 = vrot.lane.b32.xlu1 %v5995_v43, %s8610_s27  ;;  %v7914_v55 = vsel %vm1615_vm10, %v5723_v57, %v5724_v30  ;;  %v5703_v13 = vunpack.i.l.bf16 %v7872_v26  ;;  %v8636_v30 = vld [vmem:[#allocation45_spill] sm:$0xff] }
 0xa5a   : > { %v5707_v8 = vpop.permute.xlu0 %5706  ;;  %v5727_v17 = vpop.permute.xlu1 %5726  ;;  %v8637_v57 = vpack.i.bf16 %v8635_v62, %v8636_v30  ;;  %v4219_v62 = vmul.f32 %v8606_v18, %v3371_v34 }
 0xa5b   : > { %v5709_v39 = vunpack.i.h.bf16 %v5707_v8  ;;  %v5729_v29 = vunpack.i.h.bf16 %v5727_v17  ;;  %v5728_v43 = vunpack.i.l.bf16 %v5727_v17  ;;  %v7938_v17 = vsel %vm1615_vm10, %v5683_v10, %v5684_v52  ;;  %v4346_v10 = vld [vmem:[%s8428_s18 + $0x8] sm:$0xff] }
 0xa5c   : > { %6001 = vrot.lane.b32.xlu0 %v8637_v57, %s8537_s24  ;;  %v8639_v57 = vld [vmem:[#allocation41_spill] sm:$0xff]  ;;  %4582 = vmatprep.mubr.f32.mxu1 %v4346_v10 }
 0xa5d   : > { %v7928_v23 = vsel %vm1529_vm5, %v5709_v39, %v5703_v13  ;;  %v7931_v59 = vsel %vm1615_vm10, %v5688_v24, %v5728_v43  ;;  %6006 = vrot.lane.b32.xlu1 %v6005_v42, %s8610_s27  ;;  %v7935_v41 = vsel %vm1615_vm10, %v5728_v43, %v5729_v29  ;;  %v6015_v39 = vpack.i.bf16 %v3406_v7, %v3403_v33  ;;  %v8640_v43 = vld [vmem:[#allocation46_spill] sm:$0xff] }
 0xa5e   : > { %8638 = vst [vmem:[#allocation18_spill] sm:$0xff] %v7928_v23  ;;  %v7942_v30 = vpop.permute.xlu0 %5711  ;;  %v7944_v5 = vpop.permute.xlu1 %5751  ;;  %v4220_v42 = vmul.f32 %v8598_v15, %v8639_v57  ;;  %v4221_v29 = vmul.f32 %v8599_v14, %v7430_v36  ;;  %v4223_v7 = vmul.f32 %v8598_v15, %v8640_v43  ;;  %v4224_v36 = vmul.f32 %v8599_v14, %v7490_v2 }
 0xa5f   : > { %v5668_v57 = vunpack.i.l.bf16 %v7837_v27  ;;  %v4222_v2 = vmul.f32 %v8606_v18, %v3374_v40  ;;  %v4499_v40 = vld [vmem:[%s8429_s19] sm:$0xff]  ;;  %v5708_v43 = vunpack.i.l.bf16 %v5707_v8  ;;  %v5754_v24 = vunpack.i.h.bf16 %v7944_v5 }
 0xa60   : > { %6016 = vrot.lane.b32.xlu0 %v6015_v39, %s8537_s24  ;;  %v6030_v10 = vpack.i.bf16 %v4221_v29, %v4220_v42  ;;  %v6025_v27 = vpack.i.bf16 %v4224_v36, %v4223_v7  ;;  %v5704_v42 = vunpack.i.h.bf16 %v7872_v26  ;;  %v4500_v26 = vld [vmem:[%s8429_s19 + $0x8] sm:$0xff]  ;;  %v5753_v3 = vunpack.i.l.bf16 %v7944_v5 }
 0xa61   : > { %6011 = vrot.lane.b32.xlu1 %v6010_v32, %s8537_s24  ;;  %v6035_v34 = vpack.i.bf16 %v4222_v2, %v4219_v62  ;;  %v8643_v5 = vunpack.i.l.bf16 %v7647_v4 }
 0xa62   : > { %v7960_v33 = vpop.permute.xlu0 %5716  ;;  %v7962_v52 = vpop.permute.xlu1 %5761  ;;  %v8018_v2 = vsel %vm1529_vm5, %v5703_v13, %v5704_v42  ;;  %v5629_v13 = vunpack.i.h.bf16 %v7754_v31 }
 0xa63   : > { %v8503_v39 = vunpack.i.l.bf16 %v7960_v33 }
 0xa64   : > { %6021 = vrot.lane.b32.xlu0 %v8641_v54, %s8537_s24  ;;  %s8668_s24 = sshll.u32 %s8671_s28, 5 }
 0xa65   : > { %v7978_v61 = vsel %vm1592_vm9, %v5668_v57, %v8503_v39  ;;  %6031 = vrot.lane.b32.xlu1 %v6030_v10, %s8610_s27  ;;  %v4755_v10 = vld [vmem:[%s8431_s21] sm:$0xff]  ;;  %s730_s29 = scalar_lea.vmem %s8432_s22, %s8668_s24 }
 0xa66   : > { %v7984_v15 = vpop.permute.xlu0 %5731  ;;  %v7986_v14 = vpop.permute.xlu1 %5766 }
 0xa67   : > { %v8504_v25 = vunpack.i.l.bf16 %v7984_v15 }
 0xa68   : > { %6026 = vrot.lane.b32.xlu0 %v6025_v27, %s8610_s27 }
 0xa69   : > { %v7995_v18 = vsel %vm1529_vm5, %v5698_v6, %v8504_v25  ;;  %6036 = vrot.lane.b32.xlu1 %v6035_v34, %s8610_s27  ;;  %v4756_v34 = vld [vmem:[%s8431_s21 + $0x8] sm:$0xff] }
 0xa6a   : > { %v5737_v29 = vpop.permute.xlu0 %5736  ;;  %v8003_v62 = vpop.permute.xlu1 %5776 }
 0xa6b   : > { %v5739_v7 = vunpack.i.h.bf16 %v5737_v29  ;;  %v5738_v36 = vunpack.i.l.bf16 %v5737_v29 }
 0xa6c   : > { %4503 = vperm.xlu0 %5533, %v4499_v40  }
 0xa6d   : > { %v8009_v57 = vsel %vm1529_vm5, %v5708_v43, %v5738_v36  ;;  %4508 = vperm.xlu1 %5534, %v4500_v26   ;;  %v8015_v54 = vsel %vm1529_vm5, %v5738_v36, %v5739_v7  ;;  %v5574_v7 = vunpack.i.h.bf16 %v7647_v4 }
 0xa6e   : > { %8642 = vst [vmem:[#allocation20_spill] sm:$0xff] %v8009_v57  ;;  %v8022_v27 = vpop.permute.xlu0 %5741  ;;  %v8024_v6 = vpop.permute.xlu1 %5791 }
 0xa70   : > { %4759 = vperm.xlu0 %5533, %v4755_v10   ;;  %v3634_v10 = vsel %vm1570_vm8, %v5628_v37, %v5629_v13  ;;  %v5654_v13 = vunpack.i.h.bf16 %v7783_v11 }
 0xa71   : > { %4764 = vperm.xlu1 %5534, %v4756_v34  }
 0xa72   : > { %v5747_v29 = vpop.permute.xlu0 %5746  ;;  %v8031_v26 = vpop.permute.xlu1 %5801 }
 0xa73   : > { %v5749_v42 = vunpack.i.h.bf16 %v5747_v29  ;;  %v5748_v43 = vunpack.i.l.bf16 %v5747_v29 }
 0xa75   : > { %v3631_v34 = vsel %vm1570_vm8, %v5754_v24, %v5748_v43  ;;  %v3632_v28 = vsel %vm1570_vm8, %v5748_v43, %v5749_v42  ;;  %v5764_v42 = vunpack.i.h.bf16 %v7962_v52 }
 0xa76   : > { %v5757_v36 = vpop.permute.xlu0 %5756  ;;  %v5807_v8 = vpop.permute.xlu1 %5806 }
 0xa77   : > { %v5809_v32 = vunpack.i.h.bf16 %v5807_v8  ;;  %v5808_v39 = vunpack.i.l.bf16 %v5807_v8  ;;  %v3636_v8 = vsel %vm1570_vm8, %v8643_v5, %v5574_v7  ;;  %v5759_v57 = vunpack.i.h.bf16 %v5757_v36 }
 0xa78   : > { %v5758_v31 = vunpack.i.l.bf16 %v5757_v36  ;;  %v5377_v24 = vpack.c.bf16 %v3636_v8, %v3634_v10  ;;  %v5659_v7 = vunpack.i.h.bf16 %v7823_v63  ;;  %v5658_v36 = vunpack.i.l.bf16 %v7823_v63 }
 0xa79   : > { %v3629_v40 = vsel %vm1570_vm8, %v5753_v3, %v5808_v39  ;;  %v3630_v29 = vsel %vm1570_vm8, %v5808_v39, %v5809_v32  ;;  %v5714_v3 = vunpack.i.h.bf16 %v7942_v30  ;;  %v5713_v39 = vunpack.i.l.bf16 %v7942_v30 }
 0xa7a   : > { %v5375_v25 = vpack.c.bf16 %v3631_v34, %v3629_v40  ;;  %v5772_v47 = vpop.permute.xlu0 %5771  ;;  %v5812_v35 = vpop.permute.xlu1 %5811  ;;  %v5373_v45 = vpack.c.bf16 %v3632_v28, %v3630_v29  ;;  %v5763_v40 = vunpack.i.l.bf16 %v7962_v52  ;;  %v3639_v10 = vsel %vm1570_vm8, %v5764_v42, %v5758_v31 }
 0xa7b   : > { %v5814_v23 = vunpack.i.h.bf16 %v5812_v35  ;;  %v5813_v37 = vunpack.i.l.bf16 %v5812_v35  ;;  %v5653_v35 = vunpack.i.l.bf16 %v7783_v11  ;;  %v3802_v43 = vsel %vm1592_vm9, %v5713_v39, %v5714_v3 }
 0xa7c   : > { %5374 = vmatprep.subr.bf16.mxu0 %v5373_v45  ;;  %v3640_v45 = vsel %vm1570_vm8, %v5758_v31, %v5759_v57  ;;  %v5803_v52 = vunpack.i.l.bf16 %v8031_v26  ;;  %v5804_v3 = vunpack.i.h.bf16 %v8031_v26  ;;  %v5773_v26 = vunpack.i.l.bf16 %v5772_v47 }
 0xa7d   : > { %5376 = vmatpush1.bf16.msra.mxu0 %v5375_v25  ;;  %v3638_v32 = vsel %vm1570_vm8, %v5813_v37, %v5814_v23  ;;  %v3637_v30 = vsel %vm1570_vm8, %v5763_v40, %v5813_v37  ;;  %v8644_v23 = vpack.c.bf16 %v7664_v46, %v7774_v56  ;;  %v3804_v46 = vsel %vm1592_vm9, %v5653_v35, %v5654_v13 }
 0xa7e   : > { %v8051_v28 = vpop.permute.xlu0 %5781  ;;  %v8053_v4 = vpop.permute.xlu1 %5826  ;;  %5378 = vmatprep.subr.bf16.mxu0 %v5377_v24  ;;  %v5381_v25 = vpack.c.bf16 %v3640_v45, %v3638_v32  ;;  %v5383_v34 = vpack.c.bf16 %v3639_v10, %v3637_v30  ;;  %v3801_v56 = vsel %vm1592_vm9, %v5658_v36, %v5713_v39  ;;  %v5385_v5 = vpack.c.bf16 %v3804_v46, %v3802_v43 }
 0xa7f   : > { %v3803_v8 = vsel %vm1592_vm9, %v5659_v7, %v5653_v35  ;;  %v5769_v39 = vunpack.i.h.bf16 %v7986_v14  ;;  %v5768_v40 = vunpack.i.l.bf16 %v7986_v14  ;;  %v5774_v13 = vunpack.i.h.bf16 %v5772_v47 }
 0xa80   : > { %v5387_v24 = vpack.c.bf16 %v3803_v8, %v3801_v56  ;;  %v5779_v56 = vunpack.i.h.bf16 %v8003_v62 }
 0xa81   : > { %5380 = vmatpush1.bf16.msra.mxu0 %v8644_v23  ;;  %v3135_v43 = vsel %vm1491_vm4, %v5774_v13, %v5768_v40  ;;  %v3136_v36 = vsel %vm1491_vm4, %v5768_v40, %v5769_v39  ;;  %v5784_v13 = vunpack.i.h.bf16 %v8051_v28  ;;  %v5783_v39 = vunpack.i.l.bf16 %v8051_v28 }
 0xa82   : > { %v8067_v11 = vpop.permute.xlu0 %5786  ;;  %v8069_v57 = vpop.permute.xlu1 %5831  ;;  %5382 = vmatprep.subr.bf16.mxu0 %v5381_v25  ;;  %v8647_v28 = vunpack.i.l.bf16 %v7984_v15 }
 0xa83   : > { %v5833_v29 = vunpack.i.l.bf16 %v8069_v57 }
 0xa85   : > { %v8078_v63 = vsel %vm1632_vm11, %v5803_v52, %v5833_v29  ;;  %5384 = vmatpush1.bf16.msra.mxu0 %v5383_v34 }
 0xa86   : > { %v8081_v31 = vpop.permute.xlu0 %5796  ;;  %v8083_v37 = vpop.permute.xlu1 %5841  ;;  %5386 = vmatprep.subr.bf16.mxu0 %v5385_v5  ;;  %v5778_v5 = vunpack.i.l.bf16 %v8003_v62  ;;  %v5694_v62 = vunpack.i.h.bf16 %v7860_v19 }
 0xa87   : > { %v5798_v32 = vunpack.i.l.bf16 %v8081_v31 }
 0xa89   : > { %v8092_v45 = vsel %vm1632_vm11, %v5804_v3, %v5798_v32  ;;  %5388 = vmatpush1.bf16.msra.mxu0 %v5387_v24  ;;  %v5734_v24 = vunpack.i.h.bf16 %v7984_v15 }
 0xa8a   : > { %v5431_v35 = vpack.c.bf16 %v8092_v45, %v8078_v63  ;;  %v5817_v42 = vpop.permute.xlu0 %5816  ;;  %v8096_v30 = vpop.permute.xlu1 %5851  ;;  %v4353_v45 = vld [vmem:[%s8428_s18 + $0x40] sm:$0xff] }
 0xa8b   : > { %v5819_v25 = vunpack.i.h.bf16 %v5817_v42  ;;  %v5818_v23 = vunpack.i.l.bf16 %v5817_v42 }
 0xa8d   : > { %v3133_v14 = vsel %vm1491_vm4, %v5773_v26, %v5818_v23  ;;  %v3134_v7 = vsel %vm1491_vm4, %v5818_v23, %v5819_v25  ;;  %v8645_v26 = vpack.c.bf16 %v7819_v21, %v7814_v50  ;;  %v3144_v25 = vsel %vm1491_vm4, %v5778_v5, %v5779_v56 }
 0xa8e   : > { %v5327_v10 = vpack.c.bf16 %v3135_v43, %v3133_v14  ;;  %v5822_v52 = vpop.permute.xlu0 %5821  ;;  %v8102_v34 = vpop.permute.xlu1 %5861  ;;  %v5325_v46 = vpack.c.bf16 %v3136_v36, %v3134_v7  ;;  %v8646_v14 = vpack.c.bf16 %v7691_v12, %v7810_v38  ;;  %v3306_v7 = vsel %vm1529_vm5, %v8647_v28, %v5734_v24 }
 0xa8f   : > { %v5824_v47 = vunpack.i.h.bf16 %v5822_v52  ;;  %v5823_v8 = vunpack.i.l.bf16 %v5822_v52  ;;  %v3143_v36 = vsel %vm1491_vm4, %v5784_v13, %v5778_v5  ;;  %v8648_v52 = vunpack.i.l.bf16 %v7860_v19 }
 0xa90   : > { %5326 = vmatprep.subr.bf16.mxu1 %v5325_v46  ;;  %v5719_v38 = vunpack.i.h.bf16 %v7960_v33  ;;  %v5664_v24 = vunpack.i.h.bf16 %v7804_v48  ;;  %v5844_v13 = vunpack.i.h.bf16 %v8083_v37 }
 0xa91   : > { %5328 = vmatpush1.bf16.msra.mxu1 %v5327_v10  ;;  %v3142_v3 = vsel %vm1491_vm4, %v5823_v8, %v5824_v47  ;;  %v3141_v23 = vsel %vm1491_vm4, %v5783_v39, %v5823_v8  ;;  %v3308_v46 = vsel %vm1529_vm5, %v8648_v52, %v5694_v62  ;;  %v8649_v8 = vpack.c.bf16 %v7907_v1, %v7995_v18 }
 0xa92   : > { %v5837_v40 = vpop.permute.xlu0 %5836  ;;  %v8110_v42 = vpop.permute.xlu1 %5871  ;;  %5330 = vmatprep.subr.bf16.mxu1 %v8645_v26  ;;  %v5333_v43 = vpack.c.bf16 %v3144_v25, %v3142_v3  ;;  %v5335_v21 = vpack.c.bf16 %v3143_v36, %v3141_v23  ;;  %v5337_v56 = vpack.c.bf16 %v3308_v46, %v3306_v7  ;;  %v5843_v39 = vunpack.i.l.bf16 %v8083_v37 }
 0xa93   : > { %v5839_v15 = vunpack.i.h.bf16 %v5837_v40  ;;  %v5838_v5 = vunpack.i.l.bf16 %v5837_v40  ;;  %v8650_v25 = vunpack.i.l.bf16 %v7960_v33  ;;  %v8651_v36 = vunpack.i.l.bf16 %v7804_v48 }
 0xa95   : > { %5332 = vmatpush1.bf16.msra.mxu1 %v8646_v14  ;;  %v3810_v23 = vsel %vm1592_vm9, %v8650_v25, %v5719_v38  ;;  %v3807_v40 = vsel %vm1592_vm9, %v5844_v13, %v5838_v5  ;;  %v3812_v33 = vsel %vm1592_vm9, %v8651_v36, %v5664_v24  ;;  %v8652_v24 = vpack.c.bf16 %v7854_v0, %v7978_v61 }
 0xa96   : > { %v5847_v10 = vpop.permute.xlu0 %5846  ;;  %v8125_v50 = vpop.permute.xlu1 %5876  ;;  %5334 = vmatprep.subr.bf16.mxu1 %v5333_v43  ;;  %v3808_v43 = vsel %vm1592_vm9, %v5838_v5, %v5839_v15  ;;  %v5854_v15 = vunpack.i.h.bf16 %v8096_v30  ;;  %v5853_v5 = vunpack.i.l.bf16 %v8096_v30  ;;  %v8653_v0 = vpack.c.bf16 %v7902_v9, %v7914_v55 }
 0xa97   : > { %v5849_v52 = vunpack.i.h.bf16 %v5847_v10  ;;  %v5848_v46 = vunpack.i.l.bf16 %v5847_v10  ;;  %v8654_v36 = vpack.c.bf16 %v7869_v20, %v7910_v51 }
 0xa99   : > { %5336 = vmatpush1.bf16.msra.mxu1 %v5335_v21  ;;  %v5393_v21 = vpack.c.bf16 %v3812_v33, %v3810_v23  ;;  %v3815_v13 = vsel %vm1592_vm9, %v5854_v15, %v5848_v46  ;;  %v5788_v15 = vunpack.i.l.bf16 %v8067_v11 }
 0xa9a   : > { %v8130_v47 = vpop.permute.xlu0 %5856  ;;  %v8132_v12 = vpop.permute.xlu1 %5886  ;;  %5338 = vmatprep.subr.bf16.mxu1 %v5337_v56 }
 0xa9b   : > { %v5859_v23 = vunpack.i.h.bf16 %v8130_v47 }
 0xa9d   : > { %5340 = vmatpush1.bf16.msra.mxu1 %v8649_v8 }
 0xa9e   : > { %v8139_v19 = vpop.permute.xlu0 %5866  ;;  %v5897_v3 = vpop.permute.xlu1 %5896 }
 0xa9f   : > { %v5899_v26 = vunpack.i.h.bf16 %v5897_v3  ;;  %v5898_v62 = vunpack.i.l.bf16 %v5897_v3  ;;  %v5869_v20 = vunpack.i.h.bf16 %v8139_v19  ;;  %v5868_v51 = vunpack.i.l.bf16 %v8139_v19 }
 0xaa0   : > { %v5873_v19 = vunpack.i.l.bf16 %v8110_v42 }
 0xaa1   : > { %v3805_v1 = vsel %vm1592_vm9, %v5843_v39, %v5898_v62  ;;  %v3806_v18 = vsel %vm1592_vm9, %v5898_v62, %v5899_v26  ;;  %v3816_v39 = vsel %vm1592_vm9, %v5848_v46, %v5849_v52 }
 0xaa2   : > { %v5391_v14 = vpack.c.bf16 %v3807_v40, %v3805_v1  ;;  %v8150_v28 = vpop.permute.xlu0 %5881  ;;  %v8152_v7 = vpop.permute.xlu1 %5901  ;;  %v5389_v37 = vpack.c.bf16 %v3808_v43, %v3806_v18  ;;  %v5858_v40 = vunpack.i.l.bf16 %v8130_v47  ;;  %v5864_v18 = vunpack.i.h.bf16 %v8102_v34 }
 0xaa3   : > { %v5863_v43 = vunpack.i.l.bf16 %v8102_v34 }
 0xaa4   : > { %5390 = vmatprep.subr.bf16.mxu0 %v5389_v37  ;;  %v3983_v33 = vsel %vm1615_vm10, %v5864_v18, %v5858_v40  ;;  %v3984_v55 = vsel %vm1615_vm10, %v5858_v40, %v5859_v23  ;;  %v5879_v23 = vunpack.i.h.bf16 %v8125_v50  ;;  %v5878_v40 = vunpack.i.l.bf16 %v8125_v50 }
 0xaa5   : > { %5392 = vmatpush1.bf16.msra.mxu0 %v5391_v14  ;;  %v3992_v18 = vsel %vm1615_vm10, %v5868_v51, %v5869_v20  ;;  %v5793_v50 = vunpack.i.l.bf16 %v8024_v6 }
 0xaa6   : > { %v8157_v56 = vpop.permute.xlu0 %5891  ;;  %v5912_v38 = vpop.permute.xlu1 %5911  ;;  %5394 = vmatprep.subr.bf16.mxu0 %v5393_v21 }
 0xaa7   : > { %v5914_v8 = vunpack.i.h.bf16 %v5912_v38  ;;  %v5913_v3 = vunpack.i.l.bf16 %v5912_v38  ;;  %v5789_v38 = vunpack.i.h.bf16 %v8067_v11  ;;  %v8655_v11 = vpack.c.bf16 %v7938_v17, %v7935_v41 }
 0xaa8   : > { %v8656_v41 = vpack.c.bf16 %v7887_v16, %v7931_v59  ;;  %v5903_v16 = vunpack.i.l.bf16 %v8152_v7 }
 0xaa9   : > { %v3813_v48 = vsel %vm1592_vm9, %v5853_v5, %v5913_v3  ;;  %5396 = vmatpush1.bf16.msra.mxu0 %v8652_v24  ;;  %v3814_v10 = vsel %vm1592_vm9, %v5913_v3, %v5914_v8  ;;  %v5744_v8 = vunpack.i.h.bf16 %v8022_v27  ;;  %v5743_v3 = vunpack.i.l.bf16 %v8022_v27 }
 0xaaa   : > { %v5399_v26 = vpack.c.bf16 %v3815_v13, %v3813_v48  ;;  %v8168_v62 = vpop.permute.xlu0 %5906  ;;  %v8170_v25 = vpop.permute.xlu1 %5916  ;;  %v5397_v30 = vpack.c.bf16 %v3816_v39, %v3814_v10  ;;  %v5829_v13 = vunpack.i.h.bf16 %v8053_v4  ;;  %v5828_v48 = vunpack.i.l.bf16 %v8053_v4 }
 0xaab   : > { %v5874_v10 = vunpack.i.h.bf16 %v8110_v42  ;;  %v8659_v27 = vpack.c.bf16 %v8018_v2, %v8015_v54 }
 0xaac   : > { %5398 = vmatprep.subr.bf16.mxu0 %v5397_v30  ;;  %v5799_v30 = vunpack.i.h.bf16 %v8081_v31  ;;  %v4126_v59 = vsel %vm1632_vm11, %v5828_v48, %v5829_v13  ;;  %v5909_v13 = vunpack.i.h.bf16 %v8168_v62  ;;  %v5894_v31 = vunpack.i.h.bf16 %v8157_v56 }
 0xaad   : > { %5400 = vmatpush1.bf16.msra.mxu0 %v5399_v26  ;;  %v3991_v4 = vsel %vm1615_vm10, %v5874_v10, %v5868_v51  ;;  %v3312_v51 = vsel %vm1529_vm5, %v5878_v40, %v5879_v23  ;;  %v5888_v10 = vunpack.i.l.bf16 %v8132_v12  ;;  %v8658_v23 = vpack.c.bf16 %v7704_v22, %v7745_v49 }
 0xaae   : > { %v8174_v1 = vpop.permute.xlu0 %5921  ;;  %5402 = vmatprep.subr.bf16.mxu0 %v8653_v0  ;;  %v4128_v0 = vsel %vm1632_vm11, %v5788_v15, %v5789_v38  ;;  %v5883_v38 = vunpack.i.l.bf16 %v8150_v28 }
 0xaaf   : > { %v5927_v61 = vpop.permute.xlu1 %5926 }
 0xab0   : > { %v5929_v14 = vunpack.i.h.bf16 %v5927_v61  ;;  %v5928_v37 = vunpack.i.l.bf16 %v5927_v61 }
 0xab1   : > { %5404 = vmatpush1.bf16.msra.mxu0 %v8654_v36 }
 0xab2   : > { %v3981_v47 = vsel %vm1615_vm10, %v5863_v43, %v5928_v37  ;;  %v8186_v21 = vpop.permute.xlu0 %5946  ;;  %v3982_v9 = vsel %vm1615_vm10, %v5928_v37, %v5929_v14  ;;  %v5794_v43 = vunpack.i.h.bf16 %v8024_v6  ;;  %v5421_v6 = vpack.c.bf16 %v4128_v0, %v4126_v59 }
 0xab3   : > { %v5407_v52 = vpack.c.bf16 %v3983_v33, %v3981_v47  ;;  %v8190_v46 = vpop.permute.xlu1 %5931  ;;  %v5405_v34 = vpack.c.bf16 %v3984_v55, %v3982_v9  ;;  %v5884_v33 = vunpack.i.h.bf16 %v8150_v28  ;;  %v5904_v47 = vunpack.i.h.bf16 %v8152_v7 }
 0xab4   : > { %v4125_v9 = vsel %vm1632_vm11, %v5793_v50, %v5828_v48  ;;  %v4127_v55 = vsel %vm1632_vm11, %v5794_v43, %v5788_v15  ;;  %v8237_v7 = vsel %vm1632_vm11, %v5798_v32, %v5799_v30  ;;  %v5908_v15 = vunpack.i.l.bf16 %v8168_v62 }
 0xab5   : > { %5406 = vmatprep.subr.bf16.mxu0 %v5405_v34  ;;  %v5889_v34 = vunpack.i.h.bf16 %v8132_v12  ;;  %v8657_v28 = vpack.c.bf16 %v7742_v58, %v7750_v53  ;;  %v8250_v32 = vsel %vm1553_vm6, %v5903_v16, %v5904_v47  ;;  %v5918_v62 = vunpack.i.l.bf16 %v8170_v25 }
 0xab6   : > { %5408 = vmatpush1.bf16.msra.mxu0 %v5407_v52  ;;  %v8196_v5 = vpop.permute.xlu0 %5951  ;;  %v5834_v52 = vunpack.i.h.bf16 %v8069_v57  ;;  %v5924_v58 = vunpack.i.h.bf16 %v8174_v1  ;;  %v5923_v53 = vunpack.i.l.bf16 %v8174_v1  ;;  %v5933_v1 = vunpack.i.l.bf16 %v8190_v46 }
 0xab7   : > { %v5937_v24 = vpop.permute.xlu1 %5936  ;;  %5410 = vmatprep.subr.bf16.mxu0 %v8655_v11  ;;  %v5423_v22 = vpack.c.bf16 %v4127_v55, %v4125_v9  ;;  %v3320_v43 = vsel %vm1529_vm5, %v5888_v10, %v5889_v34  ;;  %v8660_v59 = vpack.c.bf16 %v7790_v60, %v7786_v44  ;;  %v5954_v54 = vunpack.i.h.bf16 %v8196_v5 }
 0xab8   : > { %v5939_v39 = vunpack.i.h.bf16 %v5937_v24  ;;  %v5938_v26 = vunpack.i.l.bf16 %v5937_v24  ;;  %v4134_v49 = vsel %vm1632_vm11, %v5833_v29, %v5834_v52  ;;  %v5953_v2 = vunpack.i.l.bf16 %v8196_v5 }
 0xaba   : > { %v3989_v61 = vsel %vm1615_vm10, %v5873_v19, %v5938_v26  ;;  %5412 = vmatpush1.bf16.msra.mxu0 %v8656_v41  ;;  %v8216_v17 = vpop.permute.xlu0 %5961  ;;  %v3990_v42 = vsel %vm1615_vm10, %v5938_v26, %v5939_v39  ;;  %v3311_v19 = vsel %vm1529_vm5, %v5884_v33, %v5878_v40  ;;  %v5919_v39 = vunpack.i.h.bf16 %v8170_v25 }
 0xabb   : > { %v5415_v14 = vpack.c.bf16 %v3991_v4, %v3989_v61  ;;  %v8222_v37 = vpop.permute.xlu1 %5941  ;;  %v5413_v36 = vpack.c.bf16 %v3992_v18, %v3990_v42  ;;  %v8266_v25 = vsel %vm1553_vm6, %v5908_v15, %v5743_v3  ;;  %v8269_v4 = vsel %vm1553_vm6, %v5909_v13, %v5903_v16  ;;  %v8664_v13 = vld [vmem:[#allocation15_spill] sm:$0xff]  ;;  %v8665_v15 = vld [vmem:[#allocation16_spill] sm:$0xff] }
 0xabc   : > { %v5934_v61 = vunpack.i.h.bf16 %v8190_v46  ;;  %v3482_v42 = vsel %vm1553_vm6, %v5743_v3, %v5744_v8  ;;  %v3319_v18 = vsel %vm1529_vm5, %v5894_v31, %v5888_v10  ;;  %v5429_v46 = vpack.c.bf16 %v8237_v7, %v4134_v49 }
 0xabd   : > { %5414 = vmatprep.subr.bf16.mxu0 %v5413_v36  ;;  %v5353_v50 = vpack.c.bf16 %v8250_v32, %v3482_v42  ;;  %v5355_v57 = vpack.c.bf16 %v8269_v4, %v8266_v25  ;;  %v4298_v8 = vsel %vm1654_vm12, %v5918_v62, %v5919_v39  ;;  %v4300_v3 = vsel %vm1654_vm12, %v5923_v53, %v5924_v58 }
 0xabe   : > { %5416 = vmatpush1.bf16.msra.mxu0 %v5415_v14  ;;  %v5972_v20 = vpop.permute.xlu0 %5971  ;;  %v5893_v14 = vunpack.i.l.bf16 %v8157_v56  ;;  %v8296_v36 = vsel %vm1654_vm12, %v5934_v61, %v5923_v53  ;;  %v8299_v33 = vsel %vm1654_vm12, %v5933_v1, %v5918_v62  ;;  %v5964_v9 = vunpack.i.h.bf16 %v8216_v17 }
 0xabf   : > { %v5974_v48 = vunpack.i.h.bf16 %v5972_v20  ;;  %v5973_v24 = vunpack.i.l.bf16 %v5972_v20  ;;  %v8241_v11 = vpop.permute.xlu1 %5956  ;;  %5418 = vmatprep.subr.bf16.mxu0 %v8657_v28  ;;  %v5963_v55 = vunpack.i.l.bf16 %v8216_v17  ;;  %v5944_v52 = vunpack.i.h.bf16 %v8222_v37  ;;  %v8662_v20 = vld [vmem:[#allocation20_spill] sm:$0xff] }
 0xac0   : > { %v5959_v60 = vunpack.i.h.bf16 %v8241_v11  ;;  %v8666_v17 = vpack.c.bf16 %v8664_v13, %v8665_v15  ;;  %v5433_v31 = vpack.c.bf16 %v4300_v3, %v4298_v8  ;;  %v5948_v32 = vunpack.i.l.bf16 %v8186_v21 }
 0xac1   : > { %v3309_v26 = vsel %vm1529_vm5, %v5883_v38, %v5973_v24  ;;  %v3310_v30 = vsel %vm1529_vm5, %v5973_v24, %v5974_v48  ;;  %v8661_v38 = vld [vmem:[#allocation18_spill] sm:$0xff]  ;;  %v5949_v24 = vunpack.i.h.bf16 %v8186_v21  ;;  %v5435_v39 = vpack.c.bf16 %v8296_v36, %v8299_v33 }
 0xac2   : > { %v5343_v12 = vpack.c.bf16 %v3311_v19, %v3309_v26  ;;  %5420 = vmatpush1.bf16.msra.mxu0 %v8658_v23  ;;  %v8261_v40 = vpop.permute.xlu0 %5976  ;;  %v5341_v0 = vpack.c.bf16 %v3312_v51, %v3310_v30  ;;  %v8663_v51 = vpack.c.bf16 %v8661_v38, %v8662_v20  ;;  %v4304_v62 = vsel %vm1654_vm12, %v5953_v2, %v5954_v54 }
 0xac3   : > { %v8273_v41 = vpop.permute.xlu1 %5966  ;;  %5422 = vmatprep.subr.bf16.mxu0 %v5421_v6  ;;  %v5943_v6 = vunpack.i.l.bf16 %v8222_v37  ;;  %v5978_v5 = vunpack.i.l.bf16 %v8261_v40  ;;  %v3490_v26 = vsel %vm1553_vm6, %v5963_v55, %v5964_v9  ;;  %v4303_v23 = vsel %vm1654_vm12, %v5959_v60, %v5953_v2  ;;  %v4352_v9 = vld [vmem:[%s8428_s18 + $0x38] sm:$0xff] }
 0xac4   : > { %5342 = vmatprep.subr.bf16.mxu1 %v5341_v0  ;;  %v5969_v28 = vunpack.i.h.bf16 %v8273_v41  ;;  %v5968_v10 = vunpack.i.l.bf16 %v8273_v41  ;;  %v5958_v21 = vunpack.i.l.bf16 %v8241_v11  ;;  %v5979_v0 = vunpack.i.h.bf16 %v8261_v40  ;;  %v4347_v41 = vld [vmem:[%s8428_s18 + $0x10] sm:$0xff] }
 0xac5   : > { %5344 = vmatpush1.bf16.msra.mxu1 %v5343_v12  ;;  %v3487_v30 = vsel %vm1553_vm6, %v5949_v24, %v5943_v6  ;;  %v3488_v12 = vsel %vm1553_vm6, %v5943_v6, %v5944_v52  ;;  %v3489_v61 = vsel %vm1553_vm6, %v5978_v5, %v5963_v55  ;;  %v8667_v15 = vmov 0.0  }
 0xac6   : > { %5424 = vmatpush1.bf16.msra.mxu0 %v5423_v22  ;;  %v5987_v29 = vpop.permute.xlu0 %5986  ;;  %5346 = vmatprep.subr.bf16.mxu1 %v8659_v27  ;;  %v3492_v11 = vsel %vm1553_vm6, %v5968_v10, %v5969_v28 }
 0xac7   : > { %v5989_v56 = vunpack.i.h.bf16 %v5987_v29  ;;  %v5988_v47 = vunpack.i.l.bf16 %v5987_v29  ;;  %v8301_v16 = vpop.permute.xlu1 %5981  ;;  %5426 = vmatprep.subr.bf16.mxu0 %v8660_v59  ;;  %v5361_v25 = vpack.c.bf16 %v3492_v11, %v3490_v26 }
 0xac8   : > { %v5984_v22 = vunpack.i.h.bf16 %v8301_v16  ;;  %v5983_v40 = vunpack.i.l.bf16 %v8301_v16 }
 0xac9   : > { %v3317_v34 = vsel %vm1529_vm5, %v5893_v14, %v5988_v47  ;;  %5348 = vmatpush1.bf16.msra.mxu1 %v8663_v51  ;;  %v3318_v44 = vsel %vm1529_vm5, %v5988_v47, %v5989_v56  ;;  %v3491_v56 = vsel %vm1553_vm6, %v5979_v0, %v5968_v10  ;;  %v4351_v0 = vld [vmem:[%s8428_s18 + $0x30] sm:$0xff] }
 0xaca   : > { %v5351_v7 = vpack.c.bf16 %v3319_v18, %v3317_v34  ;;  %5428 = vmatpush1.bf16.msra.mxu0 %v8666_v17  ;;  %v8322_v48 = vpop.permute.xlu0 %5991  ;;  %v5349_v37 = vpack.c.bf16 %v3320_v43, %v3318_v44  ;;  %v4306_v2 = vsel %vm1654_vm12, %v5983_v40, %v5984_v22  ;;  %v5363_v38 = vpack.c.bf16 %v3491_v56, %v3489_v61  ;;  %v4354_v22 = vld [vmem:[%s8428_s18 + $0x48] sm:$0xff] }
 0xacb   : > { %v5997_v19 = vpop.permute.xlu1 %5996  ;;  %5430 = vmatprep.subr.bf16.mxu0 %v5429_v46  ;;  %v5994_v58 = vunpack.i.h.bf16 %v8322_v48  ;;  %v5993_v53 = vunpack.i.l.bf16 %v8322_v48 }
 0xacc   : > { %5350 = vmatprep.subr.bf16.mxu1 %v5349_v37  ;;  %v5999_v46 = vunpack.i.h.bf16 %v5997_v19 }
 0xacd   : > { %5352 = vmatpush1.bf16.msra.mxu1 %v5351_v7  ;;  %v4308_v29 = vsel %vm1654_vm12, %v5993_v53, %v5994_v58 }
 0xace   : > { %5432 = vmatpush1.bf16.msra.mxu0 %v5431_v35  ;;  %v6002_v1 = vpop.permute.xlu0 %6001  ;;  %5354 = vmatprep.subr.bf16.mxu1 %v5353_v50  ;;  %v5998_v35 = vunpack.i.l.bf16 %v5997_v19  ;;  %v4307_v55 = vsel %vm1654_vm12, %v5999_v46, %v5993_v53  ;;  %v5441_v6 = vpack.c.bf16 %v4308_v29, %v4306_v2 }
 0xacf   : > { %v6004_v49 = vunpack.i.h.bf16 %v6002_v1  ;;  %v6003_v42 = vunpack.i.l.bf16 %v6002_v1  ;;  %v6007_v18 = vpop.permute.xlu1 %6006  ;;  %5434 = vmatprep.subr.bf16.mxu0 %v5433_v31  ;;  %v4350_v1 = vld [vmem:[%s8428_s18 + $0x28] sm:$0xff] }
 0xad0   : > { %v6009_v43 = vunpack.i.h.bf16 %v6007_v18  ;;  %v6008_v63 = vunpack.i.l.bf16 %v6007_v18  ;;  %v4305_v52 = vsel %vm1654_vm12, %v5998_v35, %v5983_v40 }
 0xad1   : > { %v3485_v50 = vsel %vm1553_vm6, %v5948_v32, %v6003_v42  ;;  %5356 = vmatpush1.bf16.msra.mxu1 %v5355_v57  ;;  %4660 = vmatmul.mubr.f32.vlgmr.msra.gmra.mrb[22].mxu0 %v4347_v41  ;;  %v3486_v14 = vsel %vm1553_vm6, %v6003_v42, %v6004_v49  ;;  %v5443_v5 = vpack.c.bf16 %v4307_v55, %v4305_v52  ;;  %v4349_v41 = vld [vmem:[%s8428_s18 + $0x20] sm:$0xff] }
 0xad2   : > { %v5359_v27 = vpack.c.bf16 %v3487_v30, %v3485_v50  ;;  %v4301_v8 = vsel %vm1654_vm12, %v5958_v21, %v6008_v63  ;;  %5436 = vmatpush1.bf16.msra.mxu0 %v5435_v39  ;;  %v6017_v3 = vpop.permute.xlu0 %6016  ;;  %v5357_v36 = vpack.c.bf16 %v3488_v12, %v3486_v14  ;;  %v4302_v33 = vsel %vm1654_vm12, %v6008_v63, %v6009_v43  ;;  %v4345_v30 = vld [vmem:[%s8428_s18] sm:$0xff] }
 0xad3   : > { %v5439_v47 = vpack.c.bf16 %v4303_v23, %v4301_v8  ;;  %v6012_v16 = vpop.permute.xlu1 %6011  ;;  %v5437_v59 = vpack.c.bf16 %v4304_v62, %v4302_v33  ;;  %4665 = vmatprep.mubr.f32.mxu0 %v4353_v45  ;;  %v6019_v4 = vunpack.i.h.bf16 %v6017_v3  ;;  %v6018_v20 = vunpack.i.l.bf16 %v6017_v3 }
 0xad4   : > { %v6014_v57 = vunpack.i.h.bf16 %v6012_v16  ;;  %v6013_v54 = vunpack.i.l.bf16 %v6012_v16  ;;  %5358 = vmatprep.subr.bf16.mxu1 %v5357_v36 }
 0xad5   : > { %5438 = vmatprep.subr.bf16.mxu0 %v5437_v59  ;;  %5360 = vmatpush1.bf16.msra.mxu1 %v5359_v27 }
 0xad6   : > { %5440 = vmatpush1.bf16.msra.mxu0 %v5439_v47  ;;  %v6022_v34 = vpop.permute.xlu0 %6021  ;;  %5362 = vmatprep.subr.bf16.mxu1 %v5361_v25  ;;  %v3495_v7 = vsel %vm1553_vm6, %v6019_v4, %v6013_v54  ;;  %v3496_v13 = vsel %vm1553_vm6, %v6013_v54, %v6014_v57  ;;  %v4753_v57 = vld [vmem:[%s8430_s20] sm:$0xff]  ;;  %v4754_v54 = vld [vmem:[%s8430_s20 + $0x8] sm:$0xff] }
 0xad7   : > { %v6024_v51 = vunpack.i.h.bf16 %v6022_v34  ;;  %v6023_v44 = vunpack.i.l.bf16 %v6022_v34  ;;  %v6032_v60 = vpop.permute.xlu1 %6031  ;;  %5442 = vmatprep.subr.bf16.mxu0 %v5441_v6  ;;  %4666 = vmatmul.mubr.f32.gmra.mrb[24].mxu0 %v4352_v9 }
 0xad8   : > { %4736 = vmatprep.mubr.f32.mxu0 %v8667_v15  ;;  %v6034_v48 = vunpack.i.h.bf16 %v6032_v60  ;;  %v6033_v37 = vunpack.i.l.bf16 %v6032_v60 }
 0xad9   : > { %v3493_v17 = vsel %vm1553_vm6, %v6018_v20, %v6023_v44  ;;  %5364 = vmatpush1.bf16.msra.mxu1 %v5363_v38  ;;  %v3494_v24 = vsel %vm1553_vm6, %v6023_v44, %v6024_v51 }
 0xada   : > { %v5367_v28 = vpack.c.bf16 %v3495_v7, %v3493_v17  ;;  %5444 = vmatpush1.bf16.msra.mxu0 %v5443_v5  ;;  %v6027_v10 = vpop.permute.xlu0 %6026  ;;  %v5365_v19 = vpack.c.bf16 %v3496_v13, %v3494_v24  ;;  %v4310_v58 = vsel %vm1654_vm12, %v6033_v37, %v6034_v48 }
 0xadb   : > { %v6029_v31 = vunpack.i.h.bf16 %v6027_v10  ;;  %v6028_v32 = vunpack.i.l.bf16 %v6027_v10  ;;  %v6037_v39 = vpop.permute.xlu1 %6036 }
 0xadc   : > { %v6039_v62 = vunpack.i.h.bf16 %v6037_v39  ;;  %v6038_v26 = vunpack.i.l.bf16 %v6037_v39  ;;  %5366 = vmatprep.subr.bf16.mxu1 %v5365_v19 }
 0xadd   : > { %5368 = vmatpush1.bf16.msra.mxu1 %v5367_v28  ;;  %v4312_v53 = vsel %vm1654_vm12, %v6028_v32, %v6029_v31 }
 0xade   : > { %v4311_v12 = vsel %vm1654_vm12, %v6039_v62, %v6028_v32  ;;  %v4309_v23 = vsel %vm1654_vm12, %v6038_v26, %v6033_v37  ;;  %v5445_v21 = vpack.c.bf16 %v4312_v53, %v4310_v58 }
 0xadf   : > { %v5447_v61 = vpack.c.bf16 %v4311_v12, %v4309_v23 }
 0xae0   : > { %4583 = vmatmul.mubr.f32.vlgmr.msra.gmra.mrb[18].mxu1 %v4345_v30  ;;  %5446 = vmatprep.subr.bf16.mxu0 %v5445_v21 }
 0xae1   : > { %5448 = vmatpush1.bf16.msra.mxu0 %v5447_v61  ;;  %4588 = vmatprep.mubr.f32.mxu1 %v4351_v0 }
 0xae4   : > { %4589 = vmatmul.mubr.f32.gmra.mrb[20].mxu1 %v4350_v1  ;;  %5054 = vmatmul.mubr.msk.f32.vlgmr.msra.gmra.mrb[22].mxu0 %vm4511_vm0, %v4349_v41 }
 0xae5   : > { %4742 = vmatprep.mubr.f32.mxu0 %v8667_v15  ;;  %4837 = vmatprep.mubr.f32.mxu1 %v8667_v15 }
 0xae8   : > { %5055 = vmatmul.mubr.msk.f32.gmra.mrb[24].mxu0 %vm4511_vm0, %v4354_v22 }
 0xaeb   : > { %v4504_v18 = vpop.permute.xlu0 %4503 }
 0xaec   : > { %v4509_v50 = vpop.permute.xlu1 %4508 }
 0xaef   : > { %v4760_v2 = vpop.permute.xlu0 %4759 }
 0xaf0   : > { %v4765_v38 = vpop.permute.xlu1 %4764 }
 0xbb3   : > { %v4584_v49 = vpop.f32.mrb[18].mxu1 }
 0xbb4   : > { %v4586_v42 = vpop.f32.mrb[19].mxu1  ;;  %v4585_v11 = vadd.f32 %v4584_v49, %v4504_v18 }
 0xbb5   : > { %v4587_v40 = vadd.f32 %v4586_v42, %v4504_v18 }
 0xbb7   : > { %v4590_v46 = vpop.f32.mrb[20].mxu1  ;;  %v4738_v43 = vpop.f32.mrb[22].mxu0 }
 0xbb8   : > { %v5462_v63 = vadd.f32 %v4738_v43, %v4585_v11  ;;  %v4592_v45 = vpop.f32.mrb[21].mxu1  ;;  %v4740_v35 = vpop.f32.mrb[23].mxu0  ;;  %v4591_v29 = vadd.f32 %v4590_v46, %v4509_v50 }
 0xbb9   : > { %v5464_v14 = vadd.f32 %v4740_v35, %v4587_v40  ;;  %v4593_v27 = vadd.f32 %v4592_v45, %v4509_v50 }
 0xbba   : > { %v4749_v56 = vmax.f32 %v5462_v63, 0.0 }
 0xbbb   : > { %v4744_v8 = vpop.f32.mrb[24].mxu0  ;;  %v4750_v16 = vmax.f32 %v5464_v14, 0.0 }
 0xbbc   : > { %v5466_v3 = vadd.f32 %v4744_v8, %v4591_v29  ;;  %v4746_v36 = vpop.f32.mrb[25].mxu0 }
 0xbbd   : > { %v5468_v33 = vadd.f32 %v4746_v36, %v4593_v27 }
 0xbbe   : > { %v4751_v47 = vmax.f32 %v5466_v3, 0.0 }
 0xbbf   : > { %v4752_v59 = vmax.f32 %v5468_v33, 0.0 }
 0xbc0   : > { %v5451_v25 = vpack.c.bf16 %v4751_v47, %v4749_v56 }
 0xbc1   : > { %v5449_v4 = vpack.c.bf16 %v4752_v59, %v4750_v16 }
 0xbc3   : > { %5450 = vmatprep.subr.bf16.mxu1 %v5449_v4 }
 0xbc4   : > { %5452 = vmatpush1.bf16.msra.mxu1 %v5451_v25 }
 0xbc7   : > { %5056 = vmatmul.mubr.msk.f32.vlgmr.msra.gmra.mrb[22].mxu1 %vm1545_vm1, %v4753_v57 }
 0xbc8   : > { %4843 = vmatprep.mubr.f32.mxu1 %v8667_v15 }
 0xbcb   : > { %5057 = vmatmul.mubr.msk.f32.gmra.mrb[24].mxu1 %vm1545_vm1, %v4754_v54 }
 0xc9a   : > { %v4839_v9 = vpop.f32.mrb[22].mxu1 }
 0xc9b   : > { %v4840_v55 = vadd.f32 %v4839_v9, %v4760_v2  ;;  %v4841_v52 = vpop.f32.mrb[23].mxu1 }
 0xc9c   : > { %v4842_v6 = vadd.f32 %v4841_v52, %v4760_v2 }
 0xc9d   : > { %v4850_v34 = vmax.f32 %v4840_v55, 0.0 }
 0xc9e   : > { %v4851_v20 = vmax.f32 %v4842_v6, 0.0  ;;  %v4845_v51 = vpop.f32.mrb[24].mxu1 }
 0xc9f   : > { %4854 = vst [vmem:[%s730_s29] sm:$0xff] %v4850_v34  ;;  %v4846_v44 = vadd.f32 %v4845_v51, %v4765_v38  ;;  %v4847_v60 = vpop.f32.mrb[25].mxu1 }
 0xca0   : > { %4855 = vst [vmem:[%s730_s29 + $0x8] sm:$0xff] %v4851_v20  ;;  %v4848_v5 = vadd.f32 %v4847_v60, %v4765_v38 }
 0xca1   : > { %v4852_v7 = vmax.f32 %v4846_v44, 0.0 }
 0xca2   : > { %v4853_v13 = vmax.f32 %v4848_v5, 0.0 }
 0xca3   : > { %4856 = vst [vmem:[%s730_s29 + $0x10] sm:$0xff] %v4852_v7 }
 0xca4   : > { %4857 = vst [vmem:[%s730_s29 + $0x18] sm:$0xff] %v4853_v13 }
 0xca5 PF: > { %s8669_s28 = sld [smem:[#allocation11_spill]] }
 0xcab   : > { %s34_s3 = sadd.s32 1, %s8669_s28  }
 0xcac   : > { %p31_p5 = scmp.ge.s32.totalorder %s34_s3, 4  }
 0xcae   :  { %33 = sbr.rel (!%p31_p5) target bundleno = 11 (0xb), region = 151 }
 0xcb5   :  { %4879 = vsyncpa [#allocation6], 1 }
 0xcb6   :  { %4881 = vsyncpa [#allocation6 + $0x1], 1 }
 0xcb7   :  { %4882 = vsyncpa [#allocation8], 1 }

</bundles_post_ra>
